<compile_context>
chip_gen: v7x
topology: tpu7x:2x2x1
jax: 0.10.0
libtpu: 0.0.40
codegen_flags: <defaults>
</compile_context>

<pallas_src>
import functools

import numpy as np

import jax
import jax.numpy as jnp
from jax.experimental import pallas as pl
from jax.experimental.pallas import tpu as pltpu


# ----------------------------------------------------------------------------
# Fused kernel: one grid step == one batch tile
#   conv(+bias+ReLU) as one MXU matmul, folded fc1+fc2 as a second MXU matmul
# ----------------------------------------------------------------------------
def _fused_kernel(x_ref, mconv_ref, bconv_ref, wfc_ref, bfc_ref, o_ref):
    # conv3x3/pad=1 + bias + ReLU, expressed as (bt, Cin*HW) @ (Cin*HW, Cout*HW)
    x = x_ref[...].astype(jnp.bfloat16)
    h = jnp.dot(x, mconv_ref[...], preferred_element_type=jnp.float32)
    h = jnp.maximum(h + bconv_ref[...], 0.0)            # f32 epilogue on the VPU

    # folded Linear stack: (bt, Cout*HW) @ (Cout*HW, 128) + bias, lane-dense out
    out = jnp.dot(h.astype(jnp.bfloat16), wfc_ref[...],
                  preferred_element_type=jnp.float32) + bfc_ref[...]
    o_ref[...] = out


# ----------------------------------------------------------------------------
# One-time parameter prep (outside the jitted forward)
# ----------------------------------------------------------------------------
def build_conv_matrix(conv_w, h, w):
    """Dense operator M with  x.reshape(N,-1) @ M == conv2d(x, conv_w, stride=1,
    padding=same).reshape(N,-1)  for NCHW x / OIHW weights (C-major flatten)."""
    wnp = np.asarray(conv_w, np.float32)
    c_out, c_in, kh_sz, kw_sz = wnp.shape
    hw = h * w
    mat = np.zeros((c_in * hw, c_out * hw), np.float32)
    ho, wo = np.meshgrid(np.arange(h), np.arange(w), indexing="ij")
    ho, wo = ho.ravel(), wo.ravel()                      # output pixel coords
    for kh in range(kh_sz):
        for kw in range(kw_sz):
            hi = ho + kh - kh_sz // 2                    # source pixel coords
            wi = wo + kw - kw_sz // 2
            ok = (hi >= 0) & (hi < h) & (wi >= 0) & (wi < w)
            p_out = (ho * w + wo)[ok]
            p_in = (hi * w + wi)[ok]
            for ci in range(c_in):
                for co in range(c_out):
                    np.add.at(mat, (ci * hw + p_in, co * hw + p_out),
                              wnp[co, ci, kh, kw])
    return jnp.asarray(mat)


def prep_params(params, h, w, n_cls_pad=128):
    """Fold conv into a dense operator, fold fc1+fc2 (exact: no activation in
    between), pad the class dim to a full 128-lane vreg, cast MXU operands to
    bf16 (f32 accumulation happens in the kernel)."""
    hw = h * w
    mconv = build_conv_matrix(params["conv_w"], h, w)            # (Cin*HW, Cout*HW)
    bconv = jnp.repeat(params["conv_b"], hw).reshape(1, -1)      # (1, Cout*HW)

    wfc = params["fc1_w"].T @ params["fc2_w"].T                  # (Cout*HW, n_cls)
    bfc = params["fc1_b"] @ params["fc2_w"].T + params["fc2_b"]  # (n_cls,)
    n_cls = wfc.shape[1]
    assert n_cls <= n_cls_pad
    wfc = jnp.pad(wfc, ((0, 0), (0, n_cls_pad - n_cls)))
    bfc = jnp.pad(bfc, (0, n_cls_pad - n_cls)).reshape(1, -1)

    return {
        "mconv": mconv.astype(jnp.bfloat16),
        "bconv": bconv.astype(jnp.float32),
        "wfc": wfc.astype(jnp.bfloat16),
        "bfc": bfc.astype(jnp.float32),
    }


# ----------------------------------------------------------------------------
# Full Sequential.forward — a single fused, batch-tiled pallas_call
# ----------------------------------------------------------------------------
def sequential_forward(x, kp, *, n_cls, batch_tile=128):
    n = x.shape[0]
    feat_in, feat_mid = kp["mconv"].shape
    ncp = kp["wfc"].shape[1]                       # class dim padded to 128 lanes

    x2 = x.reshape(n, -1)                          # NCHW C-major flatten (free)
    assert x2.shape[1] == feat_in

    bt = n if n <= batch_tile else batch_tile      # fat batch tile per grid step
    n_pad = -(-n // bt) * bt
    if n_pad != n:
        x2 = jnp.pad(x2, ((0, n_pad - n), (0, 0)))

    out = pl.pallas_call(
        _fused_kernel,
        out_shape=jax.ShapeDtypeStruct((n_pad, ncp), jnp.float32),
        grid_spec=pltpu.PrefetchScalarGridSpec(
            num_scalar_prefetch=0,
            grid=(n_pad // bt,),
            in_specs=[
                pl.BlockSpec((bt, feat_in), lambda i: (i, 0)),        # activations
                pl.BlockSpec((feat_in, feat_mid), lambda i: (0, 0)),  # invariant
                pl.BlockSpec((1, feat_mid), lambda i: (0, 0)),        # invariant
                pl.BlockSpec((feat_mid, ncp), lambda i: (0, 0)),      # invariant
                pl.BlockSpec((1, ncp), lambda i: (0, 0)),             # invariant
            ],
            out_specs=pl.BlockSpec((bt, ncp), lambda i: (i, 0)),
        ),
        compiler_params=pltpu.CompilerParams(
            dimension_semantics=("parallel",),
            vmem_limit_bytes=32 * 1024 * 1024),
    )(x2, kp["mconv"], kp["bconv"], kp["wfc"], kp["bfc"])

    return out[:n, :n_cls]


def init_params(key, c_in=4, c_out=8, h=16, w=16, hidden=32, n_classes=10):
    ks = jax.random.split(key, 6)
    flat = c_out * h * w
    return {
        "conv_w": jax.random.normal(ks[0], (c_out, c_in, 3, 3), jnp.float32) * 0.1,
        "conv_b": jax.random.normal(ks[1], (c_out,), jnp.float32) * 0.1,
        "fc1_w": jax.random.normal(ks[2], (hidden, flat), jnp.float32) * 0.02,
        "fc1_b": jax.random.normal(ks[3], (hidden,), jnp.float32) * 0.1,
        "fc2_w": jax.random.normal(ks[4], (n_classes, hidden), jnp.float32) * 0.1,
        "fc2_b": jax.random.normal(ks[5], (n_classes,), jnp.float32) * 0.1,
    }


if __name__ == "__main__":
    key = jax.random.PRNGKey(0)
    k_x, k_p = jax.random.split(key)

    N, C, H, W = 2, 4, 16, 16
    x = jax.random.normal(k_x, (N, C, H, W), jnp.float32)
    params = init_params(k_p, c_in=C, h=H, w=W)
    kparams = prep_params(params, H, W)            # one-time fold/layout prep

    fwd = jax.jit(sequential_forward, static_argnames=("n_cls", "batch_tile"))
    out = jax.block_until_ready(fwd(x, kparams, n_cls=10, batch_tile=128))
    assert out.shape == (N, 10), out.shape

    # pure-JAX f32 reference of the same forward (conv -> relu -> flatten -> fc -> fc)
    def ref_forward(x, p):
        y = jax.lax.conv_general_dilated(
            x, p["conv_w"], window_strides=(1, 1), padding="SAME",
            dimension_numbers=("NCHW", "OIHW", "NCHW"))
        y = jnp.maximum(y + p["conv_b"][None, :, None, None], 0.0)
        y = y.reshape(y.shape[0], -1)
        y = y @ p["fc1_w"].T + p["fc1_b"]
        y = y @ p["fc2_w"].T + p["fc2_b"]
        return y

    ref = ref_forward(x, params)
    err = float(jnp.max(jnp.abs(out - ref)))
    # bf16 MXU operands (f32 accumulation) -> loosened tolerance vs the f32
    # reference, as anticipated in the perf review.
    assert jnp.allclose(out, ref, atol=2e-2, rtol=2e-2), err

    print("KERNEL_OK")
</pallas_src>

<mosaic_0001>
module attributes {stable_mosaic.version = 11 : i64} {
  func.func @_fused_kernel(%arg0: i32, %arg1: memref<2x1024xf32, #tpu.memory_space<vmem>>, %arg2: memref<1024x2048xbf16, #tpu.memory_space<vmem>>, %arg3: memref<1x2048xf32, #tpu.memory_space<vmem>>, %arg4: memref<2048x128xbf16, #tpu.memory_space<vmem>>, %arg5: memref<1x128xf32, #tpu.memory_space<vmem>>, %arg6: memref<2x128xf32, #tpu.memory_space<vmem>>) attributes {dimension_semantics = [#tpu.dimension_semantics<parallel>], iteration_bounds = array<i64: 1>, scalar_prefetch = 0 : i64, scratch_operands = 0 : i64, tpu.core_type = #tpu.core_type<tc>, window_params = [{transform_indices = @transform_0, window_bounds = array<i64: 2, 1024>}, {pipeline_mode = #tpu.pipeline_mode<synchronous>, transform_indices = @transform_1, window_bounds = array<i64: 1024, 2048>}, {pipeline_mode = #tpu.pipeline_mode<synchronous>, transform_indices = @transform_2, window_bounds = array<i64: 1, 2048>}, {pipeline_mode = #tpu.pipeline_mode<synchronous>, transform_indices = @transform_3, window_bounds = array<i64: 2048, 128>}, {pipeline_mode = #tpu.pipeline_mode<synchronous>, transform_indices = @transform_4, window_bounds = array<i64: 1, 128>}, {transform_indices = @transform_5, window_bounds = array<i64: 2, 128>}]} {
    %c0 = arith.constant 0 : index
    %c0_0 = arith.constant 0 : index
    %0 = vector.load %arg1[%c0, %c0_0] : memref<2x1024xf32, #tpu.memory_space<vmem>>, vector<2x1024xf32>
    %1 = arith.truncf %0 : vector<2x1024xf32> to vector<2x1024xbf16>
    %c0_1 = arith.constant 0 : index
    %c0_2 = arith.constant 0 : index
    %2 = vector.load %arg2[%c0_1, %c0_2] : memref<1024x2048xbf16, #tpu.memory_space<vmem>>, vector<1024x2048xbf16>
    %cst = arith.constant dense<0.000000e+00> : vector<2x2048xf32>
    %3 = tpu.matmul %1, %2, %cst {dimension_numbers = #tpu.dot_dimension_numbers<[1], [0], [0], [1], [0, 0, 1, 1], [], []>} : vector<2x1024xbf16>, vector<1024x2048xbf16>, vector<2x2048xf32> -> vector<2x2048xf32>
    %c0_3 = arith.constant 0 : index
    %c0_4 = arith.constant 0 : index
    %4 = vector.load %arg3[%c0_3, %c0_4] : memref<1x2048xf32, #tpu.memory_space<vmem>>, vector<1x2048xf32>
    %5 = vector.broadcast %4 : vector<1x2048xf32> to vector<2x2048xf32>
    %6 = arith.addf %3, %5 : vector<2x2048xf32>
    %cst_5 = arith.constant 0.000000e+00 : f32
    %7 = vector.broadcast %cst_5 : f32 to vector<2x2048xf32>
    %8 = arith.maximumf %6, %7 : vector<2x2048xf32>
    %9 = arith.truncf %8 : vector<2x2048xf32> to vector<2x2048xbf16>
    %c0_6 = arith.constant 0 : index
    %c0_7 = arith.constant 0 : index
    %10 = vector.load %arg4[%c0_6, %c0_7] : memref<2048x128xbf16, #tpu.memory_space<vmem>>, vector<2048x128xbf16>
    %cst_8 = arith.constant dense<0.000000e+00> : vector<2x128xf32>
    %11 = tpu.matmul %9, %10, %cst_8 {dimension_numbers = #tpu.dot_dimension_numbers<[1], [0], [0], [1], [0, 0, 1, 1], [], []>} : vector<2x2048xbf16>, vector<2048x128xbf16>, vector<2x128xf32> -> vector<2x128xf32>
    %c0_9 = arith.constant 0 : index
    %c0_10 = arith.constant 0 : index
    %12 = vector.load %arg5[%c0_9, %c0_10] : memref<1x128xf32, #tpu.memory_space<vmem>>, vector<1x128xf32>
    %13 = vector.broadcast %12 : vector<1x128xf32> to vector<2x128xf32>
    %14 = arith.addf %11, %13 : vector<2x128xf32>
    %c0_11 = arith.constant 0 : index
    %c0_12 = arith.constant 0 : index
    %15 = vector.load %arg6[%c0_11, %c0_12] : memref<2x128xf32, #tpu.memory_space<vmem>>, vector<2x128xf32>
    tpu.vector_store %arg6[%c0_11, %c0_12], %14 {strides = array<i32>} : memref<2x128xf32, #tpu.memory_space<vmem>>, vector<2x128xf32>,
    return
  }
  func.func @transform_0(%arg0: i32) -> (i32, i32) {
    %c0_i32 = arith.constant 0 : i32
    %c0_i32_0 = arith.constant 0 : i32
    return %arg0, %c0_i32 : i32, i32
  }
  func.func @transform_1(%arg0: i32) -> (i32, i32) {
    %c0_i32 = arith.constant 0 : i32
    %c0_i32_0 = arith.constant 0 : i32
    %c0_i32_1 = arith.constant 0 : i32
    return %c0_i32, %c0_i32_0 : i32, i32
  }
  func.func @transform_2(%arg0: i32) -> (i32, i32) {
    %c0_i32 = arith.constant 0 : i32
    %c0_i32_0 = arith.constant 0 : i32
    %c0_i32_1 = arith.constant 0 : i32
    return %c0_i32, %c0_i32_0 : i32, i32
  }
  func.func @transform_3(%arg0: i32) -> (i32, i32) {
    %c0_i32 = arith.constant 0 : i32
    %c0_i32_0 = arith.constant 0 : i32
    %c0_i32_1 = arith.constant 0 : i32
    return %c0_i32, %c0_i32_0 : i32, i32
  }
  func.func @transform_4(%arg0: i32) -> (i32, i32) {
    %c0_i32 = arith.constant 0 : i32
    %c0_i32_0 = arith.constant 0 : i32
    %c0_i32_1 = arith.constant 0 : i32
    return %c0_i32, %c0_i32_0 : i32, i32
  }
  func.func @transform_5(%arg0: i32) -> (i32, i32) {
    %c0_i32 = arith.constant 0 : i32
    %c0_i32_0 = arith.constant 0 : i32
    return %arg0, %c0_i32 : i32, i32
  }
}

</mosaic_0001>

<bundles_post_ra>
// kernel: sequential_forward.1
= control target key start
LH: loop header
LB: loop body
LE: loop exit
PB: predicated region body
PF: predicated region fallthrough
CT: control target
= control target key end

     0   :  { %10 = vsyncpa [#allocation3], 0  ;;  %s11097_s0 = inlined_call_operand.vmem [shape: f32[2,1024], index: 0, kind: input, shape index: {}]   ;;  %s11098_s1 = inlined_call_operand.hbm [shape: bf16[1024,2048], index: 1, kind: input, shape index: {}]   ;;  %s11099_s2 = inlined_call_operand.hbm [shape: f32[1,2048], index: 2, kind: input, shape index: {}]   ;;  %s11100_s3 = inlined_call_operand.hbm [shape: bf16[2048,128], index: 3, kind: input, shape index: {}]   ;;  %s11101_s4 = inlined_call_operand.hbm [shape: f32[1,128], index: 4, kind: input, shape index: {}]   ;;  %s11102_s5 = inlined_call_operand.hbm [shape: f32[2,128], index: 5, kind: output, shape index: {}]  }
   0x1   :  { %11 = vsyncpa [#allocation6], 0 }
   0x2   :  { %12 = vsyncpa [#allocation9], 0 }
   0x3   :  { %13 = vsyncpa [#allocation4], 0  ;;  %s10766_s18 = smov [#allocation5]   ;;  %s10767_s20 = smov [#allocation2]  }
   0x4   :  { %s34_s19 = sshll.u32 %s10766_s18, 4  ;;  %s21_s21 = sshll.u32 %s10767_s20, 4  ;;  %s35_s19 = int_to_ptr.vmem [resolvable:$true] %s34_s19  ;;  %s10805_s21 = int_to_ptr.vmem [resolvable:$true] %s21_s21 }
   0x5   :  { %s10648_s24 = scalar_lea.hbm %s11099_s2, 256 }
   0x6   :  { %p10649_p0 = scmp.ne.s32.totalorder %s11099_s2, %s10648_s24  ;;  %p10652_p1 = scmp.lt.u32.totalorder %s10648_s24, %s11099_s2 }
   0x8   :  { %p10654_p2 = pnand %p10652_p1, %p10649_p0 }
   0xa   :  { %10657 = shalt.err (!%p10654_p2)
}
   0xb   :  { %s10658_s29 = scalar_lea.vmem %s35_s19, 256  ;;  %p10663_p4 = scmp.lt.s32.totalorder %s35_s19, %s35_s19 }
   0xc   :  { %p10659_p3 = scmp.ne.s32.totalorder %s35_s19, %s10658_s29  ;;  %p10664_p5 = scmp.lt.s32.totalorder %s10658_s29, %s10658_s29 }
   0xe   :  { %p10665_p6 = por %p10664_p5, %p10663_p4 }
  0x10   :  { %p10666_p7 = pnand %p10665_p6, %p10659_p3 }
  0x12   :  { %10669 = shalt.err (!%p10666_p7)
}
  0x13   :  { %37 = dma.hbm_to_vmem [thread:$0]  %s11099_s2, 256, %s35_s19, [#allocation6]  }
  0x14   :  { %s10670_s9 = scalar_lea.hbm %s11098_s1, 131072 }
  0x15   :  { %p10671_p8 = scmp.ne.s32.totalorder %s11098_s1, %s10670_s9  ;;  %p10674_p9 = scmp.lt.u32.totalorder %s10670_s9, %s11098_s1 }
  0x17   :  { %p10676_p10 = pnand %p10674_p9, %p10671_p8 }
  0x19   :  { %10679 = shalt.err (!%p10676_p10)
}
  0x1a   :  { %s10680_s14 = scalar_lea.vmem %s10805_s21, 131072  ;;  %p10685_p12 = scmp.lt.s32.totalorder %s10805_s21, %s10805_s21 }
  0x1b   :  { %p10681_p11 = scmp.ne.s32.totalorder %s10805_s21, %s10680_s14  ;;  %p10686_p13 = scmp.lt.s32.totalorder %s10680_s14, %s10680_s14 }
  0x1d   :  { %p10687_p0 = por %p10686_p13, %p10685_p12 }
  0x1f   :  { %p10688_p1 = pnand %p10687_p0, %p10681_p11 }
  0x21   :  { %10691 = shalt.err (!%p10688_p1)
}
  0x22   :  { %s10768_s2 = smov 1024   ;;  %s10769_s15 = smov 64  }
  0x23   :  { %27 = dma.hbm_to_vmem [thread:$0]  %s11098_s1, 131072, %s10805_s21, [#allocation3], %s10768_s2, %s10768_s2, %s10769_s15  }
  0x24   :  { %s10770_s18 = smov [#allocation7]   ;;  %s10771_s20 = smov [#allocation8]  }
  0x25   :  { %s43_s19 = sshll.u32 %s10770_s18, 4  ;;  %s56_s22 = sshll.u32 %s10771_s20, 4  ;;  %s44_s19 = int_to_ptr.vmem [resolvable:$true] %s43_s19  ;;  %s57_s22 = int_to_ptr.vmem [resolvable:$true] %s56_s22 }
  0x26   :  { %s10692_s25 = scalar_lea.hbm %s11100_s3, 16384 }
  0x27   :  { %p10693_p2 = scmp.ne.s32.totalorder %s11100_s3, %s10692_s25  ;;  %p10696_p3 = scmp.lt.u32.totalorder %s10692_s25, %s11100_s3 }
  0x29   :  { %p10698_p4 = pnand %p10696_p3, %p10693_p2 }
  0x2b   :  { %10701 = shalt.err (!%p10698_p4)
}
  0x2c   :  { %s10702_s1 = scalar_lea.vmem %s44_s19, 16384  ;;  %p10707_p6 = scmp.lt.s32.totalorder %s44_s19, %s44_s19 }
  0x2d   :  { %p10703_p5 = scmp.ne.s32.totalorder %s44_s19, %s10702_s1  ;;  %p10708_p7 = scmp.lt.s32.totalorder %s10702_s1, %s10702_s1 }
  0x2f   :  { %p10709_p8 = por %p10708_p7, %p10707_p6 }
  0x31   :  { %p10710_p9 = pnand %p10709_p8, %p10703_p5 }
  0x33   :  { %10713 = shalt.err (!%p10710_p9)
}
  0x34   :  { %s10772_s21 = smov 4   ;;  %s10714_s9 = scalar_lea.hbm %s11101_s4, 16 }
  0x35   :  { %49 = dma.hbm_to_vmem [thread:$0]  %s11100_s3, 16384, %s44_s19, [#allocation6], %s10769_s15, %s10769_s15, %s10772_s21  }
  0x36   :  { %p10715_p10 = scmp.ne.s32.totalorder %s11101_s4, %s10714_s9  ;;  %p10718_p11 = scmp.lt.u32.totalorder %s10714_s9, %s11101_s4 }
  0x38   :  { %p10720_p12 = pnand %p10718_p11, %p10715_p10 }
  0x3a   :  { %10723 = shalt.err (!%p10720_p12)
}
  0x3b   :  { %s10724_s14 = scalar_lea.vmem %s57_s22, 16  ;;  %s10728_s2 = scalar_lea.vmem %s57_s22, 32 }
  0x3c   :  { %p10725_p13 = scmp.ne.s32.totalorder %s57_s22, %s10724_s14  ;;  %p10729_p0 = scmp.lt.s32.totalorder %s57_s22, %s57_s22 }
  0x3d   :  { %p10730_p1 = scmp.lt.s32.totalorder %s10728_s2, %s10724_s14 }
  0x3f   :  { %p10731_p2 = por %p10730_p1, %p10729_p0 }
  0x41   :  { %p10732_p3 = pnand %p10731_p2, %p10725_p13 }
  0x43   :  { %10735 = shalt.err (!%p10732_p3)
}
  0x44   :  { %59 = dma.hbm_to_vmem [thread:$0]  %s11101_s4, 16, %s57_s22, [#allocation9]  }
  0x45   :  { %10758 = dma.done.wait [#allocation3], 131072  }
  0x46   :  { %10759 = vsyncadd [#allocation3], 4294836224 }
  0x47   :  { %10760 = dma.done.wait [#allocation6], 16640  }
  0x48   :  { %10761 = vsyncadd [#allocation6], 4294950656 }
  0x49   :  { %10762 = dma.done.wait [#allocation9], 16  }
  0x4a   :  { %10763 = vsyncadd [#allocation9], 4294967280  ;;  %v127_v0 = vld [vmem:[#allocation2] sm:$0xff]  ;;  %v128_v2 = vld [vmem:[#allocation2 + $0x8] sm:$0xff]  ;;  %v10773_v32 = vmov 1983009808   ;;  %v81_v34 = vlaneseq }
  0x4b   :  { %v135_v1 = vld [vmem:[#allocation2 + $0x40] sm:$0xff]  ;;  %v136_v4 = vld [vmem:[#allocation2 + $0x48] sm:$0xff]  ;;  %v79_v33 = vunpack.c.l.s4 %v10773_v32 }
  0x4c   :  { %v9069_v3 = vcombine.high %v127_v0, %v135_v1  ;;  %v9068_v5 = vcombine.low %v127_v0, %v135_v1  ;;  %v143_v6 = vld [vmem:[#allocation2 + $0x80] sm:$0xff]  ;;  %v9071_v8 = vcombine.high %v128_v2, %v136_v4  ;;  %v9070_v9 = vcombine.low %v128_v2, %v136_v4  ;;  %v144_v11 = vld [vmem:[#allocation2 + $0x88] sm:$0xff] }
  0x4d   :  { %v151_v7 = vld [vmem:[#allocation2 + $0xc0] sm:$0xff]  ;;  %v152_v12 = vld [vmem:[#allocation2 + $0xc8] sm:$0xff]  ;;  %v80_v43 = vunpack.c.0.s8 %v79_v33  ;;  %v10860_v44 = vshrl.u32 %v81_v34, 7 }
  0x4e   :  { %v9085_v10 = vcombine.high %v143_v6, %v151_v7  ;;  %v159_v13 = vld [vmem:[#allocation2 + $0x100] sm:$0xff]  ;;  %6355 = vmatprep.subr.bf16.mxu0 %v9069_v3  ;;  %v9087_v14 = vcombine.high %v144_v11, %v152_v12  ;;  %v160_v16 = vld [vmem:[#allocation2 + $0x108] sm:$0xff]  ;;  %6519 = vmatprep.subr.bf16.mxu1 %v9071_v8  ;;  %v9084_v18 = vcombine.low %v143_v6, %v151_v7 }
  0x4f   :  { %v167_v15 = vld [vmem:[#allocation2 + $0x140] sm:$0xff]  ;;  %v168_v17 = vld [vmem:[#allocation2 + $0x148] sm:$0xff]  ;;  %6356 = vmatpush1.bf16.msra.mxu0 %v9068_v5  ;;  %6520 = vmatpush1.bf16.msra.mxu1 %v9070_v9  ;;  %v9086_v19 = vcombine.low %v144_v11, %v152_v12  ;;  %v10863_v53 = vsub.s32 %v80_v43, %v10860_v44 }
  0x50   :  { %6357 = vmatprep.subr.bf16.mxu0 %v9085_v10  ;;  %v9101_v20 = vcombine.high %v159_v13, %v167_v15  ;;  %6521 = vmatprep.subr.bf16.mxu1 %v9087_v14  ;;  %v9103_v21 = vcombine.high %v160_v16, %v168_v17  ;;  %v175_v22 = vld [vmem:[#allocation2 + $0x180] sm:$0xff]  ;;  %v176_v24 = vld [vmem:[#allocation2 + $0x188] sm:$0xff]  ;;  %v9100_v26 = vcombine.low %v159_v13, %v167_v15 }
  0x51   :  { %v183_v23 = vld [vmem:[#allocation2 + $0x1c0] sm:$0xff]  ;;  %v184_v25 = vld [vmem:[#allocation2 + $0x1c8] sm:$0xff]  ;;  %v9102_v27 = vcombine.low %v160_v16, %v168_v17 }
  0x52   :  { %v9117_v28 = vcombine.high %v175_v22, %v183_v23  ;;  %v9119_v29 = vcombine.high %v176_v24, %v184_v25  ;;  %v191_v30 = vld [vmem:[#allocation2 + $0x200] sm:$0xff]  ;;  %v192_v35 = vld [vmem:[#allocation2 + $0x208] sm:$0xff]  ;;  %v9116_v37 = vcombine.low %v175_v22, %v183_v23  ;;  %v9118_v38 = vcombine.low %v176_v24, %v184_v25 }
  0x53   :  { %6358 = vmatpush1.bf16.msra.mxu0 %v9084_v18  ;;  %6522 = vmatpush1.bf16.msra.mxu1 %v9086_v19  ;;  %v199_v31 = vld [vmem:[#allocation2 + $0x240] sm:$0xff]  ;;  %v200_v36 = vld [vmem:[#allocation2 + $0x248] sm:$0xff] }
  0x54   :  { %6359 = vmatprep.subr.bf16.mxu0 %v9101_v20  ;;  %6523 = vmatprep.subr.bf16.mxu1 %v9103_v21  ;;  %v9133_v39 = vcombine.high %v191_v30, %v199_v31  ;;  %v9135_v40 = vcombine.high %v192_v35, %v200_v36  ;;  %v207_v41 = vld [vmem:[#allocation2 + $0x280] sm:$0xff]  ;;  %v208_v45 = vld [vmem:[#allocation2 + $0x288] sm:$0xff]  ;;  %v9132_v47 = vcombine.low %v191_v30, %v199_v31 }
  0x55   :  { %v215_v42 = vld [vmem:[#allocation2 + $0x2c0] sm:$0xff]  ;;  %v216_v46 = vld [vmem:[#allocation2 + $0x2c8] sm:$0xff]  ;;  %v9134_v48 = vcombine.low %v192_v35, %v200_v36 }
  0x56   :  { %v9149_v49 = vcombine.high %v207_v41, %v215_v42  ;;  %v9151_v50 = vcombine.high %v208_v45, %v216_v46  ;;  %v223_v51 = vld [vmem:[#allocation2 + $0x300] sm:$0xff]  ;;  %v224_v54 = vld [vmem:[#allocation2 + $0x308] sm:$0xff]  ;;  %v9148_v56 = vcombine.low %v207_v41, %v215_v42  ;;  %v9150_v57 = vcombine.low %v208_v45, %v216_v46 }
  0x57   :  { %6360 = vmatpush1.bf16.msra.mxu0 %v9100_v26  ;;  %6524 = vmatpush1.bf16.msra.mxu1 %v9102_v27  ;;  %v231_v52 = vld [vmem:[#allocation2 + $0x340] sm:$0xff]  ;;  %v232_v55 = vld [vmem:[#allocation2 + $0x348] sm:$0xff] }
  0x58   :  { %6361 = vmatprep.subr.bf16.mxu0 %v9117_v28  ;;  %6525 = vmatprep.subr.bf16.mxu1 %v9119_v29  ;;  %v9165_v58 = vcombine.high %v223_v51, %v231_v52  ;;  %v10868_v59 = vld [vmem:[%s11097_s0] sm:$0xff]  ;;  %v9167_v60 = vcombine.high %v224_v54, %v232_v55  ;;  %v240_v0 = vld [vmem:[#allocation2 + $0x388] sm:$0xff]  ;;  %v9164_v2 = vcombine.low %v223_v51, %v231_v52 }
  0x59   :  { %v239_v61 = vld [vmem:[#allocation2 + $0x380] sm:$0xff]  ;;  %v10872_v63 = vrot.slane %v10868_v59, %v10863_v53  ;;  %v248_v1 = vld [vmem:[#allocation2 + $0x3c8] sm:$0xff]  ;;  %v9166_v4 = vcombine.low %v224_v54, %v232_v55 }
  0x5a   :  { %v247_v62 = vld [vmem:[#allocation2 + $0x3c0] sm:$0xff]  ;;  %v9183_v6 = vcombine.high %v240_v0, %v248_v1  ;;  %v256_v10 = vld [vmem:[#allocation2 + $0x408] sm:$0xff]  ;;  %v9182_v13 = vcombine.low %v240_v0, %v248_v1 }
  0x5b   :  { %6362 = vmatpush1.bf16.msra.mxu0 %v9116_v37  ;;  %6526 = vmatpush1.bf16.msra.mxu1 %v9118_v38  ;;  %v92_v3 = vcombine.high %v10872_v63, %v10872_v63  ;;  %v9181_v5 = vcombine.high %v239_v61, %v247_v62  ;;  %v255_v7 = vld [vmem:[#allocation2 + $0x400] sm:$0xff]  ;;  %v264_v11 = vld [vmem:[#allocation2 + $0x448] sm:$0xff]  ;;  %v9180_v12 = vcombine.low %v239_v61, %v247_v62 }
  0x5c   :  { %6363 = vmatprep.subr.bf16.mxu0 %v9133_v39  ;;  %6527 = vmatprep.subr.bf16.mxu1 %v9135_v40  ;;  %v263_v8 = vld [vmem:[#allocation2 + $0x440] sm:$0xff]  ;;  %v9199_v15 = vcombine.high %v256_v10, %v264_v11  ;;  %v272_v18 = vld [vmem:[#allocation2 + $0x488] sm:$0xff]  ;;  %v9198_v21 = vcombine.low %v256_v10, %v264_v11 }
  0x5d   :  { %v10876_v9 = vpack.c.bf16 %v92_v3, %v92_v3  ;;  %v9197_v14 = vcombine.high %v255_v7, %v263_v8  ;;  %v271_v16 = vld [vmem:[#allocation2 + $0x480] sm:$0xff]  ;;  %v280_v19 = vld [vmem:[#allocation2 + $0x4c8] sm:$0xff]  ;;  %v9196_v20 = vcombine.low %v255_v7, %v263_v8 }
  0x5e   :  { %v279_v17 = vld [vmem:[#allocation2 + $0x4c0] sm:$0xff]  ;;  %v9215_v23 = vcombine.high %v272_v18, %v280_v19  ;;  %v288_v26 = vld [vmem:[#allocation2 + $0x508] sm:$0xff]  ;;  %v9214_v29 = vcombine.low %v272_v18, %v280_v19 }
  0x5f   :  { %6364 = vmatpush1.bf16.msra.mxu0 %v9132_v47  ;;  %6528 = vmatpush1.bf16.msra.mxu1 %v9134_v48  ;;  %v9213_v22 = vcombine.high %v271_v16, %v279_v17  ;;  %v287_v24 = vld [vmem:[#allocation2 + $0x500] sm:$0xff]  ;;  %v296_v27 = vld [vmem:[#allocation2 + $0x548] sm:$0xff]  ;;  %v9212_v28 = vcombine.low %v271_v16, %v279_v17 }
  0x60   :  { %6365 = vmatprep.subr.bf16.mxu0 %v9149_v49  ;;  %6529 = vmatprep.subr.bf16.mxu1 %v9151_v50  ;;  %v295_v25 = vld [vmem:[#allocation2 + $0x540] sm:$0xff]  ;;  %v9231_v31 = vcombine.high %v288_v26, %v296_v27  ;;  %v304_v34 = vld [vmem:[#allocation2 + $0x588] sm:$0xff]  ;;  %v9230_v37 = vcombine.low %v288_v26, %v296_v27 }
  0x61   :  { %6387 = vmatprep.mubr.bf16.mxu0 %v10876_v9  ;;  %6551 = vmatprep.mubr.bf16.mxu1 %v10876_v9  ;;  %v9229_v30 = vcombine.high %v287_v24, %v295_v25  ;;  %v303_v32 = vld [vmem:[#allocation2 + $0x580] sm:$0xff]  ;;  %v312_v35 = vld [vmem:[#allocation2 + $0x5c8] sm:$0xff]  ;;  %v9228_v36 = vcombine.low %v287_v24, %v295_v25  ;;  %v10889_v25 = vpack.c.bf16 %v10872_v63, %v10872_v63 }
  0x62   :  { %v311_v33 = vld [vmem:[#allocation2 + $0x5c0] sm:$0xff]  ;;  %v9247_v39 = vcombine.high %v304_v34, %v312_v35  ;;  %v320_v42 = vld [vmem:[#allocation2 + $0x608] sm:$0xff]  ;;  %v9246_v46 = vcombine.low %v304_v34, %v312_v35 }
  0x63   :  { %6366 = vmatpush1.bf16.msra.mxu0 %v9148_v56  ;;  %6530 = vmatpush1.bf16.msra.mxu1 %v9150_v57  ;;  %v9245_v38 = vcombine.high %v303_v32, %v311_v33  ;;  %v319_v40 = vld [vmem:[#allocation2 + $0x600] sm:$0xff]  ;;  %v328_v43 = vld [vmem:[#allocation2 + $0x648] sm:$0xff]  ;;  %v9244_v45 = vcombine.low %v303_v32, %v311_v33 }
  0x64   :  { %6367 = vmatprep.subr.bf16.mxu0 %v9165_v58  ;;  %6531 = vmatprep.subr.bf16.mxu1 %v9167_v60  ;;  %v327_v41 = vld [vmem:[#allocation2 + $0x640] sm:$0xff]  ;;  %v9263_v48 = vcombine.high %v320_v42, %v328_v43  ;;  %v336_v51 = vld [vmem:[#allocation2 + $0x688] sm:$0xff]  ;;  %v9262_v55 = vcombine.low %v320_v42, %v328_v43 }
  0x65   :  { %v9261_v47 = vcombine.high %v319_v40, %v327_v41  ;;  %v335_v49 = vld [vmem:[#allocation2 + $0x680] sm:$0xff]  ;;  %v344_v52 = vld [vmem:[#allocation2 + $0x6c8] sm:$0xff]  ;;  %v9260_v54 = vcombine.low %v319_v40, %v327_v41 }
  0x66   :  { %v343_v50 = vld [vmem:[#allocation2 + $0x6c0] sm:$0xff]  ;;  %v9279_v57 = vcombine.high %v336_v51, %v344_v52  ;;  %v352_v61 = vld [vmem:[#allocation2 + $0x708] sm:$0xff]  ;;  %v9278_v1 = vcombine.low %v336_v51, %v344_v52 }
  0x67   :  { %6368 = vmatpush1.bf16.msra.mxu0 %v9164_v2  ;;  %6532 = vmatpush1.bf16.msra.mxu1 %v9166_v4  ;;  %v9277_v56 = vcombine.high %v335_v49, %v343_v50  ;;  %v351_v58 = vld [vmem:[#allocation2 + $0x700] sm:$0xff]  ;;  %v360_v62 = vld [vmem:[#allocation2 + $0x748] sm:$0xff]  ;;  %v9276_v0 = vcombine.low %v335_v49, %v343_v50 }
  0x68   :  { %6369 = vmatprep.subr.bf16.mxu0 %v9181_v5  ;;  %6533 = vmatprep.subr.bf16.mxu1 %v9183_v6  ;;  %v359_v60 = vld [vmem:[#allocation2 + $0x740] sm:$0xff]  ;;  %v9295_v3 = vcombine.high %v352_v61, %v360_v62  ;;  %v77_v6 = vcombine.high %v10868_v59, %v10868_v59  ;;  %v368_v7 = vld [vmem:[#allocation2 + $0x788] sm:$0xff]  ;;  %v9294_v11 = vcombine.low %v352_v61, %v360_v62 }
  0x69   :  { %v9293_v2 = vcombine.high %v351_v58, %v359_v60  ;;  %v367_v4 = vld [vmem:[#allocation2 + $0x780] sm:$0xff]  ;;  %v376_v8 = vld [vmem:[#allocation2 + $0x7c8] sm:$0xff]  ;;  %v9292_v10 = vcombine.low %v351_v58, %v359_v60 }
  0x6a   :  { %v375_v5 = vld [vmem:[#allocation2 + $0x7c0] sm:$0xff]  ;;  %v10883_v16 = vrot.slane %v77_v6, %v10863_v53  ;;  %v384_v17 = vld [vmem:[#allocation2 + $0x808] sm:$0xff]  ;;  %v9310_v59 = vcombine.low %v368_v7, %v376_v8 }
  0x6b   :  { %6370 = vmatpush1.bf16.msra.mxu0 %v9180_v12  ;;  %6534 = vmatpush1.bf16.msra.mxu1 %v9182_v13  ;;  %v9309_v12 = vcombine.high %v367_v4, %v375_v5  ;;  %v9311_v13 = vcombine.high %v368_v7, %v376_v8  ;;  %v392_v18 = vld [vmem:[#allocation2 + $0x848] sm:$0xff]  ;;  %v9308_v19 = vcombine.low %v367_v4, %v375_v5  ;;  %v423_v32 = vld [vmem:[#allocation2 + $0x940] sm:$0xff] }
  0x6c   :  { %6371 = vmatprep.subr.bf16.mxu0 %v9197_v14  ;;  %6535 = vmatprep.subr.bf16.mxu1 %v9199_v15  ;;  %v383_v14 = vld [vmem:[#allocation2 + $0x800] sm:$0xff]  ;;  %v93_v24 = vcombine.high %v10883_v16, %v10883_v16  ;;  %v400_v26 = vld [vmem:[#allocation2 + $0x888] sm:$0xff] }
  0x6d   :  { %v391_v15 = vld [vmem:[#allocation2 + $0x840] sm:$0xff]  ;;  %v408_v27 = vld [vmem:[#allocation2 + $0x8c8] sm:$0xff] }
  0x6e   :  { %v416_v33 = vld [vmem:[#allocation2 + $0x908] sm:$0xff]  ;;  %v9343_v34 = vcombine.high %v400_v26, %v408_v27  ;;  %v439_v40 = vld [vmem:[#allocation2 + $0x9c0] sm:$0xff] }
  0x6f   :  { %6372 = vmatpush1.bf16.msra.mxu0 %v9196_v20  ;;  %6536 = vmatpush1.bf16.msra.mxu1 %v9198_v21  ;;  %v9325_v20 = vcombine.high %v383_v14, %v391_v15  ;;  %v9327_v21 = vcombine.high %v384_v17, %v392_v18  ;;  %v424_v35 = vld [vmem:[#allocation2 + $0x948] sm:$0xff]  ;;  %v455_v49 = vld [vmem:[#allocation2 + $0xa40] sm:$0xff] }
  0x70   :  { %6373 = vmatprep.subr.bf16.mxu0 %v9213_v22  ;;  %6537 = vmatprep.subr.bf16.mxu1 %v9215_v23  ;;  %v399_v22 = vld [vmem:[#allocation2 + $0x880] sm:$0xff]  ;;  %v432_v41 = vld [vmem:[#allocation2 + $0x988] sm:$0xff]  ;;  %v9359_v42 = vcombine.high %v416_v33, %v424_v35 }
  0x71   :  { %v407_v23 = vld [vmem:[#allocation2 + $0x8c0] sm:$0xff]  ;;  %v440_v43 = vld [vmem:[#allocation2 + $0x9c8] sm:$0xff] }
  0x72   :  { %v9340_v63 = vcombine.low %v399_v22, %v407_v23  ;;  %v448_v50 = vld [vmem:[#allocation2 + $0xa08] sm:$0xff]  ;;  %v9375_v51 = vcombine.high %v432_v41, %v440_v43  ;;  %v471_v58 = vld [vmem:[#allocation2 + $0xac0] sm:$0xff] }
  0x73   :  { %6374 = vmatpush1.bf16.msra.mxu0 %v9212_v28  ;;  %6538 = vmatpush1.bf16.msra.mxu1 %v9214_v29  ;;  %v9324_v28 = vcombine.low %v383_v14, %v391_v15  ;;  %v9326_v29 = vcombine.low %v384_v17, %v392_v18  ;;  %v456_v52 = vld [vmem:[#allocation2 + $0xa48] sm:$0xff]  ;;  %v487_v4 = vld [vmem:[#allocation2 + $0xb40] sm:$0xff] }
  0x74   :  { %6375 = vmatprep.subr.bf16.mxu0 %v9229_v30  ;;  %6539 = vmatprep.subr.bf16.mxu1 %v9231_v31  ;;  %v9341_v30 = vcombine.high %v399_v22, %v407_v23  ;;  %v415_v31 = vld [vmem:[#allocation2 + $0x900] sm:$0xff]  ;;  %v464_v60 = vld [vmem:[#allocation2 + $0xa88] sm:$0xff]  ;;  %v9391_v61 = vcombine.high %v448_v50, %v456_v52 }
  0x75   :  { %v472_v62 = vld [vmem:[#allocation2 + $0xac8] sm:$0xff] }
  0x76   :  { %v480_v5 = vld [vmem:[#allocation2 + $0xb08] sm:$0xff]  ;;  %v9407_v6 = vcombine.high %v464_v60, %v472_v62 }
  0x77   :  { %6376 = vmatpush1.bf16.msra.mxu0 %v9228_v36  ;;  %6540 = vmatpush1.bf16.msra.mxu1 %v9230_v37  ;;  %v10891_v36 = vpack.c.bf16 %v93_v24, %v93_v24  ;;  %v9342_v37 = vcombine.low %v400_v26, %v408_v27  ;;  %v488_v7 = vld [vmem:[#allocation2 + $0xb48] sm:$0xff] }
  0x78   :  { %6377 = vmatprep.subr.bf16.mxu0 %v9245_v38  ;;  %6541 = vmatprep.subr.bf16.mxu1 %v9247_v39  ;;  %v9357_v38 = vcombine.high %v415_v31, %v423_v32  ;;  %v431_v39 = vld [vmem:[#allocation2 + $0x980] sm:$0xff]  ;;  %v496_v14 = vld [vmem:[#allocation2 + $0xb88] sm:$0xff]  ;;  %v9423_v15 = vcombine.high %v480_v5, %v488_v7 }
  0x79   :  { %v504_v17 = vld [vmem:[#allocation2 + $0xbc8] sm:$0xff] }
  0x7a   :  { %v512_v22 = vld [vmem:[#allocation2 + $0xc08] sm:$0xff]  ;;  %v9439_v23 = vcombine.high %v496_v14, %v504_v17  ;;  %v9438_v27 = vcombine.low %v496_v14, %v504_v17  ;;  %v623_v17 = vld [vmem:[#allocation2 + $0xf80] sm:$0xff] }
  0x7b   :  { %6378 = vmatpush1.bf16.msra.mxu0 %v9244_v45  ;;  %6542 = vmatpush1.bf16.msra.mxu1 %v9246_v46  ;;  %v9356_v45 = vcombine.low %v415_v31, %v423_v32  ;;  %v9358_v46 = vcombine.low %v416_v33, %v424_v35  ;;  %v520_v24 = vld [vmem:[#allocation2 + $0xc48] sm:$0xff] }
  0x7c   :  { %6379 = vmatprep.subr.bf16.mxu0 %v9261_v47  ;;  %6543 = vmatprep.subr.bf16.mxu1 %v9263_v48  ;;  %v9373_v47 = vcombine.high %v431_v39, %v439_v40  ;;  %v447_v48 = vld [vmem:[#allocation2 + $0xa00] sm:$0xff]  ;;  %v528_v31 = vld [vmem:[#allocation2 + $0xc88] sm:$0xff]  ;;  %v9455_v32 = vcombine.high %v512_v22, %v520_v24  ;;  %v9454_v35 = vcombine.low %v512_v22, %v520_v24 }
  0x7d   :  { %v536_v33 = vld [vmem:[#allocation2 + $0xcc8] sm:$0xff] }
  0x7e   :  { %v616_v14 = vld [vmem:[#allocation2 + $0xf48] sm:$0xff] }
  0x7f   :  { %6380 = vmatpush1.bf16.msra.mxu0 %v9260_v54  ;;  %6544 = vmatpush1.bf16.msra.mxu1 %v9262_v55  ;;  %v9372_v54 = vcombine.low %v431_v39, %v439_v40  ;;  %v9374_v55 = vcombine.low %v432_v41, %v440_v43  ;;  %v544_v39 = vld [vmem:[#allocation2 + $0xd08] sm:$0xff]  ;;  %v9471_v40 = vcombine.high %v528_v31, %v536_v33 }
  0x80   :  { %6381 = vmatprep.subr.bf16.mxu0 %v9277_v56  ;;  %6545 = vmatprep.subr.bf16.mxu1 %v9279_v57  ;;  %v9389_v56 = vcombine.high %v447_v48, %v455_v49  ;;  %v463_v57 = vld [vmem:[#allocation2 + $0xa80] sm:$0xff]  ;;  %v552_v41 = vld [vmem:[#allocation2 + $0xd48] sm:$0xff]  ;;  %v9470_v43 = vcombine.low %v528_v31, %v536_v33 }
  0x81   :  { %v9404_v8 = vcombine.low %v463_v57, %v471_v58 }
  0x83   :  { %6382 = vmatpush1.bf16.msra.mxu0 %v9276_v0  ;;  %6546 = vmatpush1.bf16.msra.mxu1 %v9278_v1  ;;  %v9388_v0 = vcombine.low %v447_v48, %v455_v49  ;;  %v9390_v1 = vcombine.low %v448_v50, %v456_v52  ;;  %v560_v48 = vld [vmem:[#allocation2 + $0xd88] sm:$0xff]  ;;  %v9487_v49 = vcombine.high %v544_v39, %v552_v41 }
  0x84   :  { %6383 = vmatprep.subr.bf16.mxu0 %v9293_v2  ;;  %6547 = vmatprep.subr.bf16.mxu1 %v9295_v3  ;;  %v9405_v2 = vcombine.high %v463_v57, %v471_v58  ;;  %v479_v3 = vld [vmem:[#allocation2 + $0xb00] sm:$0xff]  ;;  %v568_v50 = vld [vmem:[#allocation2 + $0xdc8] sm:$0xff]  ;;  %v9486_v52 = vcombine.low %v544_v39, %v552_v41 }
  0x85   :  { %v9420_v18 = vcombine.low %v479_v3, %v487_v4  ;;  %v576_v57 = vld [vmem:[#allocation2 + $0xe08] sm:$0xff]  ;;  %v9503_v58 = vcombine.high %v560_v48, %v568_v50 }
  0x86   :  { %v656_v39 = vld [vmem:[#allocation2 + $0x1088] sm:$0xff] }
  0x87   :  { %6384 = vmatpush1.bf16.msra.mxu0 %v9292_v10  ;;  %6548 = vmatpush1.bf16.msra.mxu1 %v9294_v11  ;;  %v9406_v10 = vcombine.low %v464_v60, %v472_v62  ;;  %v9421_v11 = vcombine.high %v479_v3, %v487_v4  ;;  %v584_v60 = vld [vmem:[#allocation2 + $0xe48] sm:$0xff]  ;;  %v9502_v62 = vcombine.low %v560_v48, %v568_v50  ;;  %v671_v48 = vld [vmem:[#allocation2 + $0x1100] sm:$0xff] }
  0x88   :  { %6385 = vmatprep.subr.bf16.mxu0 %v9309_v12  ;;  %6549 = vmatprep.subr.bf16.mxu1 %v9311_v13  ;;  %v495_v12 = vld [vmem:[#allocation2 + $0xb80] sm:$0xff]  ;;  %v592_v3 = vld [vmem:[#allocation2 + $0xe88] sm:$0xff]  ;;  %v9519_v4 = vcombine.high %v576_v57, %v584_v60 }
  0x89   :  { %v503_v13 = vld [vmem:[#allocation2 + $0xbc0] sm:$0xff]  ;;  %v664_v41 = vld [vmem:[#allocation2 + $0x10c8] sm:$0xff] }
  0x8a   :  { %v9436_v26 = vcombine.low %v495_v12, %v503_v13  ;;  %v672_v50 = vld [vmem:[#allocation2 + $0x1108] sm:$0xff] }
  0x8b   :  { %6386 = vmatpush1.bf16.msra.mxu0 %v9308_v19  ;;  %6550 = vmatpush1.bf16.msra.mxu1 %v9310_v59  ;;  %v9422_v19 = vcombine.low %v480_v5, %v488_v7  ;;  %v9437_v59 = vcombine.high %v495_v12, %v503_v13  ;;  %v600_v5 = vld [vmem:[#allocation2 + $0xec8] sm:$0xff]  ;;  %v9518_v7 = vcombine.low %v576_v57, %v584_v60  ;;  %v687_v57 = vld [vmem:[#allocation2 + $0x1180] sm:$0xff] }
  0x8c   :  { %6396 = vmatprep.subr.bf16.mxu0 %v9325_v20  ;;  %6560 = vmatprep.subr.bf16.mxu1 %v9327_v21  ;;  %v511_v20 = vld [vmem:[#allocation2 + $0xc00] sm:$0xff]  ;;  %v608_v12 = vld [vmem:[#allocation2 + $0xf08] sm:$0xff]  ;;  %v9535_v13 = vcombine.high %v592_v3, %v600_v5 }
  0x8d   :  { %v519_v21 = vld [vmem:[#allocation2 + $0xc40] sm:$0xff]  ;;  %v9551_v22 = vcombine.high %v608_v12, %v616_v14  ;;  %v688_v60 = vld [vmem:[#allocation2 + $0x1188] sm:$0xff] }
  0x8e   :  { %6388 = vmatmul.mubr.bf16.vlgmr.msra.gmra.mrb[0].mxu0 %v10889_v25  ;;  %6552 = vmatmul.mubr.bf16.vlgmr.msra.gmra.mrb[0].mxu1 %v10889_v25 }
  0x8f   :  { %6397 = vmatpush1.bf16.msra.mxu0 %v9324_v28  ;;  %6561 = vmatpush1.bf16.msra.mxu1 %v9326_v29  ;;  %v9453_v28 = vcombine.high %v511_v20, %v519_v21  ;;  %v527_v29 = vld [vmem:[#allocation2 + $0xc80] sm:$0xff] }
  0x90   :  { %6398 = vmatprep.subr.bf16.mxu0 %v9341_v30  ;;  %6562 = vmatprep.subr.bf16.mxu1 %v9343_v34  ;;  %v535_v30 = vld [vmem:[#allocation2 + $0xcc0] sm:$0xff]  ;;  %v9452_v34 = vcombine.low %v511_v20, %v519_v21  ;;  %v624_v20 = vld [vmem:[#allocation2 + $0xf88] sm:$0xff] }
  0x91   :  { %6428 = vmatprep.mubr.bf16.mxu0 %v10891_v36  ;;  %6592 = vmatprep.mubr.bf16.mxu1 %v10891_v36  ;;  %v632_v21 = vld [vmem:[#allocation2 + $0xfc8] sm:$0xff] }
  0x92   :  { %v9567_v31 = vcombine.high %v624_v20, %v632_v21 }
  0x93   :  { %6399 = vmatpush1.bf16.msra.mxu0 %v9340_v63  ;;  %6563 = vmatpush1.bf16.msra.mxu1 %v9342_v37  ;;  %v9469_v63 = vcombine.high %v527_v29, %v535_v30  ;;  %v543_v37 = vld [vmem:[#allocation2 + $0xd00] sm:$0xff] }
  0x94   :  { %6400 = vmatprep.subr.bf16.mxu0 %v9357_v38  ;;  %6564 = vmatprep.subr.bf16.mxu1 %v9359_v42  ;;  %v551_v38 = vld [vmem:[#allocation2 + $0xd40] sm:$0xff]  ;;  %v9468_v42 = vcombine.low %v527_v29, %v535_v30  ;;  %v640_v30 = vld [vmem:[#allocation2 + $0x1008] sm:$0xff] }
  0x95   :  { %v647_v29 = vld [vmem:[#allocation2 + $0x1040] sm:$0xff] }
  0x97   :  { %6401 = vmatpush1.bf16.msra.mxu0 %v9356_v45  ;;  %6565 = vmatpush1.bf16.msra.mxu1 %v9358_v46  ;;  %v9485_v45 = vcombine.high %v543_v37, %v551_v38  ;;  %v559_v46 = vld [vmem:[#allocation2 + $0xd80] sm:$0xff] }
  0x98   :  { %6402 = vmatprep.subr.bf16.mxu0 %v9373_v47  ;;  %6566 = vmatprep.subr.bf16.mxu1 %v9375_v51  ;;  %v567_v47 = vld [vmem:[#allocation2 + $0xdc0] sm:$0xff]  ;;  %v9484_v51 = vcombine.low %v543_v37, %v551_v38 }
  0x99   :  { %v655_v37 = vld [vmem:[#allocation2 + $0x1080] sm:$0xff] }
  0x9a   :  { %v663_v38 = vld [vmem:[#allocation2 + $0x10c0] sm:$0xff] }
  0x9b   :  { %6403 = vmatpush1.bf16.msra.mxu0 %v9372_v54  ;;  %6567 = vmatpush1.bf16.msra.mxu1 %v9374_v55  ;;  %v9501_v54 = vcombine.high %v559_v46, %v567_v47  ;;  %v575_v55 = vld [vmem:[#allocation2 + $0xe00] sm:$0xff] }
  0x9c   :  { %6404 = vmatprep.subr.bf16.mxu0 %v9389_v56  ;;  %6568 = vmatprep.subr.bf16.mxu1 %v9391_v61  ;;  %v583_v56 = vld [vmem:[#allocation2 + $0xe40] sm:$0xff]  ;;  %v9500_v61 = vcombine.low %v559_v46, %v567_v47  ;;  %v9597_v47 = vcombine.high %v655_v37, %v663_v38 }
  0x9f   :  { %6405 = vmatpush1.bf16.msra.mxu0 %v9388_v0  ;;  %6569 = vmatpush1.bf16.msra.mxu1 %v9390_v1  ;;  %v9517_v0 = vcombine.high %v575_v55, %v583_v56  ;;  %v591_v1 = vld [vmem:[#allocation2 + $0xe80] sm:$0xff] }
  0xa0   :  { %6406 = vmatprep.subr.bf16.mxu0 %v9405_v2  ;;  %6570 = vmatprep.subr.bf16.mxu1 %v9407_v6  ;;  %v599_v2 = vld [vmem:[#allocation2 + $0xec0] sm:$0xff]  ;;  %v9516_v6 = vcombine.low %v575_v55, %v583_v56  ;;  %v9598_v55 = vcombine.low %v656_v39, %v664_v41 }
  0xa3   :  { %6407 = vmatpush1.bf16.msra.mxu0 %v9404_v8  ;;  %6571 = vmatpush1.bf16.msra.mxu1 %v9406_v10  ;;  %v9533_v8 = vcombine.high %v591_v1, %v599_v2  ;;  %v607_v10 = vld [vmem:[#allocation2 + $0xf00] sm:$0xff] }
  0xa4   :  { %6408 = vmatprep.subr.bf16.mxu0 %v9421_v11  ;;  %6572 = vmatprep.subr.bf16.mxu1 %v9423_v15  ;;  %v615_v11 = vld [vmem:[#allocation2 + $0xf40] sm:$0xff]  ;;  %v9532_v15 = vcombine.low %v591_v1, %v599_v2 }
  0xa5   :  { %v9548_v24 = vcombine.low %v607_v10, %v615_v11 }
  0xa7   :  { %6409 = vmatpush1.bf16.msra.mxu0 %v9420_v18  ;;  %6573 = vmatpush1.bf16.msra.mxu1 %v9422_v19  ;;  %v9534_v18 = vcombine.low %v592_v3, %v600_v5  ;;  %v9549_v19 = vcombine.high %v607_v10, %v615_v11  ;;  %v703_v3 = vld [vmem:[#allocation2 + $0x1200] sm:$0xff]  ;;  %v704_v5 = vld [vmem:[#allocation2 + $0x1208] sm:$0xff] }
  0xa8   :  { %6410 = vmatprep.subr.bf16.mxu0 %v9437_v59  ;;  %6574 = vmatprep.subr.bf16.mxu1 %v9439_v23  ;;  %v631_v59 = vld [vmem:[#allocation2 + $0xfc0] sm:$0xff]  ;;  %v10900_v23 = vld [vmem:[%s11097_s0 + $0x8] sm:$0xff]  ;;  %s10774_s0 = smov [#allocation10]  }
  0xa9   :  { %v10904_v33 = vrot.slane %v10900_v23, %v10863_v53  ;;  %s9057_s19 = sshll.u32 %s10774_s0, 4  ;;  %s9058_s19 = int_to_ptr.vmem [resolvable:$true] %s9057_s19 }
  0xaa   :  { %s10736_s20 = scalar_lea.vmem %s9058_s19, 32  ;;  %p10741_p5 = scmp.lt.s32.totalorder %s9058_s19, %s9058_s19 }
  0xab   :  { %6411 = vmatpush1.bf16.msra.mxu0 %v9436_v26  ;;  %6575 = vmatpush1.bf16.msra.mxu1 %v9438_v27  ;;  %v9550_v26 = vcombine.low %v608_v12, %v616_v14  ;;  %v9565_v27 = vcombine.high %v623_v17, %v631_v59  ;;  %v719_v12 = vld [vmem:[#allocation2 + $0x1280] sm:$0xff]  ;;  %v720_v14 = vld [vmem:[#allocation2 + $0x1288] sm:$0xff]  ;;  %p10737_p4 = scmp.ne.s32.totalorder %s9058_s19, %s10736_s20  ;;  %p10742_p6 = scmp.lt.s32.totalorder %s10736_s20, %s10736_s20 }
  0xac   :  { %6412 = vmatprep.subr.bf16.mxu0 %v9453_v28  ;;  %6576 = vmatprep.subr.bf16.mxu1 %v9455_v32  ;;  %v639_v28 = vld [vmem:[#allocation2 + $0x1000] sm:$0xff]  ;;  %v648_v32 = vld [vmem:[#allocation2 + $0x1048] sm:$0xff] }
  0xad   :  { %v9582_v46 = vcombine.low %v640_v30, %v648_v32  ;;  %p10743_p7 = por %p10742_p6, %p10741_p5 }
  0xaf   :  { %6413 = vmatpush1.bf16.msra.mxu0 %v9452_v34  ;;  %6577 = vmatpush1.bf16.msra.mxu1 %v9454_v35  ;;  %v9564_v34 = vcombine.low %v623_v17, %v631_v59  ;;  %v9566_v35 = vcombine.low %v624_v20, %v632_v21  ;;  %v728_v17 = vld [vmem:[#allocation2 + $0x12c8] sm:$0xff]  ;;  %v735_v20 = vld [vmem:[#allocation2 + $0x1300] sm:$0xff]  ;;  %p10744_p8 = pnand %p10743_p7, %p10737_p4 }
  0xb0   :  { %6414 = vmatprep.subr.bf16.mxu0 %v9469_v63  ;;  %6578 = vmatprep.subr.bf16.mxu1 %v9471_v40  ;;  %v9581_v63 = vcombine.high %v639_v28, %v647_v29  ;;  %v9583_v40 = vcombine.high %v640_v30, %v648_v32  ;;  %v743_v21 = vld [vmem:[#allocation2 + $0x1340] sm:$0xff]  ;;  %v752_v32 = vld [vmem:[#allocation2 + $0x1388] sm:$0xff] }
  0xb1   :  { %v751_v30 = vld [vmem:[#allocation2 + $0x1380] sm:$0xff] }
  0xb3   :  { %6415 = vmatpush1.bf16.msra.mxu0 %v9468_v42  ;;  %6579 = vmatpush1.bf16.msra.mxu1 %v9470_v43  ;;  %v109_v42 = vcombine.high %v10904_v33, %v10904_v33  ;;  %v10910_v43 = vpack.c.bf16 %v10883_v16, %v10883_v16  ;;  %v9596_v16 = vcombine.low %v655_v37, %v663_v38 }
  0xb4   :  { %6416 = vmatprep.subr.bf16.mxu0 %v9485_v45  ;;  %6580 = vmatprep.subr.bf16.mxu1 %v9487_v49  ;;  %v9580_v45 = vcombine.low %v639_v28, %v647_v29  ;;  %v679_v49 = vld [vmem:[#allocation2 + $0x1140] sm:$0xff]  ;;  %v9662_v28 = vcombine.low %v720_v14, %v728_v17  ;;  %v9677_v29 = vcombine.high %v735_v20, %v743_v21 }
  0xb5   :  { %v9613_v56 = vcombine.high %v671_v48, %v679_v49 }
  0xb7   :  { %6417 = vmatpush1.bf16.msra.mxu0 %v9484_v51  ;;  %6581 = vmatpush1.bf16.msra.mxu1 %v9486_v52  ;;  %v9599_v51 = vcombine.high %v656_v39, %v664_v41  ;;  %v680_v52 = vld [vmem:[#allocation2 + $0x1148] sm:$0xff]  ;;  %v767_v39 = vld [vmem:[#allocation2 + $0x1400] sm:$0xff] }
  0xb8   :  { %6418 = vmatprep.subr.bf16.mxu0 %v9501_v54  ;;  %6582 = vmatprep.subr.bf16.mxu1 %v9503_v58  ;;  %v10912_v54 = vpack.c.bf16 %v109_v42, %v109_v42  ;;  %v695_v58 = vld [vmem:[#allocation2 + $0x11c0] sm:$0xff]  ;;  %v9614_v1 = vcombine.low %v672_v50, %v680_v52  ;;  %v768_v41 = vld [vmem:[#allocation2 + $0x1408] sm:$0xff] }
  0xb9   :  { %v9629_v2 = vcombine.high %v687_v57, %v695_v58 }
  0xbb   :  { %6419 = vmatpush1.bf16.msra.mxu0 %v9500_v61  ;;  %6583 = vmatpush1.bf16.msra.mxu1 %v9502_v62  ;;  %v9615_v61 = vcombine.high %v672_v50, %v680_v52  ;;  %v696_v62 = vld [vmem:[#allocation2 + $0x11c8] sm:$0xff]  ;;  %v791_v50 = vld [vmem:[#allocation2 + $0x14c0] sm:$0xff] }
  0xbc   :  { %6420 = vmatprep.subr.bf16.mxu0 %v9517_v0  ;;  %6584 = vmatprep.subr.bf16.mxu1 %v9519_v4  ;;  %v9612_v0 = vcombine.low %v671_v48, %v679_v49  ;;  %v711_v4 = vld [vmem:[#allocation2 + $0x1240] sm:$0xff]  ;;  %v9630_v10 = vcombine.low %v688_v60, %v696_v62 }
  0xbd   :  { %v9645_v11 = vcombine.high %v703_v3, %v711_v4  ;;  %v783_v49 = vld [vmem:[#allocation2 + $0x1480] sm:$0xff] }
  0xbf   :  { %6421 = vmatpush1.bf16.msra.mxu0 %v9516_v6  ;;  %6585 = vmatpush1.bf16.msra.mxu1 %v9518_v7  ;;  %v9631_v6 = vcombine.high %v688_v60, %v696_v62  ;;  %v712_v7 = vld [vmem:[#allocation2 + $0x1248] sm:$0xff]  ;;  %v807_v60 = vld [vmem:[#allocation2 + $0x1540] sm:$0xff] }
  0xc0   :  { %6422 = vmatprep.subr.bf16.mxu0 %v9533_v8  ;;  %6586 = vmatprep.subr.bf16.mxu1 %v9535_v13  ;;  %v9628_v8 = vcombine.low %v687_v57, %v695_v58  ;;  %v727_v13 = vld [vmem:[#allocation2 + $0x12c0] sm:$0xff]  ;;  %v9725_v57 = vcombine.high %v783_v49, %v791_v50 }
  0xc1   :  { %v9661_v59 = vcombine.high %v719_v12, %v727_v13  ;;  %v799_v58 = vld [vmem:[#allocation2 + $0x1500] sm:$0xff] }
  0xc3   :  { %6423 = vmatpush1.bf16.msra.mxu0 %v9532_v15  ;;  %6587 = vmatpush1.bf16.msra.mxu1 %v9534_v18  ;;  %v9647_v15 = vcombine.high %v704_v5, %v712_v7  ;;  %v9644_v18 = vcombine.low %v703_v3, %v711_v4  ;;  %v9741_v3 = vcombine.high %v799_v58, %v807_v60  ;;  %v815_v4 = vld [vmem:[#allocation2 + $0x1580] sm:$0xff] }
  0xc4   :  { %6424 = vmatprep.subr.bf16.mxu0 %v9549_v19  ;;  %6588 = vmatprep.subr.bf16.mxu1 %v9551_v22  ;;  %v9646_v19 = vcombine.low %v704_v5, %v712_v7  ;;  %v736_v22 = vld [vmem:[#allocation2 + $0x1308] sm:$0xff]  ;;  %v823_v5 = vld [vmem:[#allocation2 + $0x15c0] sm:$0xff] }
  0xc7   :  { %6425 = vmatpush1.bf16.msra.mxu0 %v9548_v24  ;;  %6589 = vmatpush1.bf16.msra.mxu1 %v9550_v26  ;;  %v9663_v24 = vcombine.high %v720_v14, %v728_v17  ;;  %v744_v26 = vld [vmem:[#allocation2 + $0x1348] sm:$0xff]  ;;  %v839_v14 = vld [vmem:[#allocation2 + $0x1640] sm:$0xff] }
  0xc8   :  { %6426 = vmatprep.subr.bf16.mxu0 %v9565_v27  ;;  %6590 = vmatprep.subr.bf16.mxu1 %v9567_v31  ;;  %v9660_v27 = vcombine.low %v719_v12, %v727_v13  ;;  %v759_v31 = vld [vmem:[#allocation2 + $0x13c0] sm:$0xff]  ;;  %v9678_v37 = vcombine.low %v736_v22, %v744_v26  ;;  %v9757_v12 = vcombine.high %v815_v4, %v823_v5 }
  0xc9   :  { %v9693_v38 = vcombine.high %v751_v30, %v759_v31  ;;  %v831_v13 = vld [vmem:[#allocation2 + $0x1600] sm:$0xff] }
  0xcb   :  { %6427 = vmatpush1.bf16.msra.mxu0 %v9564_v34  ;;  %6591 = vmatpush1.bf16.msra.mxu1 %v9566_v35  ;;  %v9679_v34 = vcombine.high %v736_v22, %v744_v26  ;;  %v760_v35 = vld [vmem:[#allocation2 + $0x13c8] sm:$0xff]  ;;  %v855_v22 = vld [vmem:[#allocation2 + $0x16c0] sm:$0xff] }
  0xcc   :  { %6437 = vmatprep.subr.bf16.mxu0 %v9581_v63  ;;  %6601 = vmatprep.subr.bf16.mxu1 %v9583_v40  ;;  %v9676_v63 = vcombine.low %v735_v20, %v743_v21  ;;  %v775_v40 = vld [vmem:[#allocation2 + $0x1440] sm:$0xff]  ;;  %v9695_v42 = vcombine.high %v752_v32, %v760_v35  ;;  %v9773_v20 = vcombine.high %v831_v13, %v839_v14 }
  0xcd   :  { %v9709_v48 = vcombine.high %v767_v39, %v775_v40  ;;  %v847_v21 = vld [vmem:[#allocation2 + $0x1680] sm:$0xff] }
  0xce   :  { %6429 = vmatmul.mubr.bf16.vlgmr.msra.gmra.mrb[0].mxu0 %v10910_v43  ;;  %6593 = vmatmul.mubr.bf16.vlgmr.msra.gmra.mrb[0].mxu1 %v10910_v43 }
  0xcf   :  { %6438 = vmatpush1.bf16.msra.mxu0 %v9580_v45  ;;  %6602 = vmatpush1.bf16.msra.mxu1 %v9582_v46  ;;  %v776_v45 = vld [vmem:[#allocation2 + $0x1448] sm:$0xff]  ;;  %v9692_v46 = vcombine.low %v751_v30, %v759_v31  ;;  %v9789_v30 = vcombine.high %v847_v21, %v855_v22  ;;  %v863_v31 = vld [vmem:[#allocation2 + $0x1700] sm:$0xff] }
  0xd0   :  { %6439 = vmatprep.subr.bf16.mxu0 %v9597_v47  ;;  %6603 = vmatprep.subr.bf16.mxu1 %v9599_v51  ;;  %v9694_v47 = vcombine.low %v752_v32, %v760_v35  ;;  %v784_v51 = vld [vmem:[#allocation2 + $0x1488] sm:$0xff]  ;;  %v9711_v52 = vcombine.high %v768_v41, %v776_v45  ;;  %v871_v32 = vld [vmem:[#allocation2 + $0x1740] sm:$0xff] }
  0xd1   :  { %6469 = vmatprep.mubr.bf16.mxu0 %v10912_v54  ;;  %6633 = vmatprep.mubr.bf16.mxu1 %v10912_v54 }
  0xd3   :  { %6440 = vmatpush1.bf16.msra.mxu0 %v9596_v16  ;;  %6604 = vmatpush1.bf16.msra.mxu1 %v9598_v55  ;;  %v792_v16 = vld [vmem:[#allocation2 + $0x14c8] sm:$0xff]  ;;  %v9708_v55 = vcombine.low %v767_v39, %v775_v40  ;;  %v9805_v39 = vcombine.high %v863_v31, %v871_v32  ;;  %v879_v40 = vld [vmem:[#allocation2 + $0x1780] sm:$0xff] }
  0xd4   :  { %6441 = vmatprep.subr.bf16.mxu0 %v9613_v56  ;;  %6605 = vmatprep.subr.bf16.mxu1 %v9615_v61  ;;  %v9710_v56 = vcombine.low %v768_v41, %v776_v45  ;;  %v800_v61 = vld [vmem:[#allocation2 + $0x1508] sm:$0xff]  ;;  %v9727_v62 = vcombine.high %v784_v51, %v792_v16  ;;  %v887_v41 = vld [vmem:[#allocation2 + $0x17c0] sm:$0xff] }
  0xd7   :  { %6442 = vmatpush1.bf16.msra.mxu0 %v9612_v0  ;;  %6606 = vmatpush1.bf16.msra.mxu1 %v9614_v1  ;;  %v808_v0 = vld [vmem:[#allocation2 + $0x1548] sm:$0xff]  ;;  %v9724_v1 = vcombine.low %v783_v49, %v791_v50  ;;  %v9821_v50 = vcombine.high %v879_v40, %v887_v41 }
  0xd8   :  { %6443 = vmatprep.subr.bf16.mxu0 %v9629_v2  ;;  %6607 = vmatprep.subr.bf16.mxu1 %v9631_v6  ;;  %v9726_v2 = vcombine.low %v784_v51, %v792_v16  ;;  %v816_v6 = vld [vmem:[#allocation2 + $0x1588] sm:$0xff]  ;;  %v9743_v7 = vcombine.high %v800_v61, %v808_v0  ;;  %v895_v51 = vld [vmem:[#allocation2 + $0x1800] sm:$0xff] }
  0xd9   :  { %v896_v16 = vld [vmem:[#allocation2 + $0x1808] sm:$0xff] }
  0xdb   :  { %6444 = vmatpush1.bf16.msra.mxu0 %v9628_v8  ;;  %6608 = vmatpush1.bf16.msra.mxu1 %v9630_v10  ;;  %v824_v8 = vld [vmem:[#allocation2 + $0x15c8] sm:$0xff]  ;;  %v9740_v10 = vcombine.low %v799_v58, %v807_v60  ;;  %v9820_v58 = vcombine.low %v879_v40, %v887_v41 }
  0xdc   :  { %6445 = vmatprep.subr.bf16.mxu0 %v9645_v11  ;;  %6609 = vmatprep.subr.bf16.mxu1 %v9647_v15  ;;  %v9742_v11 = vcombine.low %v800_v61, %v808_v0  ;;  %v832_v15 = vld [vmem:[#allocation2 + $0x1608] sm:$0xff]  ;;  %v9759_v17 = vcombine.high %v816_v6, %v824_v8  ;;  %v911_v61 = vld [vmem:[#allocation2 + $0x1880] sm:$0xff] }
  0xdd   :  { %v912_v0 = vld [vmem:[#allocation2 + $0x1888] sm:$0xff] }
  0xdf   :  { %6446 = vmatpush1.bf16.msra.mxu0 %v9644_v18  ;;  %6610 = vmatpush1.bf16.msra.mxu1 %v9646_v19  ;;  %v840_v18 = vld [vmem:[#allocation2 + $0x1648] sm:$0xff]  ;;  %v9756_v19 = vcombine.low %v815_v4, %v823_v5  ;;  %v10927_v4 = vpack.c.bf16 %v10904_v33, %v10904_v33 }
  0xe0   :  { %6447 = vmatprep.subr.bf16.mxu0 %v9661_v59  ;;  %6611 = vmatprep.subr.bf16.mxu1 %v9663_v24  ;;  %v9758_v59 = vcombine.low %v816_v6, %v824_v8  ;;  %v848_v24 = vld [vmem:[#allocation2 + $0x1688] sm:$0xff]  ;;  %v9775_v26 = vcombine.high %v832_v15, %v840_v18  ;;  %v927_v8 = vld [vmem:[#allocation2 + $0x1900] sm:$0xff] }
  0xe3   :  { %6448 = vmatpush1.bf16.msra.mxu0 %v9660_v27  ;;  %6612 = vmatpush1.bf16.msra.mxu1 %v9662_v28  ;;  %v856_v27 = vld [vmem:[#allocation2 + $0x16c8] sm:$0xff]  ;;  %v9772_v28 = vcombine.low %v831_v13, %v839_v14 }
  0xe4   :  { %6449 = vmatprep.subr.bf16.mxu0 %v9677_v29  ;;  %6613 = vmatprep.subr.bf16.mxu1 %v9679_v34  ;;  %v9774_v29 = vcombine.low %v832_v15, %v840_v18  ;;  %v864_v34 = vld [vmem:[#allocation2 + $0x1708] sm:$0xff]  ;;  %v9791_v35 = vcombine.high %v848_v24, %v856_v27  ;;  %v943_v18 = vld [vmem:[#allocation2 + $0x1980] sm:$0xff] }
  0xe5   :  { %v936_v13 = vld [vmem:[#allocation2 + $0x1948] sm:$0xff] }
  0xe7   :  { %6450 = vmatpush1.bf16.msra.mxu0 %v9676_v63  ;;  %6614 = vmatpush1.bf16.msra.mxu1 %v9678_v37  ;;  %v872_v63 = vld [vmem:[#allocation2 + $0x1748] sm:$0xff]  ;;  %v9788_v37 = vcombine.low %v847_v21, %v855_v22 }
  0xe8   :  { %6451 = vmatprep.subr.bf16.mxu0 %v9693_v38  ;;  %6615 = vmatprep.subr.bf16.mxu1 %v9695_v42  ;;  %v9790_v38 = vcombine.low %v848_v24, %v856_v27  ;;  %v880_v42 = vld [vmem:[#allocation2 + $0x1788] sm:$0xff]  ;;  %v9807_v45 = vcombine.high %v864_v34, %v872_v63  ;;  %v9806_v49 = vcombine.low %v864_v34, %v872_v63  ;;  %v959_v27 = vld [vmem:[#allocation2 + $0x1a00] sm:$0xff] }
  0xe9   :  { %v975_v63 = vld [vmem:[#allocation2 + $0x1a80] sm:$0xff] }
  0xeb   :  { %6452 = vmatpush1.bf16.msra.mxu0 %v9692_v46  ;;  %6616 = vmatpush1.bf16.msra.mxu1 %v9694_v47  ;;  %v888_v46 = vld [vmem:[#allocation2 + $0x17c8] sm:$0xff]  ;;  %v94_v47 = vcombine.high %v10900_v23, %v10900_v23 }
  0xec   :  { %6453 = vmatprep.subr.bf16.mxu0 %v9709_v48  ;;  %6617 = vmatprep.subr.bf16.mxu1 %v9711_v52  ;;  %v9804_v48 = vcombine.low %v863_v31, %v871_v32  ;;  %v903_v52 = vld [vmem:[#allocation2 + $0x1840] sm:$0xff]  ;;  %v9822_v23 = vcombine.low %v880_v42, %v888_v46 }
  0xed   :  { %v9837_v60 = vcombine.high %v895_v51, %v903_v52 }
  0xef   :  { %6454 = vmatpush1.bf16.msra.mxu0 %v9708_v55  ;;  %6618 = vmatpush1.bf16.msra.mxu1 %v9710_v56  ;;  %v9823_v55 = vcombine.high %v880_v42, %v888_v46  ;;  %v904_v56 = vld [vmem:[#allocation2 + $0x1848] sm:$0xff]  ;;  %v991_v46 = vld [vmem:[#allocation2 + $0x1b00] sm:$0xff] }
  0xf0   :  { %6455 = vmatprep.subr.bf16.mxu0 %v9725_v57  ;;  %6619 = vmatprep.subr.bf16.mxu1 %v9727_v62  ;;  %v10921_v57 = vrot.slane %v94_v47, %v10863_v53  ;;  %v919_v62 = vld [vmem:[#allocation2 + $0x18c0] sm:$0xff]  ;;  %v9836_v53 = vcombine.low %v895_v51, %v903_v52  ;;  %v9838_v5 = vcombine.low %v896_v16, %v904_v56 }
  0xf1   :  { %v9853_v6 = vcombine.high %v911_v61, %v919_v62  ;;  %v9852_v33 = vcombine.low %v911_v61, %v919_v62  ;;  %v999_v47 = vld [vmem:[#allocation2 + $0x1b40] sm:$0xff] }
  0xf2   :  { %v9933_v52 = vcombine.high %v991_v46, %v999_v47 }
  0xf3   :  { %6456 = vmatpush1.bf16.msra.mxu0 %v9724_v1  ;;  %6620 = vmatpush1.bf16.msra.mxu1 %v9726_v2  ;;  %v9839_v1 = vcombine.high %v896_v16, %v904_v56  ;;  %v920_v2 = vld [vmem:[#allocation2 + $0x18c8] sm:$0xff]  ;;  %v1015_v56 = vld [vmem:[#allocation2 + $0x1bc0] sm:$0xff] }
  0xf4   :  { %6457 = vmatprep.subr.bf16.mxu0 %v9741_v3  ;;  %6621 = vmatprep.subr.bf16.mxu1 %v9743_v7  ;;  %v110_v3 = vcombine.high %v10921_v57, %v10921_v57  ;;  %v9855_v7 = vcombine.high %v912_v0, %v920_v2  ;;  %v9854_v14 = vcombine.low %v912_v0, %v920_v2  ;;  %v1031_v2 = vld [vmem:[#allocation2 + $0x1c40] sm:$0xff] }
  0xf7   :  { %6458 = vmatpush1.bf16.msra.mxu0 %v9740_v10  ;;  %6622 = vmatpush1.bf16.msra.mxu1 %v9742_v11  ;;  %v935_v10 = vld [vmem:[#allocation2 + $0x1940] sm:$0xff]  ;;  %v10929_v11 = vpack.c.bf16 %v110_v3, %v110_v3  ;;  %v1024_v3 = vld [vmem:[#allocation2 + $0x1c08] sm:$0xff] }
  0xf8   :  { %6459 = vmatprep.subr.bf16.mxu0 %v9757_v12  ;;  %6623 = vmatprep.subr.bf16.mxu1 %v9759_v17  ;;  %v928_v12 = vld [vmem:[#allocation2 + $0x1908] sm:$0xff]  ;;  %v9869_v15 = vcombine.high %v927_v8, %v935_v10  ;;  %v9868_v21 = vcombine.low %v927_v8, %v935_v10  ;;  %v1039_v10 = vld [vmem:[#allocation2 + $0x1c80] sm:$0xff] }
  0xf9   :  { %v9871_v17 = vcombine.high %v928_v12, %v936_v13  ;;  %v9870_v22 = vcombine.low %v928_v12, %v936_v13  ;;  %v1047_v12 = vld [vmem:[#allocation2 + $0x1cc0] sm:$0xff]  ;;  %v1040_v13 = vld [vmem:[#allocation2 + $0x1c88] sm:$0xff] }
  0xfb   :  { %6460 = vmatpush1.bf16.msra.mxu0 %v9756_v19  ;;  %6624 = vmatpush1.bf16.msra.mxu1 %v9758_v59  ;;  %v951_v19 = vld [vmem:[#allocation2 + $0x19c0] sm:$0xff]  ;;  %v944_v59 = vld [vmem:[#allocation2 + $0x1988] sm:$0xff] }
  0xfc   :  { %6461 = vmatprep.subr.bf16.mxu0 %v9773_v20  ;;  %6625 = vmatprep.subr.bf16.mxu1 %v9775_v26  ;;  %v952_v20 = vld [vmem:[#allocation2 + $0x19c8] sm:$0xff]  ;;  %v9885_v24 = vcombine.high %v943_v18, %v951_v19  ;;  %v9884_v31 = vcombine.low %v943_v18, %v951_v19  ;;  %v1055_v19 = vld [vmem:[#allocation2 + $0x1d00] sm:$0xff] }
  0xfd   :  { %v9887_v26 = vcombine.high %v944_v59, %v952_v20  ;;  %v9886_v32 = vcombine.low %v944_v59, %v952_v20  ;;  %v1063_v59 = vld [vmem:[#allocation2 + $0x1d40] sm:$0xff]  ;;  %v1056_v20 = vld [vmem:[#allocation2 + $0x1d08] sm:$0xff] }
  0xff   :  { %6462 = vmatpush1.bf16.msra.mxu0 %v9772_v28  ;;  %6626 = vmatpush1.bf16.msra.mxu1 %v9774_v29  ;;  %v967_v28 = vld [vmem:[#allocation2 + $0x1a40] sm:$0xff]  ;;  %v960_v29 = vld [vmem:[#allocation2 + $0x1a08] sm:$0xff] }
 0x100   :  { %6463 = vmatprep.subr.bf16.mxu0 %v9789_v30  ;;  %6627 = vmatprep.subr.bf16.mxu1 %v9791_v35  ;;  %v968_v30 = vld [vmem:[#allocation2 + $0x1a48] sm:$0xff]  ;;  %v9901_v34 = vcombine.high %v959_v27, %v967_v28  ;;  %v9900_v40 = vcombine.low %v959_v27, %v967_v28  ;;  %v1071_v28 = vld [vmem:[#allocation2 + $0x1d80] sm:$0xff] }
 0x101   :  { %v9903_v35 = vcombine.high %v960_v29, %v968_v30  ;;  %v9902_v41 = vcombine.low %v960_v29, %v968_v30  ;;  %v1079_v29 = vld [vmem:[#allocation2 + $0x1dc0] sm:$0xff]  ;;  %v1072_v30 = vld [vmem:[#allocation2 + $0x1d88] sm:$0xff] }
 0x103   :  { %6464 = vmatpush1.bf16.msra.mxu0 %v9788_v37  ;;  %6628 = vmatpush1.bf16.msra.mxu1 %v9790_v38  ;;  %v983_v37 = vld [vmem:[#allocation2 + $0x1ac0] sm:$0xff]  ;;  %v976_v38 = vld [vmem:[#allocation2 + $0x1a88] sm:$0xff] }
 0x104   :  { %6465 = vmatprep.subr.bf16.mxu0 %v9805_v39  ;;  %6629 = vmatprep.subr.bf16.mxu1 %v9807_v45  ;;  %v984_v39 = vld [vmem:[#allocation2 + $0x1ac8] sm:$0xff]  ;;  %v9917_v42 = vcombine.high %v975_v63, %v983_v37 }
 0x105   :  { %v9919_v45 = vcombine.high %v976_v38, %v984_v39  ;;  %v9918_v51 = vcombine.low %v976_v38, %v984_v39  ;;  %v1095_v38 = vld [vmem:[#allocation2 + $0x1e40] sm:$0xff]  ;;  %v1088_v39 = vld [vmem:[#allocation2 + $0x1e08] sm:$0xff] }
 0x107   :  { %6466 = vmatpush1.bf16.msra.mxu0 %v9804_v48  ;;  %6630 = vmatpush1.bf16.msra.mxu1 %v9806_v49  ;;  %v992_v48 = vld [vmem:[#allocation2 + $0x1b08] sm:$0xff] }
 0x108   :  { %6467 = vmatprep.subr.bf16.mxu0 %v9821_v50  ;;  %6631 = vmatprep.subr.bf16.mxu1 %v9823_v55  ;;  %v1000_v49 = vld [vmem:[#allocation2 + $0x1b48] sm:$0xff]  ;;  %v9916_v50 = vcombine.low %v975_v63, %v983_v37  ;;  %v1007_v55 = vld [vmem:[#allocation2 + $0x1b80] sm:$0xff] }
 0x109   :  { %v9935_v16 = vcombine.high %v992_v48, %v1000_v49  ;;  %v9934_v61 = vcombine.low %v992_v48, %v1000_v49  ;;  %v9949_v62 = vcombine.high %v1007_v55, %v1015_v56  ;;  %v1087_v37 = vld [vmem:[#allocation2 + $0x1e00] sm:$0xff]  ;;  %v1104_v49 = vld [vmem:[#allocation2 + $0x1e88] sm:$0xff] }
 0x10a   :  { %v1111_v48 = vld [vmem:[#allocation2 + $0x1ec0] sm:$0xff] }
 0x10b   :  { %6468 = vmatpush1.bf16.msra.mxu0 %v9820_v58  ;;  %6632 = vmatpush1.bf16.msra.mxu1 %v9822_v23  ;;  %v1008_v58 = vld [vmem:[#allocation2 + $0x1b88] sm:$0xff] }
 0x10c   :  { %6478 = vmatprep.subr.bf16.mxu0 %v9837_v60  ;;  %6642 = vmatprep.subr.bf16.mxu1 %v9839_v1  ;;  %v1016_v23 = vld [vmem:[#allocation2 + $0x1bc8] sm:$0xff]  ;;  %v9932_v60 = vcombine.low %v991_v46, %v999_v47  ;;  %v1023_v1 = vld [vmem:[#allocation2 + $0x1c00] sm:$0xff] }
 0x10d   :  { %v9951_v0 = vcombine.high %v1008_v58, %v1016_v23  ;;  %v1103_v47 = vld [vmem:[#allocation2 + $0x1e80] sm:$0xff] }
 0x10e   :  { %6470 = vmatmul.mubr.bf16.vlgmr.msra.gmra.mrb[0].mxu0 %v10927_v4  ;;  %6634 = vmatmul.mubr.bf16.vlgmr.msra.gmra.mrb[0].mxu1 %v10927_v4 }
 0x10f   :  { %6479 = vmatpush1.bf16.msra.mxu0 %v9836_v53  ;;  %6643 = vmatpush1.bf16.msra.mxu1 %v9838_v5  ;;  %v1032_v53 = vld [vmem:[#allocation2 + $0x1c48] sm:$0xff]  ;;  %v9948_v5 = vcombine.low %v1007_v55, %v1015_v56  ;;  %v1119_v56 = vld [vmem:[#allocation2 + $0x1f00] sm:$0xff] }
 0x110   :  { %6480 = vmatprep.subr.bf16.mxu0 %v9853_v6  ;;  %6644 = vmatprep.subr.bf16.mxu1 %v9855_v7  ;;  %v9950_v6 = vcombine.low %v1008_v58, %v1016_v23  ;;  %v9965_v7 = vcombine.high %v1023_v1, %v1031_v2  ;;  %v9967_v8 = vcombine.high %v1024_v3, %v1032_v53  ;;  %v1127_v58 = vld [vmem:[#allocation2 + $0x1f40] sm:$0xff]  ;;  %v1120_v23 = vld [vmem:[#allocation2 + $0x1f08] sm:$0xff] }
 0x111   :  { %6510 = vmatprep.mubr.bf16.mxu0 %v10929_v11  ;;  %6674 = vmatprep.mubr.bf16.mxu1 %v10929_v11 }
 0x113   :  { %6481 = vmatpush1.bf16.msra.mxu0 %v9852_v33  ;;  %6645 = vmatpush1.bf16.msra.mxu1 %v9854_v14  ;;  %v1048_v33 = vld [vmem:[#allocation2 + $0x1cc8] sm:$0xff]  ;;  %v9964_v14 = vcombine.low %v1023_v1, %v1031_v2  ;;  %v1135_v2 = vld [vmem:[#allocation2 + $0x1f80] sm:$0xff] }
 0x114   :  { %6482 = vmatprep.subr.bf16.mxu0 %v9869_v15  ;;  %6646 = vmatprep.subr.bf16.mxu1 %v9871_v17  ;;  %v9966_v15 = vcombine.low %v1024_v3, %v1032_v53  ;;  %v9981_v17 = vcombine.high %v1039_v10, %v1047_v12  ;;  %v9983_v18 = vcombine.high %v1040_v13, %v1048_v33  ;;  %v1143_v3 = vld [vmem:[#allocation2 + $0x1fc0] sm:$0xff]  ;;  %v1136_v53 = vld [vmem:[#allocation2 + $0x1f88] sm:$0xff] }
 0x117   :  { %6483 = vmatpush1.bf16.msra.mxu0 %v9868_v21  ;;  %6647 = vmatpush1.bf16.msra.mxu1 %v9870_v22  ;;  %v1064_v21 = vld [vmem:[#allocation2 + $0x1d48] sm:$0xff]  ;;  %v9980_v22 = vcombine.low %v1039_v10, %v1047_v12  ;;  %v129_v12 = vld [vmem:[#allocation2 + $0x10] sm:$0xff] }
 0x118   :  { %6484 = vmatprep.subr.bf16.mxu0 %v9885_v24  ;;  %6648 = vmatprep.subr.bf16.mxu1 %v9887_v26  ;;  %v9982_v24 = vcombine.low %v1040_v13, %v1048_v33  ;;  %v9997_v26 = vcombine.high %v1055_v19, %v1063_v59  ;;  %v9999_v27 = vcombine.high %v1056_v20, %v1064_v21  ;;  %v137_v13 = vld [vmem:[#allocation2 + $0x50] sm:$0xff]  ;;  %v130_v33 = vld [vmem:[#allocation2 + $0x18] sm:$0xff] }
 0x11b   :  { %6485 = vmatpush1.bf16.msra.mxu0 %v9884_v31  ;;  %6649 = vmatpush1.bf16.msra.mxu1 %v9886_v32  ;;  %v1080_v31 = vld [vmem:[#allocation2 + $0x1dc8] sm:$0xff]  ;;  %v9996_v32 = vcombine.low %v1055_v19, %v1063_v59  ;;  %v145_v59 = vld [vmem:[#allocation2 + $0x90] sm:$0xff] }
 0x11c   :  { %6486 = vmatprep.subr.bf16.mxu0 %v9901_v34  ;;  %6650 = vmatprep.subr.bf16.mxu1 %v9903_v35  ;;  %v9998_v34 = vcombine.low %v1056_v20, %v1064_v21  ;;  %v10013_v35 = vcombine.high %v1071_v28, %v1079_v29  ;;  %v10015_v63 = vcombine.high %v1072_v30, %v1080_v31  ;;  %v153_v20 = vld [vmem:[#allocation2 + $0xd0] sm:$0xff] }
 0x11d   :  { %v10937_v21 = vpack.c.bf16 %v10921_v57, %v10921_v57  ;;  %v9088_v57 = vcombine.low %v145_v59, %v153_v20 }
 0x11f   :  { %6487 = vmatpush1.bf16.msra.mxu0 %v9900_v40  ;;  %6651 = vmatpush1.bf16.msra.mxu1 %v9902_v41  ;;  %v1096_v40 = vld [vmem:[#allocation2 + $0x1e48] sm:$0xff]  ;;  %v10012_v41 = vcombine.low %v1071_v28, %v1079_v29  ;;  %v9089_v28 = vcombine.high %v145_v59, %v153_v20  ;;  %v257_v20 = vld [vmem:[#allocation2 + $0x410] sm:$0xff] }
 0x120   :  { %6488 = vmatprep.subr.bf16.mxu0 %v9917_v42  ;;  %6652 = vmatprep.subr.bf16.mxu1 %v9919_v45  ;;  %v10014_v42 = vcombine.low %v1072_v30, %v1080_v31  ;;  %v10029_v45 = vcombine.high %v1087_v37, %v1095_v38  ;;  %v10031_v46 = vcombine.high %v1088_v39, %v1096_v40  ;;  %v161_v30 = vld [vmem:[#allocation2 + $0x110] sm:$0xff] }
 0x121   :  { %v169_v31 = vld [vmem:[#allocation2 + $0x150] sm:$0xff] }
 0x123   :  { %6489 = vmatpush1.bf16.msra.mxu0 %v9916_v50  ;;  %6653 = vmatpush1.bf16.msra.mxu1 %v9918_v51  ;;  %v1112_v50 = vld [vmem:[#allocation2 + $0x1ec8] sm:$0xff]  ;;  %v10028_v51 = vcombine.low %v1087_v37, %v1095_v38  ;;  %v177_v38 = vld [vmem:[#allocation2 + $0x190] sm:$0xff] }
 0x124   :  { %6490 = vmatprep.subr.bf16.mxu0 %v9933_v52  ;;  %6654 = vmatprep.subr.bf16.mxu1 %v9935_v16  ;;  %v10030_v52 = vcombine.low %v1088_v39, %v1096_v40  ;;  %v10045_v16 = vcombine.high %v1103_v47, %v1111_v48  ;;  %v10047_v55 = vcombine.high %v1104_v49, %v1112_v50  ;;  %v185_v39 = vld [vmem:[#allocation2 + $0x1d0] sm:$0xff]  ;;  %v178_v40 = vld [vmem:[#allocation2 + $0x198] sm:$0xff] }
 0x127   :  { %6491 = vmatpush1.bf16.msra.mxu0 %v9932_v60  ;;  %6655 = vmatpush1.bf16.msra.mxu1 %v9934_v61  ;;  %v1128_v60 = vld [vmem:[#allocation2 + $0x1f48] sm:$0xff]  ;;  %v10044_v61 = vcombine.low %v1103_v47, %v1111_v48  ;;  %v193_v48 = vld [vmem:[#allocation2 + $0x210] sm:$0xff] }
 0x128   :  { %6492 = vmatprep.subr.bf16.mxu0 %v9949_v62  ;;  %6656 = vmatprep.subr.bf16.mxu1 %v9951_v0  ;;  %v10046_v62 = vcombine.low %v1104_v49, %v1112_v50  ;;  %v10061_v0 = vcombine.high %v1119_v56, %v1127_v58  ;;  %v10063_v1 = vcombine.high %v1120_v23, %v1128_v60  ;;  %v201_v49 = vld [vmem:[#allocation2 + $0x250] sm:$0xff]  ;;  %v194_v50 = vld [vmem:[#allocation2 + $0x218] sm:$0xff] }
 0x12b   :  { %6493 = vmatpush1.bf16.msra.mxu0 %v9948_v5  ;;  %6657 = vmatpush1.bf16.msra.mxu1 %v9950_v6  ;;  %v1144_v5 = vld [vmem:[#allocation2 + $0x1fc8] sm:$0xff]  ;;  %v10060_v6 = vcombine.low %v1119_v56, %v1127_v58  ;;  %v209_v58 = vld [vmem:[#allocation2 + $0x290] sm:$0xff] }
 0x12c   :  { %6494 = vmatprep.subr.bf16.mxu0 %v9965_v7  ;;  %6658 = vmatprep.subr.bf16.mxu1 %v9967_v8  ;;  %v10062_v7 = vcombine.low %v1120_v23, %v1128_v60  ;;  %v10077_v8 = vcombine.high %v1135_v2, %v1143_v3  ;;  %v10079_v10 = vcombine.high %v1136_v53, %v1144_v5  ;;  %v217_v23 = vld [vmem:[#allocation2 + $0x2d0] sm:$0xff]  ;;  %v210_v60 = vld [vmem:[#allocation2 + $0x298] sm:$0xff] }
 0x12f   :  { %6495 = vmatpush1.bf16.msra.mxu0 %v9964_v14  ;;  %6659 = vmatpush1.bf16.msra.mxu1 %v9966_v15  ;;  %v138_v14 = vld [vmem:[#allocation2 + $0x58] sm:$0xff]  ;;  %v10076_v15 = vcombine.low %v1135_v2, %v1143_v3  ;;  %v225_v3 = vld [vmem:[#allocation2 + $0x310] sm:$0xff] }
 0x130   :  { %6496 = vmatprep.subr.bf16.mxu0 %v9981_v17  ;;  %6660 = vmatprep.subr.bf16.mxu1 %v9983_v18  ;;  %v10078_v17 = vcombine.low %v1136_v53, %v1144_v5  ;;  %v9073_v18 = vcombine.high %v129_v12, %v137_v13  ;;  %v9075_v19 = vcombine.high %v130_v33, %v138_v14  ;;  %v233_v53 = vld [vmem:[#allocation2 + $0x350] sm:$0xff]  ;;  %v226_v5 = vld [vmem:[#allocation2 + $0x318] sm:$0xff] }
 0x133   :  { %6497 = vmatpush1.bf16.msra.mxu0 %v9980_v22  ;;  %6661 = vmatpush1.bf16.msra.mxu1 %v9982_v24  ;;  %v146_v22 = vld [vmem:[#allocation2 + $0x98] sm:$0xff] }
 0x134   :  { %6498 = vmatprep.subr.bf16.mxu0 %v9997_v26  ;;  %6662 = vmatprep.subr.bf16.mxu1 %v9999_v27  ;;  %v154_v24 = vld [vmem:[#allocation2 + $0xd8] sm:$0xff]  ;;  %v9072_v26 = vcombine.low %v129_v12, %v137_v13  ;;  %v9074_v27 = vcombine.low %v130_v33, %v138_v14  ;;  %v241_v13 = vld [vmem:[#allocation2 + $0x390] sm:$0xff] }
 0x135   :  { %v9091_v29 = vcombine.high %v146_v22, %v154_v24  ;;  %v249_v33 = vld [vmem:[#allocation2 + $0x3d0] sm:$0xff]  ;;  %v242_v14 = vld [vmem:[#allocation2 + $0x398] sm:$0xff] }
 0x137   :  { %6499 = vmatpush1.bf16.msra.mxu0 %v9996_v32  ;;  %6663 = vmatpush1.bf16.msra.mxu1 %v9998_v34  ;;  %v162_v32 = vld [vmem:[#allocation2 + $0x118] sm:$0xff] }
 0x138   :  { %6500 = vmatprep.subr.bf16.mxu0 %v10013_v35  ;;  %6664 = vmatprep.subr.bf16.mxu1 %v10015_v63  ;;  %v170_v34 = vld [vmem:[#allocation2 + $0x158] sm:$0xff]  ;;  %v9090_v35 = vcombine.low %v146_v22, %v154_v24  ;;  %v9105_v63 = vcombine.high %v161_v30, %v169_v31  ;;  %v265_v22 = vld [vmem:[#allocation2 + $0x450] sm:$0xff] }
 0x139   :  { %v9107_v37 = vcombine.high %v162_v32, %v170_v34  ;;  %v258_v24 = vld [vmem:[#allocation2 + $0x418] sm:$0xff] }
 0x13b   :  { %6501 = vmatpush1.bf16.msra.mxu0 %v10012_v41  ;;  %6665 = vmatpush1.bf16.msra.mxu1 %v10014_v42  ;;  %v186_v41 = vld [vmem:[#allocation2 + $0x1d8] sm:$0xff]  ;;  %v9104_v42 = vcombine.low %v161_v30, %v169_v31  ;;  %v273_v31 = vld [vmem:[#allocation2 + $0x490] sm:$0xff] }
 0x13c   :  { %6502 = vmatprep.subr.bf16.mxu0 %v10029_v45  ;;  %6666 = vmatprep.subr.bf16.mxu1 %v10031_v46  ;;  %v9106_v45 = vcombine.low %v162_v32, %v170_v34  ;;  %v9121_v46 = vcombine.high %v177_v38, %v185_v39  ;;  %v9123_v47 = vcombine.high %v178_v40, %v186_v41  ;;  %v281_v32 = vld [vmem:[#allocation2 + $0x4d0] sm:$0xff]  ;;  %v274_v34 = vld [vmem:[#allocation2 + $0x498] sm:$0xff] }
 0x13f   :  { %6503 = vmatpush1.bf16.msra.mxu0 %v10028_v51  ;;  %6667 = vmatpush1.bf16.msra.mxu1 %v10030_v52  ;;  %v202_v51 = vld [vmem:[#allocation2 + $0x258] sm:$0xff]  ;;  %v9120_v52 = vcombine.low %v177_v38, %v185_v39  ;;  %v289_v39 = vld [vmem:[#allocation2 + $0x510] sm:$0xff] }
 0x140   :  { %6504 = vmatprep.subr.bf16.mxu0 %v10045_v16  ;;  %6668 = vmatprep.subr.bf16.mxu1 %v10047_v55  ;;  %v9122_v16 = vcombine.low %v178_v40, %v186_v41  ;;  %v9137_v55 = vcombine.high %v193_v48, %v201_v49  ;;  %v9139_v56 = vcombine.high %v194_v50, %v202_v51  ;;  %v297_v40 = vld [vmem:[#allocation2 + $0x550] sm:$0xff]  ;;  %v290_v41 = vld [vmem:[#allocation2 + $0x518] sm:$0xff] }
 0x143   :  { %6505 = vmatpush1.bf16.msra.mxu0 %v10044_v61  ;;  %6669 = vmatpush1.bf16.msra.mxu1 %v10046_v62  ;;  %v218_v61 = vld [vmem:[#allocation2 + $0x2d8] sm:$0xff]  ;;  %v9136_v62 = vcombine.low %v193_v48, %v201_v49  ;;  %v305_v49 = vld [vmem:[#allocation2 + $0x590] sm:$0xff] }
 0x144   :  { %6506 = vmatprep.subr.bf16.mxu0 %v10061_v0  ;;  %6670 = vmatprep.subr.bf16.mxu1 %v10063_v1  ;;  %v9138_v0 = vcombine.low %v194_v50, %v202_v51  ;;  %v9153_v1 = vcombine.high %v209_v58, %v217_v23  ;;  %v9155_v2 = vcombine.high %v210_v60, %v218_v61  ;;  %v313_v50 = vld [vmem:[#allocation2 + $0x5d0] sm:$0xff]  ;;  %v306_v51 = vld [vmem:[#allocation2 + $0x598] sm:$0xff] }
 0x147   :  { %6507 = vmatpush1.bf16.msra.mxu0 %v10060_v6  ;;  %6671 = vmatpush1.bf16.msra.mxu1 %v10062_v7  ;;  %v234_v6 = vld [vmem:[#allocation2 + $0x358] sm:$0xff]  ;;  %v9152_v7 = vcombine.low %v209_v58, %v217_v23  ;;  %v321_v23 = vld [vmem:[#allocation2 + $0x610] sm:$0xff] }
 0x148   :  { %6508 = vmatprep.subr.bf16.mxu0 %v10077_v8  ;;  %6672 = vmatprep.subr.bf16.mxu1 %v10079_v10  ;;  %v9154_v8 = vcombine.low %v210_v60, %v218_v61  ;;  %v9169_v10 = vcombine.high %v225_v3, %v233_v53  ;;  %v9171_v12 = vcombine.high %v226_v5, %v234_v6  ;;  %v329_v60 = vld [vmem:[#allocation2 + $0x650] sm:$0xff]  ;;  %v322_v61 = vld [vmem:[#allocation2 + $0x618] sm:$0xff] }
 0x14b   :  { %6509 = vmatpush1.bf16.msra.mxu0 %v10076_v15  ;;  %6673 = vmatpush1.bf16.msra.mxu1 %v10078_v17  ;;  %v250_v15 = vld [vmem:[#allocation2 + $0x3d8] sm:$0xff]  ;;  %v9168_v17 = vcombine.low %v225_v3, %v233_v53  ;;  %v337_v53 = vld [vmem:[#allocation2 + $0x690] sm:$0xff] }
 0x14c   :  { %6683 = vmatprep.subr.bf16.mxu0 %v9073_v18  ;;  %6847 = vmatprep.subr.bf16.mxu1 %v9075_v19  ;;  %v9170_v18 = vcombine.low %v226_v5, %v234_v6  ;;  %v9185_v19 = vcombine.high %v241_v13, %v249_v33  ;;  %v9187_v59 = vcombine.high %v242_v14, %v250_v15  ;;  %v345_v5 = vld [vmem:[#allocation2 + $0x6d0] sm:$0xff]  ;;  %v338_v6 = vld [vmem:[#allocation2 + $0x698] sm:$0xff] }
 0x14e   :  { %6511 = vmatmul.mubr.bf16.vlgmr.msra.gmra.mrb[0].mxu0 %v10937_v21  ;;  %6675 = vmatmul.mubr.bf16.vlgmr.msra.gmra.mrb[0].mxu1 %v10937_v21 }
 0x14f   :  { %6684 = vmatpush1.bf16.msra.mxu0 %v9072_v26  ;;  %6848 = vmatpush1.bf16.msra.mxu1 %v9074_v27  ;;  %v266_v26 = vld [vmem:[#allocation2 + $0x458] sm:$0xff]  ;;  %v9184_v27 = vcombine.low %v241_v13, %v249_v33  ;;  %v353_v33 = vld [vmem:[#allocation2 + $0x710] sm:$0xff] }
 0x150   :  { %6685 = vmatprep.subr.bf16.mxu0 %v9089_v28  ;;  %6849 = vmatprep.subr.bf16.mxu1 %v9091_v29  ;;  %v9186_v28 = vcombine.low %v242_v14, %v250_v15  ;;  %v9201_v29 = vcombine.high %v257_v20, %v265_v22  ;;  %v9203_v30 = vcombine.high %v258_v24, %v266_v26  ;;  %v361_v14 = vld [vmem:[#allocation2 + $0x750] sm:$0xff]  ;;  %v354_v15 = vld [vmem:[#allocation2 + $0x718] sm:$0xff] }
 0x151   :  { %6715 = vmatprep.mubr.bf16.mxu0 %v10876_v9  ;;  %6879 = vmatprep.mubr.bf16.mxu1 %v10876_v9 }
 0x153   :  { %6686 = vmatpush1.bf16.msra.mxu0 %v9088_v57  ;;  %6850 = vmatpush1.bf16.msra.mxu1 %v9090_v35  ;;  %v282_v57 = vld [vmem:[#allocation2 + $0x4d8] sm:$0xff]  ;;  %v9200_v35 = vcombine.low %v257_v20, %v265_v22  ;;  %v369_v22 = vld [vmem:[#allocation2 + $0x790] sm:$0xff] }
 0x154   :  { %6687 = vmatprep.subr.bf16.mxu0 %v9105_v63  ;;  %6851 = vmatprep.subr.bf16.mxu1 %v9107_v37  ;;  %v9202_v63 = vcombine.low %v258_v24, %v266_v26  ;;  %v9217_v37 = vcombine.high %v273_v31, %v281_v32  ;;  %v9219_v38 = vcombine.high %v274_v34, %v282_v57  ;;  %v377_v24 = vld [vmem:[#allocation2 + $0x7d0] sm:$0xff]  ;;  %v370_v26 = vld [vmem:[#allocation2 + $0x798] sm:$0xff] }
 0x157   :  { %6688 = vmatpush1.bf16.msra.mxu0 %v9104_v42  ;;  %6852 = vmatpush1.bf16.msra.mxu1 %v9106_v45  ;;  %v298_v42 = vld [vmem:[#allocation2 + $0x558] sm:$0xff]  ;;  %v9216_v45 = vcombine.low %v273_v31, %v281_v32  ;;  %v385_v32 = vld [vmem:[#allocation2 + $0x810] sm:$0xff] }
 0x158   :  { %6689 = vmatprep.subr.bf16.mxu0 %v9121_v46  ;;  %6853 = vmatprep.subr.bf16.mxu1 %v9123_v47  ;;  %v9218_v46 = vcombine.low %v274_v34, %v282_v57  ;;  %v9233_v47 = vcombine.high %v289_v39, %v297_v40  ;;  %v9235_v48 = vcombine.high %v290_v41, %v298_v42  ;;  %v393_v34 = vld [vmem:[#allocation2 + $0x850] sm:$0xff]  ;;  %v386_v57 = vld [vmem:[#allocation2 + $0x818] sm:$0xff] }
 0x15b   :  { %6690 = vmatpush1.bf16.msra.mxu0 %v9120_v52  ;;  %6854 = vmatpush1.bf16.msra.mxu1 %v9122_v16  ;;  %v314_v52 = vld [vmem:[#allocation2 + $0x5d8] sm:$0xff]  ;;  %v9232_v16 = vcombine.low %v289_v39, %v297_v40  ;;  %v401_v40 = vld [vmem:[#allocation2 + $0x890] sm:$0xff] }
 0x15c   :  { %6691 = vmatprep.subr.bf16.mxu0 %v9137_v55  ;;  %6855 = vmatprep.subr.bf16.mxu1 %v9139_v56  ;;  %v9234_v55 = vcombine.low %v290_v41, %v298_v42  ;;  %v9249_v56 = vcombine.high %v305_v49, %v313_v50  ;;  %v9251_v58 = vcombine.high %v306_v51, %v314_v52  ;;  %v409_v41 = vld [vmem:[#allocation2 + $0x8d0] sm:$0xff]  ;;  %v402_v42 = vld [vmem:[#allocation2 + $0x898] sm:$0xff] }
 0x15f   :  { %6692 = vmatpush1.bf16.msra.mxu0 %v9136_v62  ;;  %6856 = vmatpush1.bf16.msra.mxu1 %v9138_v0  ;;  %v330_v62 = vld [vmem:[#allocation2 + $0x658] sm:$0xff]  ;;  %v9248_v0 = vcombine.low %v305_v49, %v313_v50  ;;  %v417_v50 = vld [vmem:[#allocation2 + $0x910] sm:$0xff] }
 0x160   :  { %6693 = vmatprep.subr.bf16.mxu0 %v9153_v1  ;;  %6857 = vmatprep.subr.bf16.mxu1 %v9155_v2  ;;  %v9250_v1 = vcombine.low %v306_v51, %v314_v52  ;;  %v9265_v2 = vcombine.high %v321_v23, %v329_v60  ;;  %v9267_v3 = vcombine.high %v322_v61, %v330_v62  ;;  %v425_v51 = vld [vmem:[#allocation2 + $0x950] sm:$0xff]  ;;  %v418_v52 = vld [vmem:[#allocation2 + $0x918] sm:$0xff] }
 0x163   :  { %6694 = vmatpush1.bf16.msra.mxu0 %v9152_v7  ;;  %6858 = vmatpush1.bf16.msra.mxu1 %v9154_v8  ;;  %v346_v7 = vld [vmem:[#allocation2 + $0x6d8] sm:$0xff]  ;;  %v9264_v8 = vcombine.low %v321_v23, %v329_v60  ;;  %v433_v60 = vld [vmem:[#allocation2 + $0x990] sm:$0xff] }
 0x164   :  { %6695 = vmatprep.subr.bf16.mxu0 %v9169_v10  ;;  %6859 = vmatprep.subr.bf16.mxu1 %v9171_v12  ;;  %v9266_v10 = vcombine.low %v322_v61, %v330_v62  ;;  %v9281_v12 = vcombine.high %v337_v53, %v345_v5  ;;  %v9283_v13 = vcombine.high %v338_v6, %v346_v7  ;;  %v441_v61 = vld [vmem:[#allocation2 + $0x9d0] sm:$0xff]  ;;  %v434_v62 = vld [vmem:[#allocation2 + $0x998] sm:$0xff] }
 0x167   :  { %6696 = vmatpush1.bf16.msra.mxu0 %v9168_v17  ;;  %6860 = vmatpush1.bf16.msra.mxu1 %v9170_v18  ;;  %v362_v17 = vld [vmem:[#allocation2 + $0x758] sm:$0xff]  ;;  %v9280_v18 = vcombine.low %v337_v53, %v345_v5  ;;  %v449_v5 = vld [vmem:[#allocation2 + $0xa10] sm:$0xff] }
 0x168   :  { %6697 = vmatprep.subr.bf16.mxu0 %v9185_v19  ;;  %6861 = vmatprep.subr.bf16.mxu1 %v9187_v59  ;;  %v9282_v19 = vcombine.low %v338_v6, %v346_v7  ;;  %v9297_v59 = vcombine.high %v353_v33, %v361_v14  ;;  %v9299_v20 = vcombine.high %v354_v15, %v362_v17  ;;  %v457_v6 = vld [vmem:[#allocation2 + $0xa50] sm:$0xff]  ;;  %v450_v7 = vld [vmem:[#allocation2 + $0xa18] sm:$0xff] }
 0x16b   :  { %6698 = vmatpush1.bf16.msra.mxu0 %v9184_v27  ;;  %6862 = vmatpush1.bf16.msra.mxu1 %v9186_v28  ;;  %v378_v27 = vld [vmem:[#allocation2 + $0x7d8] sm:$0xff]  ;;  %v9296_v28 = vcombine.low %v353_v33, %v361_v14  ;;  %v465_v14 = vld [vmem:[#allocation2 + $0xa90] sm:$0xff] }
 0x16c   :  { %6699 = vmatprep.subr.bf16.mxu0 %v9201_v29  ;;  %6863 = vmatprep.subr.bf16.mxu1 %v9203_v30  ;;  %v9298_v29 = vcombine.low %v354_v15, %v362_v17  ;;  %v9313_v30 = vcombine.high %v369_v22, %v377_v24  ;;  %v9315_v31 = vcombine.high %v370_v26, %v378_v27  ;;  %v473_v15 = vld [vmem:[#allocation2 + $0xad0] sm:$0xff]  ;;  %v466_v17 = vld [vmem:[#allocation2 + $0xa98] sm:$0xff] }
 0x16f   :  { %6700 = vmatpush1.bf16.msra.mxu0 %v9200_v35  ;;  %6864 = vmatpush1.bf16.msra.mxu1 %v9202_v63  ;;  %v394_v35 = vld [vmem:[#allocation2 + $0x858] sm:$0xff]  ;;  %v9312_v63 = vcombine.low %v369_v22, %v377_v24  ;;  %v481_v24 = vld [vmem:[#allocation2 + $0xb10] sm:$0xff] }
 0x170   :  { %6701 = vmatprep.subr.bf16.mxu0 %v9217_v37  ;;  %6865 = vmatprep.subr.bf16.mxu1 %v9219_v38  ;;  %v9314_v37 = vcombine.low %v370_v26, %v378_v27  ;;  %v9329_v38 = vcombine.high %v385_v32, %v393_v34  ;;  %v9331_v39 = vcombine.high %v386_v57, %v394_v35  ;;  %v489_v26 = vld [vmem:[#allocation2 + $0xb50] sm:$0xff]  ;;  %v482_v27 = vld [vmem:[#allocation2 + $0xb18] sm:$0xff] }
 0x173   :  { %6702 = vmatpush1.bf16.msra.mxu0 %v9216_v45  ;;  %6866 = vmatpush1.bf16.msra.mxu1 %v9218_v46  ;;  %v410_v45 = vld [vmem:[#allocation2 + $0x8d8] sm:$0xff]  ;;  %v9328_v46 = vcombine.low %v385_v32, %v393_v34  ;;  %v497_v34 = vld [vmem:[#allocation2 + $0xb90] sm:$0xff] }
 0x174   :  { %6703 = vmatprep.subr.bf16.mxu0 %v9233_v47  ;;  %6867 = vmatprep.subr.bf16.mxu1 %v9235_v48  ;;  %v9330_v47 = vcombine.low %v386_v57, %v394_v35  ;;  %v9345_v48 = vcombine.high %v401_v40, %v409_v41  ;;  %v9347_v49 = vcombine.high %v402_v42, %v410_v45  ;;  %v505_v57 = vld [vmem:[#allocation2 + $0xbd0] sm:$0xff]  ;;  %v498_v35 = vld [vmem:[#allocation2 + $0xb98] sm:$0xff] }
 0x177   :  { %6704 = vmatpush1.bf16.msra.mxu0 %v9232_v16  ;;  %6868 = vmatpush1.bf16.msra.mxu1 %v9234_v55  ;;  %v426_v16 = vld [vmem:[#allocation2 + $0x958] sm:$0xff]  ;;  %v9344_v55 = vcombine.low %v401_v40, %v409_v41  ;;  %v513_v41 = vld [vmem:[#allocation2 + $0xc10] sm:$0xff] }
 0x178   :  { %6705 = vmatprep.subr.bf16.mxu0 %v9249_v56  ;;  %6869 = vmatprep.subr.bf16.mxu1 %v9251_v58  ;;  %v9346_v56 = vcombine.low %v402_v42, %v410_v45  ;;  %v9361_v58 = vcombine.high %v417_v50, %v425_v51  ;;  %v9363_v23 = vcombine.high %v418_v52, %v426_v16  ;;  %v521_v42 = vld [vmem:[#allocation2 + $0xc50] sm:$0xff]  ;;  %v514_v45 = vld [vmem:[#allocation2 + $0xc18] sm:$0xff] }
 0x17b   :  { %6706 = vmatpush1.bf16.msra.mxu0 %v9248_v0  ;;  %6870 = vmatpush1.bf16.msra.mxu1 %v9250_v1  ;;  %v442_v0 = vld [vmem:[#allocation2 + $0x9d8] sm:$0xff]  ;;  %v9360_v1 = vcombine.low %v417_v50, %v425_v51  ;;  %v529_v51 = vld [vmem:[#allocation2 + $0xc90] sm:$0xff] }
 0x17c   :  { %6707 = vmatprep.subr.bf16.mxu0 %v9265_v2  ;;  %6871 = vmatprep.subr.bf16.mxu1 %v9267_v3  ;;  %v9362_v2 = vcombine.low %v418_v52, %v426_v16  ;;  %v9377_v3 = vcombine.high %v433_v60, %v441_v61  ;;  %v9379_v53 = vcombine.high %v434_v62, %v442_v0  ;;  %v537_v52 = vld [vmem:[#allocation2 + $0xcd0] sm:$0xff]  ;;  %v530_v16 = vld [vmem:[#allocation2 + $0xc98] sm:$0xff] }
 0x17f   :  { %6708 = vmatpush1.bf16.msra.mxu0 %v9264_v8  ;;  %6872 = vmatpush1.bf16.msra.mxu1 %v9266_v10  ;;  %v458_v8 = vld [vmem:[#allocation2 + $0xa58] sm:$0xff]  ;;  %v9376_v10 = vcombine.low %v433_v60, %v441_v61  ;;  %v545_v61 = vld [vmem:[#allocation2 + $0xd10] sm:$0xff] }
 0x180   :  { %6709 = vmatprep.subr.bf16.mxu0 %v9281_v12  ;;  %6873 = vmatprep.subr.bf16.mxu1 %v9283_v13  ;;  %v9378_v12 = vcombine.low %v434_v62, %v442_v0  ;;  %v9393_v13 = vcombine.high %v449_v5, %v457_v6  ;;  %v9395_v33 = vcombine.high %v450_v7, %v458_v8  ;;  %v553_v62 = vld [vmem:[#allocation2 + $0xd50] sm:$0xff]  ;;  %v546_v0 = vld [vmem:[#allocation2 + $0xd18] sm:$0xff] }
 0x183   :  { %6710 = vmatpush1.bf16.msra.mxu0 %v9280_v18  ;;  %6874 = vmatpush1.bf16.msra.mxu1 %v9282_v19  ;;  %v474_v18 = vld [vmem:[#allocation2 + $0xad8] sm:$0xff]  ;;  %v9392_v19 = vcombine.low %v449_v5, %v457_v6  ;;  %v561_v6 = vld [vmem:[#allocation2 + $0xd90] sm:$0xff] }
 0x184   :  { %6711 = vmatprep.subr.bf16.mxu0 %v9297_v59  ;;  %6875 = vmatprep.subr.bf16.mxu1 %v9299_v20  ;;  %v9394_v59 = vcombine.low %v450_v7, %v458_v8  ;;  %v9409_v20 = vcombine.high %v465_v14, %v473_v15  ;;  %v9411_v22 = vcombine.high %v466_v17, %v474_v18  ;;  %v569_v7 = vld [vmem:[#allocation2 + $0xdd0] sm:$0xff]  ;;  %v562_v8 = vld [vmem:[#allocation2 + $0xd98] sm:$0xff] }
 0x187   :  { %6712 = vmatpush1.bf16.msra.mxu0 %v9296_v28  ;;  %6876 = vmatpush1.bf16.msra.mxu1 %v9298_v29  ;;  %v490_v28 = vld [vmem:[#allocation2 + $0xb58] sm:$0xff]  ;;  %v9408_v29 = vcombine.low %v465_v14, %v473_v15  ;;  %v577_v15 = vld [vmem:[#allocation2 + $0xe10] sm:$0xff] }
 0x188   :  { %6713 = vmatprep.subr.bf16.mxu0 %v9313_v30  ;;  %6877 = vmatprep.subr.bf16.mxu1 %v9315_v31  ;;  %v9410_v30 = vcombine.low %v466_v17, %v474_v18  ;;  %v9425_v31 = vcombine.high %v481_v24, %v489_v26  ;;  %v9427_v32 = vcombine.high %v482_v27, %v490_v28  ;;  %v585_v17 = vld [vmem:[#allocation2 + $0xe50] sm:$0xff]  ;;  %v578_v18 = vld [vmem:[#allocation2 + $0xe18] sm:$0xff] }
 0x18b   :  { %6714 = vmatpush1.bf16.msra.mxu0 %v9312_v63  ;;  %6878 = vmatpush1.bf16.msra.mxu1 %v9314_v37  ;;  %v506_v63 = vld [vmem:[#allocation2 + $0xbd8] sm:$0xff]  ;;  %v9424_v37 = vcombine.low %v481_v24, %v489_v26  ;;  %v593_v26 = vld [vmem:[#allocation2 + $0xe90] sm:$0xff] }
 0x18c   :  { %6724 = vmatprep.subr.bf16.mxu0 %v9329_v38  ;;  %6888 = vmatprep.subr.bf16.mxu1 %v9331_v39  ;;  %v9426_v38 = vcombine.low %v482_v27, %v490_v28  ;;  %v9441_v39 = vcombine.high %v497_v34, %v505_v57  ;;  %v9443_v40 = vcombine.high %v498_v35, %v506_v63  ;;  %v601_v27 = vld [vmem:[#allocation2 + $0xed0] sm:$0xff]  ;;  %v594_v28 = vld [vmem:[#allocation2 + $0xe98] sm:$0xff] }
 0x18e   :  { %6716 = vmatmul.mubr.bf16.vlgmr.msra.gmra.mrb[4].mxu0 %v10889_v25  ;;  %6880 = vmatmul.mubr.bf16.vlgmr.msra.gmra.mrb[4].mxu1 %v10889_v25 }
 0x18f   :  { %6725 = vmatpush1.bf16.msra.mxu0 %v9328_v46  ;;  %6889 = vmatpush1.bf16.msra.mxu1 %v9330_v47  ;;  %v522_v46 = vld [vmem:[#allocation2 + $0xc58] sm:$0xff]  ;;  %v9440_v47 = vcombine.low %v497_v34, %v505_v57  ;;  %v609_v57 = vld [vmem:[#allocation2 + $0xf10] sm:$0xff] }
 0x190   :  { %6726 = vmatprep.subr.bf16.mxu0 %v9345_v48  ;;  %6890 = vmatprep.subr.bf16.mxu1 %v9347_v49  ;;  %v9442_v48 = vcombine.low %v498_v35, %v506_v63  ;;  %v9457_v49 = vcombine.high %v513_v41, %v521_v42  ;;  %v9459_v50 = vcombine.high %v514_v45, %v522_v46  ;;  %v617_v35 = vld [vmem:[#allocation2 + $0xf50] sm:$0xff]  ;;  %v610_v63 = vld [vmem:[#allocation2 + $0xf18] sm:$0xff] }
 0x191   :  { %6756 = vmatprep.mubr.bf16.mxu0 %v10891_v36  ;;  %6920 = vmatprep.mubr.bf16.mxu1 %v10891_v36 }
 0x193   :  { %6727 = vmatpush1.bf16.msra.mxu0 %v9344_v55  ;;  %6891 = vmatpush1.bf16.msra.mxu1 %v9346_v56  ;;  %v538_v55 = vld [vmem:[#allocation2 + $0xcd8] sm:$0xff]  ;;  %v9456_v56 = vcombine.low %v513_v41, %v521_v42  ;;  %v625_v42 = vld [vmem:[#allocation2 + $0xf90] sm:$0xff] }
 0x194   :  { %6728 = vmatprep.subr.bf16.mxu0 %v9361_v58  ;;  %6892 = vmatprep.subr.bf16.mxu1 %v9363_v23  ;;  %v9458_v58 = vcombine.low %v514_v45, %v522_v46  ;;  %v9473_v23 = vcombine.high %v529_v51, %v537_v52  ;;  %v9475_v60 = vcombine.high %v530_v16, %v538_v55  ;;  %v633_v45 = vld [vmem:[#allocation2 + $0xfd0] sm:$0xff]  ;;  %v626_v46 = vld [vmem:[#allocation2 + $0xf98] sm:$0xff] }
 0x197   :  { %6729 = vmatpush1.bf16.msra.mxu0 %v9360_v1  ;;  %6893 = vmatpush1.bf16.msra.mxu1 %v9362_v2  ;;  %v554_v1 = vld [vmem:[#allocation2 + $0xd58] sm:$0xff]  ;;  %v9472_v2 = vcombine.low %v529_v51, %v537_v52  ;;  %v641_v52 = vld [vmem:[#allocation2 + $0x1010] sm:$0xff] }
 0x198   :  { %6730 = vmatprep.subr.bf16.mxu0 %v9377_v3  ;;  %6894 = vmatprep.subr.bf16.mxu1 %v9379_v53  ;;  %v9474_v3 = vcombine.low %v530_v16, %v538_v55  ;;  %v9489_v53 = vcombine.high %v545_v61, %v553_v62  ;;  %v9491_v5 = vcombine.high %v546_v0, %v554_v1  ;;  %v649_v16 = vld [vmem:[#allocation2 + $0x1050] sm:$0xff]  ;;  %v642_v55 = vld [vmem:[#allocation2 + $0x1018] sm:$0xff] }
 0x19b   :  { %6731 = vmatpush1.bf16.msra.mxu0 %v9376_v10  ;;  %6895 = vmatpush1.bf16.msra.mxu1 %v9378_v12  ;;  %v570_v10 = vld [vmem:[#allocation2 + $0xdd8] sm:$0xff]  ;;  %v9488_v12 = vcombine.low %v545_v61, %v553_v62  ;;  %v657_v62 = vld [vmem:[#allocation2 + $0x1090] sm:$0xff] }
 0x19c   :  { %6732 = vmatprep.subr.bf16.mxu0 %v9393_v13  ;;  %6896 = vmatprep.subr.bf16.mxu1 %v9395_v33  ;;  %v9490_v13 = vcombine.low %v546_v0, %v554_v1  ;;  %v9505_v33 = vcombine.high %v561_v6, %v569_v7  ;;  %v9507_v14 = vcombine.high %v562_v8, %v570_v10  ;;  %v665_v0 = vld [vmem:[#allocation2 + $0x10d0] sm:$0xff]  ;;  %v658_v1 = vld [vmem:[#allocation2 + $0x1098] sm:$0xff] }
 0x19f   :  { %6733 = vmatpush1.bf16.msra.mxu0 %v9392_v19  ;;  %6897 = vmatpush1.bf16.msra.mxu1 %v9394_v59  ;;  %v586_v19 = vld [vmem:[#allocation2 + $0xe58] sm:$0xff]  ;;  %v9504_v59 = vcombine.low %v561_v6, %v569_v7  ;;  %v673_v7 = vld [vmem:[#allocation2 + $0x1110] sm:$0xff] }
 0x1a0   :  { %6734 = vmatprep.subr.bf16.mxu0 %v9409_v20  ;;  %6898 = vmatprep.subr.bf16.mxu1 %v9411_v22  ;;  %v9506_v20 = vcombine.low %v562_v8, %v570_v10  ;;  %v9521_v22 = vcombine.high %v577_v15, %v585_v17  ;;  %v9523_v24 = vcombine.high %v578_v18, %v586_v19  ;;  %v681_v8 = vld [vmem:[#allocation2 + $0x1150] sm:$0xff]  ;;  %v674_v10 = vld [vmem:[#allocation2 + $0x1118] sm:$0xff] }
 0x1a3   :  { %6735 = vmatpush1.bf16.msra.mxu0 %v9408_v29  ;;  %6899 = vmatpush1.bf16.msra.mxu1 %v9410_v30  ;;  %v602_v29 = vld [vmem:[#allocation2 + $0xed8] sm:$0xff]  ;;  %v9520_v30 = vcombine.low %v577_v15, %v585_v17  ;;  %v689_v17 = vld [vmem:[#allocation2 + $0x1190] sm:$0xff] }
 0x1a4   :  { %6736 = vmatprep.subr.bf16.mxu0 %v9425_v31  ;;  %6900 = vmatprep.subr.bf16.mxu1 %v9427_v32  ;;  %v9522_v31 = vcombine.low %v578_v18, %v586_v19  ;;  %v9537_v32 = vcombine.high %v593_v26, %v601_v27  ;;  %v9539_v34 = vcombine.high %v594_v28, %v602_v29  ;;  %v697_v18 = vld [vmem:[#allocation2 + $0x11d0] sm:$0xff]  ;;  %v690_v19 = vld [vmem:[#allocation2 + $0x1198] sm:$0xff] }
 0x1a7   :  { %6737 = vmatpush1.bf16.msra.mxu0 %v9424_v37  ;;  %6901 = vmatpush1.bf16.msra.mxu1 %v9426_v38  ;;  %v618_v37 = vld [vmem:[#allocation2 + $0xf58] sm:$0xff]  ;;  %v9536_v38 = vcombine.low %v593_v26, %v601_v27  ;;  %v705_v27 = vld [vmem:[#allocation2 + $0x1210] sm:$0xff] }
 0x1a8   :  { %6738 = vmatprep.subr.bf16.mxu0 %v9441_v39  ;;  %6902 = vmatprep.subr.bf16.mxu1 %v9443_v40  ;;  %v9538_v39 = vcombine.low %v594_v28, %v602_v29  ;;  %v9553_v40 = vcombine.high %v609_v57, %v617_v35  ;;  %v9555_v41 = vcombine.high %v610_v63, %v618_v37  ;;  %v713_v28 = vld [vmem:[#allocation2 + $0x1250] sm:$0xff]  ;;  %v706_v29 = vld [vmem:[#allocation2 + $0x1218] sm:$0xff] }
 0x1ab   :  { %6739 = vmatpush1.bf16.msra.mxu0 %v9440_v47  ;;  %6903 = vmatpush1.bf16.msra.mxu1 %v9442_v48  ;;  %v634_v47 = vld [vmem:[#allocation2 + $0xfd8] sm:$0xff]  ;;  %v9552_v48 = vcombine.low %v609_v57, %v617_v35  ;;  %v721_v35 = vld [vmem:[#allocation2 + $0x1290] sm:$0xff] }
 0x1ac   :  { %6740 = vmatprep.subr.bf16.mxu0 %v9457_v49  ;;  %6904 = vmatprep.subr.bf16.mxu1 %v9459_v50  ;;  %v9554_v49 = vcombine.low %v610_v63, %v618_v37  ;;  %v9569_v50 = vcombine.high %v625_v42, %v633_v45  ;;  %v9571_v51 = vcombine.high %v626_v46, %v634_v47  ;;  %v729_v63 = vld [vmem:[#allocation2 + $0x12d0] sm:$0xff]  ;;  %v722_v37 = vld [vmem:[#allocation2 + $0x1298] sm:$0xff] }
 0x1af   :  { %6741 = vmatpush1.bf16.msra.mxu0 %v9456_v56  ;;  %6905 = vmatpush1.bf16.msra.mxu1 %v9458_v58  ;;  %v650_v56 = vld [vmem:[#allocation2 + $0x1058] sm:$0xff]  ;;  %v9568_v58 = vcombine.low %v625_v42, %v633_v45  ;;  %v737_v45 = vld [vmem:[#allocation2 + $0x1310] sm:$0xff] }
 0x1b0   :  { %6742 = vmatprep.subr.bf16.mxu0 %v9473_v23  ;;  %6906 = vmatprep.subr.bf16.mxu1 %v9475_v60  ;;  %v9570_v23 = vcombine.low %v626_v46, %v634_v47  ;;  %v9585_v60 = vcombine.high %v641_v52, %v649_v16  ;;  %v9587_v61 = vcombine.high %v642_v55, %v650_v56  ;;  %v745_v46 = vld [vmem:[#allocation2 + $0x1350] sm:$0xff]  ;;  %v738_v47 = vld [vmem:[#allocation2 + $0x1318] sm:$0xff] }
 0x1b3   :  { %6743 = vmatpush1.bf16.msra.mxu0 %v9472_v2  ;;  %6907 = vmatpush1.bf16.msra.mxu1 %v9474_v3  ;;  %v666_v2 = vld [vmem:[#allocation2 + $0x10d8] sm:$0xff]  ;;  %v9584_v3 = vcombine.low %v641_v52, %v649_v16  ;;  %v753_v16 = vld [vmem:[#allocation2 + $0x1390] sm:$0xff] }
 0x1b4   :  { %6744 = vmatprep.subr.bf16.mxu0 %v9489_v53  ;;  %6908 = vmatprep.subr.bf16.mxu1 %v9491_v5  ;;  %v9586_v53 = vcombine.low %v642_v55, %v650_v56  ;;  %v9601_v5 = vcombine.high %v657_v62, %v665_v0  ;;  %v9603_v6 = vcombine.high %v658_v1, %v666_v2  ;;  %v761_v55 = vld [vmem:[#allocation2 + $0x13d0] sm:$0xff]  ;;  %v754_v56 = vld [vmem:[#allocation2 + $0x1398] sm:$0xff] }
 0x1b7   :  { %6745 = vmatpush1.bf16.msra.mxu0 %v9488_v12  ;;  %6909 = vmatpush1.bf16.msra.mxu1 %v9490_v13  ;;  %v682_v12 = vld [vmem:[#allocation2 + $0x1158] sm:$0xff]  ;;  %v9600_v13 = vcombine.low %v657_v62, %v665_v0  ;;  %v769_v0 = vld [vmem:[#allocation2 + $0x1410] sm:$0xff] }
 0x1b8   :  { %6746 = vmatprep.subr.bf16.mxu0 %v9505_v33  ;;  %6910 = vmatprep.subr.bf16.mxu1 %v9507_v14  ;;  %v9602_v33 = vcombine.low %v658_v1, %v666_v2  ;;  %v9617_v14 = vcombine.high %v673_v7, %v681_v8  ;;  %v9619_v15 = vcombine.high %v674_v10, %v682_v12  ;;  %v777_v1 = vld [vmem:[#allocation2 + $0x1450] sm:$0xff]  ;;  %v770_v2 = vld [vmem:[#allocation2 + $0x1418] sm:$0xff] }
 0x1bb   :  { %6747 = vmatpush1.bf16.msra.mxu0 %v9504_v59  ;;  %6911 = vmatpush1.bf16.msra.mxu1 %v9506_v20  ;;  %v698_v59 = vld [vmem:[#allocation2 + $0x11d8] sm:$0xff]  ;;  %v9616_v20 = vcombine.low %v673_v7, %v681_v8  ;;  %v785_v8 = vld [vmem:[#allocation2 + $0x1490] sm:$0xff] }
 0x1bc   :  { %6748 = vmatprep.subr.bf16.mxu0 %v9521_v22  ;;  %6912 = vmatprep.subr.bf16.mxu1 %v9523_v24  ;;  %v9618_v22 = vcombine.low %v674_v10, %v682_v12  ;;  %v9633_v24 = vcombine.high %v689_v17, %v697_v18  ;;  %v9635_v26 = vcombine.high %v690_v19, %v698_v59  ;;  %v793_v10 = vld [vmem:[#allocation2 + $0x14d0] sm:$0xff]  ;;  %v786_v12 = vld [vmem:[#allocation2 + $0x1498] sm:$0xff] }
 0x1bf   :  { %6749 = vmatpush1.bf16.msra.mxu0 %v9520_v30  ;;  %6913 = vmatpush1.bf16.msra.mxu1 %v9522_v31  ;;  %v714_v30 = vld [vmem:[#allocation2 + $0x1258] sm:$0xff]  ;;  %v9632_v31 = vcombine.low %v689_v17, %v697_v18  ;;  %v801_v18 = vld [vmem:[#allocation2 + $0x1510] sm:$0xff] }
 0x1c0   :  { %6750 = vmatprep.subr.bf16.mxu0 %v9537_v32  ;;  %6914 = vmatprep.subr.bf16.mxu1 %v9539_v34  ;;  %v9634_v32 = vcombine.low %v690_v19, %v698_v59  ;;  %v9649_v34 = vcombine.high %v705_v27, %v713_v28  ;;  %v9651_v57 = vcombine.high %v706_v29, %v714_v30  ;;  %v809_v19 = vld [vmem:[#allocation2 + $0x1550] sm:$0xff]  ;;  %v802_v59 = vld [vmem:[#allocation2 + $0x1518] sm:$0xff] }
 0x1c3   :  { %6751 = vmatpush1.bf16.msra.mxu0 %v9536_v38  ;;  %6915 = vmatpush1.bf16.msra.mxu1 %v9538_v39  ;;  %v730_v38 = vld [vmem:[#allocation2 + $0x12d8] sm:$0xff]  ;;  %v9648_v39 = vcombine.low %v705_v27, %v713_v28  ;;  %v817_v28 = vld [vmem:[#allocation2 + $0x1590] sm:$0xff] }
 0x1c4   :  { %6752 = vmatprep.subr.bf16.mxu0 %v9553_v40  ;;  %6916 = vmatprep.subr.bf16.mxu1 %v9555_v41  ;;  %v9650_v40 = vcombine.low %v706_v29, %v714_v30  ;;  %v9665_v41 = vcombine.high %v721_v35, %v729_v63  ;;  %v9667_v42 = vcombine.high %v722_v37, %v730_v38  ;;  %v825_v29 = vld [vmem:[#allocation2 + $0x15d0] sm:$0xff]  ;;  %v818_v30 = vld [vmem:[#allocation2 + $0x1598] sm:$0xff] }
 0x1c7   :  { %6753 = vmatpush1.bf16.msra.mxu0 %v9552_v48  ;;  %6917 = vmatpush1.bf16.msra.mxu1 %v9554_v49  ;;  %v746_v48 = vld [vmem:[#allocation2 + $0x1358] sm:$0xff]  ;;  %v9664_v49 = vcombine.low %v721_v35, %v729_v63  ;;  %v833_v63 = vld [vmem:[#allocation2 + $0x1610] sm:$0xff] }
 0x1c8   :  { %6754 = vmatprep.subr.bf16.mxu0 %v9569_v50  ;;  %6918 = vmatprep.subr.bf16.mxu1 %v9571_v51  ;;  %v9666_v50 = vcombine.low %v722_v37, %v730_v38  ;;  %v9681_v51 = vcombine.high %v737_v45, %v745_v46  ;;  %v9683_v52 = vcombine.high %v738_v47, %v746_v48  ;;  %v841_v37 = vld [vmem:[#allocation2 + $0x1650] sm:$0xff]  ;;  %v834_v38 = vld [vmem:[#allocation2 + $0x1618] sm:$0xff] }
 0x1cb   :  { %6755 = vmatpush1.bf16.msra.mxu0 %v9568_v58  ;;  %6919 = vmatpush1.bf16.msra.mxu1 %v9570_v23  ;;  %v762_v58 = vld [vmem:[#allocation2 + $0x13d8] sm:$0xff]  ;;  %v9680_v23 = vcombine.low %v737_v45, %v745_v46  ;;  %v849_v46 = vld [vmem:[#allocation2 + $0x1690] sm:$0xff] }
 0x1cc   :  { %6765 = vmatprep.subr.bf16.mxu0 %v9585_v60  ;;  %6929 = vmatprep.subr.bf16.mxu1 %v9587_v61  ;;  %v9682_v60 = vcombine.low %v738_v47, %v746_v48  ;;  %v9697_v61 = vcombine.high %v753_v16, %v761_v55  ;;  %v9699_v62 = vcombine.high %v754_v56, %v762_v58  ;;  %v857_v47 = vld [vmem:[#allocation2 + $0x16d0] sm:$0xff]  ;;  %v850_v48 = vld [vmem:[#allocation2 + $0x1698] sm:$0xff] }
 0x1ce   :  { %6757 = vmatmul.mubr.bf16.vlgmr.msra.gmra.mrb[4].mxu0 %v10910_v43  ;;  %6921 = vmatmul.mubr.bf16.vlgmr.msra.gmra.mrb[4].mxu1 %v10910_v43 }
 0x1cf   :  { %6766 = vmatpush1.bf16.msra.mxu0 %v9584_v3  ;;  %6930 = vmatpush1.bf16.msra.mxu1 %v9586_v53  ;;  %v778_v3 = vld [vmem:[#allocation2 + $0x1458] sm:$0xff]  ;;  %v9696_v53 = vcombine.low %v753_v16, %v761_v55  ;;  %v865_v55 = vld [vmem:[#allocation2 + $0x1710] sm:$0xff] }
 0x1d0   :  { %6767 = vmatprep.subr.bf16.mxu0 %v9601_v5  ;;  %6931 = vmatprep.subr.bf16.mxu1 %v9603_v6  ;;  %v9698_v5 = vcombine.low %v754_v56, %v762_v58  ;;  %v9713_v6 = vcombine.high %v769_v0, %v777_v1  ;;  %v9715_v7 = vcombine.high %v770_v2, %v778_v3  ;;  %v873_v56 = vld [vmem:[#allocation2 + $0x1750] sm:$0xff]  ;;  %v866_v58 = vld [vmem:[#allocation2 + $0x1718] sm:$0xff] }
 0x1d1   :  { %6797 = vmatprep.mubr.bf16.mxu0 %v10912_v54  ;;  %6961 = vmatprep.mubr.bf16.mxu1 %v10912_v54 }
 0x1d3   :  { %6768 = vmatpush1.bf16.msra.mxu0 %v9600_v13  ;;  %6932 = vmatpush1.bf16.msra.mxu1 %v9602_v33  ;;  %v794_v13 = vld [vmem:[#allocation2 + $0x14d8] sm:$0xff]  ;;  %v9712_v33 = vcombine.low %v769_v0, %v777_v1  ;;  %v881_v1 = vld [vmem:[#allocation2 + $0x1790] sm:$0xff] }
 0x1d4   :  { %6769 = vmatprep.subr.bf16.mxu0 %v9617_v14  ;;  %6933 = vmatprep.subr.bf16.mxu1 %v9619_v15  ;;  %v9714_v14 = vcombine.low %v770_v2, %v778_v3  ;;  %v9729_v15 = vcombine.high %v785_v8, %v793_v10  ;;  %v9731_v17 = vcombine.high %v786_v12, %v794_v13  ;;  %v889_v2 = vld [vmem:[#allocation2 + $0x17d0] sm:$0xff]  ;;  %v882_v3 = vld [vmem:[#allocation2 + $0x1798] sm:$0xff] }
 0x1d7   :  { %6770 = vmatpush1.bf16.msra.mxu0 %v9616_v20  ;;  %6934 = vmatpush1.bf16.msra.mxu1 %v9618_v22  ;;  %v810_v20 = vld [vmem:[#allocation2 + $0x1558] sm:$0xff]  ;;  %v9728_v22 = vcombine.low %v785_v8, %v793_v10  ;;  %v897_v10 = vld [vmem:[#allocation2 + $0x1810] sm:$0xff] }
 0x1d8   :  { %6771 = vmatprep.subr.bf16.mxu0 %v9633_v24  ;;  %6935 = vmatprep.subr.bf16.mxu1 %v9635_v26  ;;  %v9730_v24 = vcombine.low %v786_v12, %v794_v13  ;;  %v9745_v26 = vcombine.high %v801_v18, %v809_v19  ;;  %v9747_v27 = vcombine.high %v802_v59, %v810_v20  ;;  %v905_v12 = vld [vmem:[#allocation2 + $0x1850] sm:$0xff]  ;;  %v898_v13 = vld [vmem:[#allocation2 + $0x1818] sm:$0xff] }
 0x1db   :  { %6772 = vmatpush1.bf16.msra.mxu0 %v9632_v31  ;;  %6936 = vmatpush1.bf16.msra.mxu1 %v9634_v32  ;;  %v826_v31 = vld [vmem:[#allocation2 + $0x15d8] sm:$0xff]  ;;  %v9744_v32 = vcombine.low %v801_v18, %v809_v19  ;;  %v913_v19 = vld [vmem:[#allocation2 + $0x1890] sm:$0xff] }
 0x1dc   :  { %6773 = vmatprep.subr.bf16.mxu0 %v9649_v34  ;;  %6937 = vmatprep.subr.bf16.mxu1 %v9651_v57  ;;  %v9746_v34 = vcombine.low %v802_v59, %v810_v20  ;;  %v9761_v57 = vcombine.high %v817_v28, %v825_v29  ;;  %v9763_v35 = vcombine.high %v818_v30, %v826_v31  ;;  %v921_v59 = vld [vmem:[#allocation2 + $0x18d0] sm:$0xff]  ;;  %v914_v20 = vld [vmem:[#allocation2 + $0x1898] sm:$0xff] }
 0x1df   :  { %6774 = vmatpush1.bf16.msra.mxu0 %v9648_v39  ;;  %6938 = vmatpush1.bf16.msra.mxu1 %v9650_v40  ;;  %v842_v39 = vld [vmem:[#allocation2 + $0x1658] sm:$0xff]  ;;  %v9760_v40 = vcombine.low %v817_v28, %v825_v29  ;;  %v929_v29 = vld [vmem:[#allocation2 + $0x1910] sm:$0xff] }
 0x1e0   :  { %6775 = vmatprep.subr.bf16.mxu0 %v9665_v41  ;;  %6939 = vmatprep.subr.bf16.mxu1 %v9667_v42  ;;  %v9762_v41 = vcombine.low %v818_v30, %v826_v31  ;;  %v9777_v42 = vcombine.high %v833_v63, %v841_v37  ;;  %v9779_v45 = vcombine.high %v834_v38, %v842_v39  ;;  %v937_v30 = vld [vmem:[#allocation2 + $0x1950] sm:$0xff]  ;;  %v930_v31 = vld [vmem:[#allocation2 + $0x1918] sm:$0xff] }
 0x1e3   :  { %6776 = vmatpush1.bf16.msra.mxu0 %v9664_v49  ;;  %6940 = vmatpush1.bf16.msra.mxu1 %v9666_v50  ;;  %v858_v49 = vld [vmem:[#allocation2 + $0x16d8] sm:$0xff]  ;;  %v9776_v50 = vcombine.low %v833_v63, %v841_v37  ;;  %v945_v37 = vld [vmem:[#allocation2 + $0x1990] sm:$0xff] }
 0x1e4   :  { %6777 = vmatprep.subr.bf16.mxu0 %v9681_v51  ;;  %6941 = vmatprep.subr.bf16.mxu1 %v9683_v52  ;;  %v9778_v51 = vcombine.low %v834_v38, %v842_v39  ;;  %v9793_v52 = vcombine.high %v849_v46, %v857_v47  ;;  %v9795_v16 = vcombine.high %v850_v48, %v858_v49  ;;  %v953_v38 = vld [vmem:[#allocation2 + $0x19d0] sm:$0xff]  ;;  %v946_v39 = vld [vmem:[#allocation2 + $0x1998] sm:$0xff] }
 0x1e7   :  { %6778 = vmatpush1.bf16.msra.mxu0 %v9680_v23  ;;  %6942 = vmatpush1.bf16.msra.mxu1 %v9682_v60  ;;  %v874_v23 = vld [vmem:[#allocation2 + $0x1758] sm:$0xff]  ;;  %v9792_v60 = vcombine.low %v849_v46, %v857_v47  ;;  %v961_v47 = vld [vmem:[#allocation2 + $0x1a10] sm:$0xff] }
 0x1e8   :  { %6779 = vmatprep.subr.bf16.mxu0 %v9697_v61  ;;  %6943 = vmatprep.subr.bf16.mxu1 %v9699_v62  ;;  %v9794_v61 = vcombine.low %v850_v48, %v858_v49  ;;  %v9809_v62 = vcombine.high %v865_v55, %v873_v56  ;;  %v9811_v0 = vcombine.high %v866_v58, %v874_v23  ;;  %v969_v48 = vld [vmem:[#allocation2 + $0x1a50] sm:$0xff]  ;;  %v962_v49 = vld [vmem:[#allocation2 + $0x1a18] sm:$0xff] }
 0x1eb   :  { %6780 = vmatpush1.bf16.msra.mxu0 %v9696_v53  ;;  %6944 = vmatpush1.bf16.msra.mxu1 %v9698_v5  ;;  %v890_v53 = vld [vmem:[#allocation2 + $0x17d8] sm:$0xff]  ;;  %v9808_v5 = vcombine.low %v865_v55, %v873_v56  ;;  %v977_v56 = vld [vmem:[#allocation2 + $0x1a90] sm:$0xff] }
 0x1ec   :  { %6781 = vmatprep.subr.bf16.mxu0 %v9713_v6  ;;  %6945 = vmatprep.subr.bf16.mxu1 %v9715_v7  ;;  %v9810_v6 = vcombine.low %v866_v58, %v874_v23  ;;  %v9825_v7 = vcombine.high %v881_v1, %v889_v2  ;;  %v9827_v8 = vcombine.high %v882_v3, %v890_v53  ;;  %v985_v58 = vld [vmem:[#allocation2 + $0x1ad0] sm:$0xff]  ;;  %v978_v23 = vld [vmem:[#allocation2 + $0x1a98] sm:$0xff] }
 0x1ef   :  { %6782 = vmatpush1.bf16.msra.mxu0 %v9712_v33  ;;  %6946 = vmatpush1.bf16.msra.mxu1 %v9714_v14  ;;  %v906_v33 = vld [vmem:[#allocation2 + $0x1858] sm:$0xff]  ;;  %v9824_v14 = vcombine.low %v881_v1, %v889_v2  ;;  %v993_v2 = vld [vmem:[#allocation2 + $0x1b10] sm:$0xff] }
 0x1f0   :  { %6783 = vmatprep.subr.bf16.mxu0 %v9729_v15  ;;  %6947 = vmatprep.subr.bf16.mxu1 %v9731_v17  ;;  %v9826_v15 = vcombine.low %v882_v3, %v890_v53  ;;  %v9841_v17 = vcombine.high %v897_v10, %v905_v12  ;;  %v9843_v18 = vcombine.high %v898_v13, %v906_v33  ;;  %v1001_v3 = vld [vmem:[#allocation2 + $0x1b50] sm:$0xff]  ;;  %v994_v53 = vld [vmem:[#allocation2 + $0x1b18] sm:$0xff] }
 0x1f3   :  { %6784 = vmatpush1.bf16.msra.mxu0 %v9728_v22  ;;  %6948 = vmatpush1.bf16.msra.mxu1 %v9730_v24  ;;  %v922_v22 = vld [vmem:[#allocation2 + $0x18d8] sm:$0xff]  ;;  %v9840_v24 = vcombine.low %v897_v10, %v905_v12 }
 0x1f4   :  { %6785 = vmatprep.subr.bf16.mxu0 %v9745_v26  ;;  %6949 = vmatprep.subr.bf16.mxu1 %v9747_v27  ;;  %v9842_v26 = vcombine.low %v898_v13, %v906_v33  ;;  %v9857_v27 = vcombine.high %v913_v19, %v921_v59  ;;  %v9859_v28 = vcombine.high %v914_v20, %v922_v22  ;;  %v1009_v13 = vld [vmem:[#allocation2 + $0x1b90] sm:$0xff] }
 0x1f5   :  { %v1017_v33 = vld [vmem:[#allocation2 + $0x1bd0] sm:$0xff] }
 0x1f7   :  { %6786 = vmatpush1.bf16.msra.mxu0 %v9744_v32  ;;  %6950 = vmatpush1.bf16.msra.mxu1 %v9746_v34  ;;  %v938_v32 = vld [vmem:[#allocation2 + $0x1958] sm:$0xff]  ;;  %v9856_v34 = vcombine.low %v913_v19, %v921_v59 }
 0x1f8   :  { %6787 = vmatprep.subr.bf16.mxu0 %v9761_v57  ;;  %6951 = vmatprep.subr.bf16.mxu1 %v9763_v35  ;;  %v9858_v57 = vcombine.low %v914_v20, %v922_v22  ;;  %v9873_v35 = vcombine.high %v929_v29, %v937_v30  ;;  %v9875_v63 = vcombine.high %v930_v31, %v938_v32 }
 0x1f9   :  { %v9936_v20 = vcombine.low %v993_v2, %v1001_v3 }
 0x1fb   :  { %6788 = vmatpush1.bf16.msra.mxu0 %v9760_v40  ;;  %6952 = vmatpush1.bf16.msra.mxu1 %v9762_v41  ;;  %v954_v40 = vld [vmem:[#allocation2 + $0x19d8] sm:$0xff]  ;;  %v9872_v41 = vcombine.low %v929_v29, %v937_v30  ;;  %v1025_v30 = vld [vmem:[#allocation2 + $0x1c10] sm:$0xff] }
 0x1fc   :  { %6789 = vmatprep.subr.bf16.mxu0 %v9777_v42  ;;  %6953 = vmatprep.subr.bf16.mxu1 %v9779_v45  ;;  %v9874_v42 = vcombine.low %v930_v31, %v938_v32  ;;  %v9889_v45 = vcombine.high %v945_v37, %v953_v38  ;;  %v9891_v46 = vcombine.high %v946_v39, %v954_v40  ;;  %v1033_v31 = vld [vmem:[#allocation2 + $0x1c50] sm:$0xff]  ;;  %v1026_v32 = vld [vmem:[#allocation2 + $0x1c18] sm:$0xff] }
 0x1ff   :  { %6790 = vmatpush1.bf16.msra.mxu0 %v9776_v50  ;;  %6954 = vmatpush1.bf16.msra.mxu1 %v9778_v51  ;;  %v970_v50 = vld [vmem:[#allocation2 + $0x1a58] sm:$0xff]  ;;  %v9888_v51 = vcombine.low %v945_v37, %v953_v38  ;;  %v1041_v38 = vld [vmem:[#allocation2 + $0x1c90] sm:$0xff] }
 0x200   :  { %6791 = vmatprep.subr.bf16.mxu0 %v9793_v52  ;;  %6955 = vmatprep.subr.bf16.mxu1 %v9795_v16  ;;  %v9890_v52 = vcombine.low %v946_v39, %v954_v40  ;;  %v9905_v16 = vcombine.high %v961_v47, %v969_v48  ;;  %v9907_v55 = vcombine.high %v962_v49, %v970_v50  ;;  %v1049_v39 = vld [vmem:[#allocation2 + $0x1cd0] sm:$0xff]  ;;  %v1042_v40 = vld [vmem:[#allocation2 + $0x1c98] sm:$0xff] }
 0x203   :  { %6792 = vmatpush1.bf16.msra.mxu0 %v9792_v60  ;;  %6956 = vmatpush1.bf16.msra.mxu1 %v9794_v61  ;;  %v986_v60 = vld [vmem:[#allocation2 + $0x1ad8] sm:$0xff]  ;;  %v9904_v61 = vcombine.low %v961_v47, %v969_v48  ;;  %v1057_v48 = vld [vmem:[#allocation2 + $0x1d10] sm:$0xff] }
 0x204   :  { %6793 = vmatprep.subr.bf16.mxu0 %v9809_v62  ;;  %6957 = vmatprep.subr.bf16.mxu1 %v9811_v0  ;;  %v9906_v62 = vcombine.low %v962_v49, %v970_v50  ;;  %v9921_v0 = vcombine.high %v977_v56, %v985_v58  ;;  %v9923_v1 = vcombine.high %v978_v23, %v986_v60  ;;  %v1065_v49 = vld [vmem:[#allocation2 + $0x1d50] sm:$0xff]  ;;  %v1058_v50 = vld [vmem:[#allocation2 + $0x1d18] sm:$0xff] }
 0x207   :  { %6794 = vmatpush1.bf16.msra.mxu0 %v9808_v5  ;;  %6958 = vmatpush1.bf16.msra.mxu1 %v9810_v6  ;;  %v1002_v5 = vld [vmem:[#allocation2 + $0x1b58] sm:$0xff]  ;;  %v9920_v6 = vcombine.low %v977_v56, %v985_v58  ;;  %v1073_v58 = vld [vmem:[#allocation2 + $0x1d90] sm:$0xff] }
 0x208   :  { %6795 = vmatprep.subr.bf16.mxu0 %v9825_v7  ;;  %6959 = vmatprep.subr.bf16.mxu1 %v9827_v8  ;;  %v9922_v7 = vcombine.low %v978_v23, %v986_v60  ;;  %v9937_v8 = vcombine.high %v993_v2, %v1001_v3  ;;  %v9939_v12 = vcombine.high %v994_v53, %v1002_v5  ;;  %v1081_v23 = vld [vmem:[#allocation2 + $0x1dd0] sm:$0xff]  ;;  %v1074_v60 = vld [vmem:[#allocation2 + $0x1d98] sm:$0xff] }
 0x209   :  { %v1089_v3 = vld [vmem:[#allocation2 + $0x1e10] sm:$0xff] }
 0x20b   :  { %6796 = vmatpush1.bf16.msra.mxu0 %v9824_v14  ;;  %6960 = vmatpush1.bf16.msra.mxu1 %v9826_v15 }
 0x20c   :  { %6806 = vmatprep.subr.bf16.mxu0 %v9841_v17  ;;  %6970 = vmatprep.subr.bf16.mxu1 %v9843_v18  ;;  %v1010_v17 = vld [vmem:[#allocation2 + $0x1b98] sm:$0xff] }
 0x20d   :  { %v1018_v18 = vld [vmem:[#allocation2 + $0x1bd8] sm:$0xff] }
 0x20e   :  { %6798 = vmatmul.mubr.bf16.vlgmr.msra.gmra.mrb[4].mxu0 %v10927_v4  ;;  %6962 = vmatmul.mubr.bf16.vlgmr.msra.gmra.mrb[4].mxu1 %v10927_v4  ;;  %v9955_v29 = vcombine.high %v1010_v17, %v1018_v18 }
 0x20f   :  { %6807 = vmatpush1.bf16.msra.mxu0 %v9840_v24  ;;  %6971 = vmatpush1.bf16.msra.mxu1 %v9842_v26  ;;  %v9938_v26 = vcombine.low %v994_v53, %v1002_v5  ;;  %v1097_v53 = vld [vmem:[#allocation2 + $0x1e50] sm:$0xff]  ;;  %v1090_v5 = vld [vmem:[#allocation2 + $0x1e18] sm:$0xff] }
 0x210   :  { %6808 = vmatprep.subr.bf16.mxu0 %v9857_v27  ;;  %6972 = vmatprep.subr.bf16.mxu1 %v9859_v28  ;;  %v9953_v27 = vcombine.high %v1009_v13, %v1017_v33 }
 0x211   :  { %6838 = vmatprep.mubr.bf16.mxu0 %v10929_v11  ;;  %7002 = vmatprep.mubr.bf16.mxu1 %v10929_v11 }
 0x213   :  { %6809 = vmatpush1.bf16.msra.mxu0 %v9856_v34  ;;  %6973 = vmatpush1.bf16.msra.mxu1 %v9858_v57  ;;  %v1034_v34 = vld [vmem:[#allocation2 + $0x1c58] sm:$0xff]  ;;  %v9952_v57 = vcombine.low %v1009_v13, %v1017_v33  ;;  %v1105_v33 = vld [vmem:[#allocation2 + $0x1e90] sm:$0xff] }
 0x214   :  { %6810 = vmatprep.subr.bf16.mxu0 %v9873_v35  ;;  %6974 = vmatprep.subr.bf16.mxu1 %v9875_v63  ;;  %v9954_v35 = vcombine.low %v1010_v17, %v1018_v18  ;;  %v9969_v63 = vcombine.high %v1025_v30, %v1033_v31  ;;  %v9971_v37 = vcombine.high %v1026_v32, %v1034_v34  ;;  %v1113_v17 = vld [vmem:[#allocation2 + $0x1ed0] sm:$0xff]  ;;  %v1106_v18 = vld [vmem:[#allocation2 + $0x1e98] sm:$0xff] }
 0x217   :  { %6811 = vmatpush1.bf16.msra.mxu0 %v9872_v41  ;;  %6975 = vmatpush1.bf16.msra.mxu1 %v9874_v42  ;;  %v1050_v41 = vld [vmem:[#allocation2 + $0x1cd8] sm:$0xff]  ;;  %v9968_v42 = vcombine.low %v1025_v30, %v1033_v31  ;;  %v10048_v31 = vcombine.low %v1105_v33, %v1113_v17 }
 0x218   :  { %6812 = vmatprep.subr.bf16.mxu0 %v9889_v45  ;;  %6976 = vmatprep.subr.bf16.mxu1 %v9891_v46  ;;  %v9970_v45 = vcombine.low %v1026_v32, %v1034_v34  ;;  %v9985_v46 = vcombine.high %v1041_v38, %v1049_v39  ;;  %v9987_v47 = vcombine.high %v1042_v40, %v1050_v41  ;;  %v1130_v30 = vld [vmem:[#allocation2 + $0x1f58] sm:$0xff] }
 0x21b   :  { %6813 = vmatpush1.bf16.msra.mxu0 %v9888_v51  ;;  %6977 = vmatpush1.bf16.msra.mxu1 %v9890_v52  ;;  %v1066_v51 = vld [vmem:[#allocation2 + $0x1d58] sm:$0xff]  ;;  %v9984_v52 = vcombine.low %v1041_v38, %v1049_v39 }
 0x21c   :  { %6814 = vmatprep.subr.bf16.mxu0 %v9905_v16  ;;  %6978 = vmatprep.subr.bf16.mxu1 %v9907_v55  ;;  %v9986_v16 = vcombine.low %v1042_v40, %v1050_v41  ;;  %v10001_v55 = vcombine.high %v1057_v48, %v1065_v49  ;;  %v10003_v56 = vcombine.high %v1058_v50, %v1066_v51  ;;  %v1146_v38 = vld [vmem:[#allocation2 + $0x1fd8] sm:$0xff] }
 0x21f   :  { %6815 = vmatpush1.bf16.msra.mxu0 %v9904_v61  ;;  %6979 = vmatpush1.bf16.msra.mxu1 %v9906_v62  ;;  %v1082_v61 = vld [vmem:[#allocation2 + $0x1dd8] sm:$0xff]  ;;  %v10000_v62 = vcombine.low %v1057_v48, %v1065_v49  ;;  %v140_v48 = vld [vmem:[#allocation2 + $0x68] sm:$0xff] }
 0x220   :  { %6816 = vmatprep.subr.bf16.mxu0 %v9921_v0  ;;  %6980 = vmatprep.subr.bf16.mxu1 %v9923_v1  ;;  %v10002_v0 = vcombine.low %v1058_v50, %v1066_v51  ;;  %v10017_v1 = vcombine.high %v1073_v58, %v1081_v23  ;;  %v10019_v2 = vcombine.high %v1074_v60, %v1082_v61 }
 0x221   :  { %v10955_v10 = vpop.f32.mrb[0].mxu0  ;;  %v10957_v14 = vpop.f32.mrb[0].mxu1 }
 0x222   :  { %v10959_v15 = vpop.f32.mrb[1].mxu0  ;;  %v10961_v19 = vpop.f32.mrb[1].mxu1 }
 0x223   :  { %v6516_v59 = vpop.f32.mrb[2].mxu0  ;;  %6817 = vmatpush1.bf16.msra.mxu0 %v9920_v6  ;;  %v6680_v22 = vpop.f32.mrb[2].mxu1  ;;  %6981 = vmatpush1.bf16.msra.mxu1 %v9922_v7  ;;  %v1098_v6 = vld [vmem:[#allocation2 + $0x1e58] sm:$0xff]  ;;  %v10016_v7 = vcombine.low %v1073_v58, %v1081_v23  ;;  %v156_v58 = vld [vmem:[#allocation2 + $0xe8] sm:$0xff] }
 0x224   :  { %v6517_v24 = vpop.f32.mrb[3].mxu0  ;;  %6818 = vmatprep.subr.bf16.mxu0 %v9937_v8  ;;  %v6681_v28 = vpop.f32.mrb[3].mxu1  ;;  %6982 = vmatprep.subr.bf16.mxu1 %v9939_v12  ;;  %v10018_v8 = vcombine.low %v1074_v60, %v1082_v61  ;;  %v10033_v12 = vcombine.high %v1089_v3, %v1097_v53  ;;  %v10035_v13 = vcombine.high %v1090_v5, %v1098_v6  ;;  %v1114_v59 = vld [vmem:[#allocation2 + $0x1ed8] sm:$0xff] }
 0x225   :  { %v10034_v22 = vcombine.low %v1090_v5, %v1098_v6  ;;  %v10049_v24 = vcombine.high %v1105_v33, %v1113_v17  ;;  %v1129_v28 = vld [vmem:[#allocation2 + $0x1f50] sm:$0xff]  ;;  %v10050_v32 = vcombine.low %v1106_v18, %v1114_v59  ;;  %v188_v33 = vld [vmem:[#allocation2 + $0x1e8] sm:$0xff] }
 0x227   :  { %6819 = vmatpush1.bf16.msra.mxu0 %v9936_v20  ;;  %6983 = vmatpush1.bf16.msra.mxu1 %v9938_v26  ;;  %v10032_v20 = vcombine.low %v1089_v3, %v1097_v53  ;;  %v10051_v26 = vcombine.high %v1106_v18, %v1114_v59  ;;  %v172_v3 = vld [vmem:[#allocation2 + $0x168] sm:$0xff] }
 0x228   :  { %6820 = vmatprep.subr.bf16.mxu0 %v9953_v27  ;;  %6984 = vmatprep.subr.bf16.mxu1 %v9955_v29  ;;  %v1121_v27 = vld [vmem:[#allocation2 + $0x1f10] sm:$0xff]  ;;  %v1122_v29 = vld [vmem:[#allocation2 + $0x1f18] sm:$0xff] }
 0x229   :  { %v10065_v34 = vcombine.high %v1121_v27, %v1129_v28  ;;  %v10064_v39 = vcombine.low %v1121_v27, %v1129_v28  ;;  %v10066_v40 = vcombine.low %v1122_v29, %v1130_v30  ;;  %v204_v27 = vld [vmem:[#allocation2 + $0x268] sm:$0xff] }
 0x22b   :  { %6821 = vmatpush1.bf16.msra.mxu0 %v9952_v57  ;;  %6985 = vmatpush1.bf16.msra.mxu1 %v9954_v35  ;;  %v10067_v57 = vcombine.high %v1122_v29, %v1130_v30  ;;  %v1137_v35 = vld [vmem:[#allocation2 + $0x1f90] sm:$0xff] }
 0x22c   :  { %6822 = vmatprep.subr.bf16.mxu0 %v9969_v63  ;;  %6986 = vmatprep.subr.bf16.mxu1 %v9971_v37  ;;  %v1145_v63 = vld [vmem:[#allocation2 + $0x1fd0] sm:$0xff]  ;;  %v1138_v37 = vld [vmem:[#allocation2 + $0x1f98] sm:$0xff] }
 0x22d   :  { %v10081_v41 = vcombine.high %v1137_v35, %v1145_v63  ;;  %v10080_v49 = vcombine.low %v1137_v35, %v1145_v63  ;;  %v10082_v50 = vcombine.low %v1138_v37, %v1146_v38  ;;  %v220_v35 = vld [vmem:[#allocation2 + $0x2e8] sm:$0xff] }
 0x22f   :  { %6823 = vmatpush1.bf16.msra.mxu0 %v9968_v42  ;;  %6987 = vmatpush1.bf16.msra.mxu1 %v9970_v45  ;;  %v10083_v42 = vcombine.high %v1138_v37, %v1146_v38  ;;  %v131_v45 = vld [vmem:[#allocation2 + $0x20] sm:$0xff] }
 0x230   :  { %6824 = vmatprep.subr.bf16.mxu0 %v9985_v46  ;;  %6988 = vmatprep.subr.bf16.mxu1 %v9987_v47  ;;  %v139_v46 = vld [vmem:[#allocation2 + $0x60] sm:$0xff]  ;;  %v132_v47 = vld [vmem:[#allocation2 + $0x28] sm:$0xff] }
 0x231   :  { %v9077_v51 = vcombine.high %v131_v45, %v139_v46  ;;  %v9076_v23 = vcombine.low %v131_v45, %v139_v46  ;;  %v9078_v60 = vcombine.low %v132_v47, %v140_v48  ;;  %v236_v45 = vld [vmem:[#allocation2 + $0x368] sm:$0xff] }
 0x233   :  { %6825 = vmatpush1.bf16.msra.mxu0 %v9984_v52  ;;  %6989 = vmatpush1.bf16.msra.mxu1 %v9986_v16  ;;  %v9079_v52 = vcombine.high %v132_v47, %v140_v48  ;;  %v147_v16 = vld [vmem:[#allocation2 + $0xa0] sm:$0xff] }
 0x234   :  { %6826 = vmatprep.subr.bf16.mxu0 %v10001_v55  ;;  %6990 = vmatprep.subr.bf16.mxu1 %v10003_v56  ;;  %v155_v55 = vld [vmem:[#allocation2 + $0xe0] sm:$0xff]  ;;  %v148_v56 = vld [vmem:[#allocation2 + $0xa8] sm:$0xff] }
 0x235   :  { %v9093_v61 = vcombine.high %v147_v16, %v155_v55  ;;  %v9092_v53 = vcombine.low %v147_v16, %v155_v55  ;;  %v9094_v5 = vcombine.low %v148_v56, %v156_v58  ;;  %v252_v16 = vld [vmem:[#allocation2 + $0x3e8] sm:$0xff] }
 0x237   :  { %6827 = vmatpush1.bf16.msra.mxu0 %v10000_v62  ;;  %6991 = vmatpush1.bf16.msra.mxu1 %v10002_v0  ;;  %v9095_v62 = vcombine.high %v148_v56, %v156_v58  ;;  %v163_v0 = vld [vmem:[#allocation2 + $0x120] sm:$0xff] }
 0x238   :  { %6828 = vmatprep.subr.bf16.mxu0 %v10017_v1  ;;  %6992 = vmatprep.subr.bf16.mxu1 %v10019_v2  ;;  %v171_v1 = vld [vmem:[#allocation2 + $0x160] sm:$0xff]  ;;  %v164_v2 = vld [vmem:[#allocation2 + $0x128] sm:$0xff] }
 0x239   :  { %v9109_v6 = vcombine.high %v163_v0, %v171_v1  ;;  %v9108_v17 = vcombine.low %v163_v0, %v171_v1  ;;  %v9110_v18 = vcombine.low %v164_v2, %v172_v3  ;;  %v268_v0 = vld [vmem:[#allocation2 + $0x468] sm:$0xff] }
 0x23b   :  { %6829 = vmatpush1.bf16.msra.mxu0 %v10016_v7  ;;  %6993 = vmatpush1.bf16.msra.mxu1 %v10018_v8  ;;  %v9111_v7 = vcombine.high %v164_v2, %v172_v3  ;;  %v179_v8 = vld [vmem:[#allocation2 + $0x1a0] sm:$0xff] }
 0x23c   :  { %6830 = vmatprep.subr.bf16.mxu0 %v10033_v12  ;;  %6994 = vmatprep.subr.bf16.mxu1 %v10035_v13  ;;  %v187_v12 = vld [vmem:[#allocation2 + $0x1e0] sm:$0xff]  ;;  %v180_v13 = vld [vmem:[#allocation2 + $0x1a8] sm:$0xff] }
 0x23d   :  { %v9125_v59 = vcombine.high %v179_v8, %v187_v12  ;;  %v9124_v28 = vcombine.low %v179_v8, %v187_v12  ;;  %v9126_v29 = vcombine.low %v180_v13, %v188_v33  ;;  %v284_v8 = vld [vmem:[#allocation2 + $0x4e8] sm:$0xff] }
 0x23f   :  { %6831 = vmatpush1.bf16.msra.mxu0 %v10032_v20  ;;  %6995 = vmatpush1.bf16.msra.mxu1 %v10034_v22  ;;  %v9127_v20 = vcombine.high %v180_v13, %v188_v33  ;;  %v195_v22 = vld [vmem:[#allocation2 + $0x220] sm:$0xff] }
 0x240   :  { %6832 = vmatprep.subr.bf16.mxu0 %v10049_v24  ;;  %6996 = vmatprep.subr.bf16.mxu1 %v10051_v26  ;;  %v203_v24 = vld [vmem:[#allocation2 + $0x260] sm:$0xff]  ;;  %v196_v26 = vld [vmem:[#allocation2 + $0x228] sm:$0xff] }
 0x241   :  { %v9141_v30 = vcombine.high %v195_v22, %v203_v24  ;;  %v9140_v63 = vcombine.low %v195_v22, %v203_v24  ;;  %v9142_v37 = vcombine.low %v196_v26, %v204_v27  ;;  %v300_v22 = vld [vmem:[#allocation2 + $0x568] sm:$0xff] }
 0x243   :  { %6833 = vmatpush1.bf16.msra.mxu0 %v10048_v31  ;;  %6997 = vmatpush1.bf16.msra.mxu1 %v10050_v32  ;;  %v9143_v31 = vcombine.high %v196_v26, %v204_v27  ;;  %v211_v32 = vld [vmem:[#allocation2 + $0x2a0] sm:$0xff] }
 0x244   :  { %6834 = vmatprep.subr.bf16.mxu0 %v10065_v34  ;;  %6998 = vmatprep.subr.bf16.mxu1 %v10067_v57  ;;  %v219_v34 = vld [vmem:[#allocation2 + $0x2e0] sm:$0xff]  ;;  %v212_v57 = vld [vmem:[#allocation2 + $0x2a8] sm:$0xff] }
 0x245   :  { %v9157_v38 = vcombine.high %v211_v32, %v219_v34  ;;  %v9156_v46 = vcombine.low %v211_v32, %v219_v34  ;;  %v9158_v47 = vcombine.low %v212_v57, %v220_v35  ;;  %v316_v32 = vld [vmem:[#allocation2 + $0x5e8] sm:$0xff] }
 0x247   :  { %6835 = vmatpush1.bf16.msra.mxu0 %v10064_v39  ;;  %6999 = vmatpush1.bf16.msra.mxu1 %v10066_v40  ;;  %v9159_v39 = vcombine.high %v212_v57, %v220_v35  ;;  %v227_v40 = vld [vmem:[#allocation2 + $0x320] sm:$0xff] }
 0x248   :  { %6836 = vmatprep.subr.bf16.mxu0 %v10081_v41  ;;  %7000 = vmatprep.subr.bf16.mxu1 %v10083_v42  ;;  %v235_v41 = vld [vmem:[#allocation2 + $0x360] sm:$0xff]  ;;  %v228_v42 = vld [vmem:[#allocation2 + $0x328] sm:$0xff] }
 0x249   :  { %v9173_v48 = vcombine.high %v227_v40, %v235_v41  ;;  %v9172_v55 = vcombine.low %v227_v40, %v235_v41  ;;  %v9174_v56 = vcombine.low %v228_v42, %v236_v45  ;;  %v332_v40 = vld [vmem:[#allocation2 + $0x668] sm:$0xff] }
 0x24b   :  { %6837 = vmatpush1.bf16.msra.mxu0 %v10080_v49  ;;  %7001 = vmatpush1.bf16.msra.mxu1 %v10082_v50  ;;  %v9175_v49 = vcombine.high %v228_v42, %v236_v45  ;;  %v243_v50 = vld [vmem:[#allocation2 + $0x3a0] sm:$0xff] }
 0x24c   :  { %7011 = vmatprep.subr.bf16.mxu0 %v9077_v51  ;;  %7175 = vmatprep.subr.bf16.mxu1 %v9079_v52  ;;  %v251_v51 = vld [vmem:[#allocation2 + $0x3e0] sm:$0xff]  ;;  %v244_v52 = vld [vmem:[#allocation2 + $0x3a8] sm:$0xff] }
 0x24d   :  { %v9189_v58 = vcombine.high %v243_v50, %v251_v51  ;;  %v9188_v1 = vcombine.low %v243_v50, %v251_v51  ;;  %v9190_v2 = vcombine.low %v244_v52, %v252_v16  ;;  %v348_v50 = vld [vmem:[#allocation2 + $0x6e8] sm:$0xff] }
 0x24e   :  { %6839 = vmatmul.mubr.bf16.vlgmr.msra.gmra.mrb[4].mxu0 %v10937_v21  ;;  %7003 = vmatmul.mubr.bf16.vlgmr.msra.gmra.mrb[4].mxu1 %v10937_v21 }
 0x24f   :  { %7012 = vmatpush1.bf16.msra.mxu0 %v9076_v23  ;;  %7176 = vmatpush1.bf16.msra.mxu1 %v9078_v60  ;;  %v9191_v23 = vcombine.high %v244_v52, %v252_v16  ;;  %v259_v60 = vld [vmem:[#allocation2 + $0x420] sm:$0xff] }
 0x250   :  { %7013 = vmatprep.subr.bf16.mxu0 %v9093_v61  ;;  %7177 = vmatprep.subr.bf16.mxu1 %v9095_v62  ;;  %v267_v61 = vld [vmem:[#allocation2 + $0x460] sm:$0xff]  ;;  %v260_v62 = vld [vmem:[#allocation2 + $0x428] sm:$0xff] }
 0x251   :  { %7043 = vmatprep.mubr.bf16.mxu0 %v10876_v9  ;;  %7207 = vmatprep.mubr.bf16.mxu1 %v10876_v9  ;;  %v9205_v3 = vcombine.high %v259_v60, %v267_v61  ;;  %v9204_v12 = vcombine.low %v259_v60, %v267_v61  ;;  %v9206_v13 = vcombine.low %v260_v62, %v268_v0  ;;  %v364_v60 = vld [vmem:[#allocation2 + $0x768] sm:$0xff] }
 0x253   :  { %7014 = vmatpush1.bf16.msra.mxu0 %v9092_v53  ;;  %7178 = vmatpush1.bf16.msra.mxu1 %v9094_v5  ;;  %v9207_v53 = vcombine.high %v260_v62, %v268_v0  ;;  %v275_v5 = vld [vmem:[#allocation2 + $0x4a0] sm:$0xff] }
 0x254   :  { %7015 = vmatprep.subr.bf16.mxu0 %v9109_v6  ;;  %7179 = vmatprep.subr.bf16.mxu1 %v9111_v7  ;;  %v283_v6 = vld [vmem:[#allocation2 + $0x4e0] sm:$0xff]  ;;  %v276_v7 = vld [vmem:[#allocation2 + $0x4a8] sm:$0xff] }
 0x255   :  { %v9221_v33 = vcombine.high %v275_v5, %v283_v6  ;;  %v9220_v24 = vcombine.low %v275_v5, %v283_v6  ;;  %v9222_v26 = vcombine.low %v276_v7, %v284_v8  ;;  %v380_v5 = vld [vmem:[#allocation2 + $0x7e8] sm:$0xff] }
 0x257   :  { %7016 = vmatpush1.bf16.msra.mxu0 %v9108_v17  ;;  %7180 = vmatpush1.bf16.msra.mxu1 %v9110_v18  ;;  %v9223_v17 = vcombine.high %v276_v7, %v284_v8  ;;  %v291_v18 = vld [vmem:[#allocation2 + $0x520] sm:$0xff] }
 0x258   :  { %7017 = vmatprep.subr.bf16.mxu0 %v9125_v59  ;;  %7181 = vmatprep.subr.bf16.mxu1 %v9127_v20  ;;  %v299_v59 = vld [vmem:[#allocation2 + $0x560] sm:$0xff]  ;;  %v292_v20 = vld [vmem:[#allocation2 + $0x528] sm:$0xff] }
 0x259   :  { %v9237_v27 = vcombine.high %v291_v18, %v299_v59  ;;  %v9236_v34 = vcombine.low %v291_v18, %v299_v59  ;;  %v9238_v57 = vcombine.low %v292_v20, %v300_v22  ;;  %v396_v18 = vld [vmem:[#allocation2 + $0x868] sm:$0xff] }
 0x25b   :  { %7018 = vmatpush1.bf16.msra.mxu0 %v9124_v28  ;;  %7182 = vmatpush1.bf16.msra.mxu1 %v9126_v29  ;;  %v9239_v28 = vcombine.high %v292_v20, %v300_v22  ;;  %v307_v29 = vld [vmem:[#allocation2 + $0x5a0] sm:$0xff] }
 0x25c   :  { %7019 = vmatprep.subr.bf16.mxu0 %v9141_v30  ;;  %7183 = vmatprep.subr.bf16.mxu1 %v9143_v31  ;;  %v315_v30 = vld [vmem:[#allocation2 + $0x5e0] sm:$0xff]  ;;  %v308_v31 = vld [vmem:[#allocation2 + $0x5a8] sm:$0xff] }
 0x25d   :  { %v9253_v35 = vcombine.high %v307_v29, %v315_v30  ;;  %v9252_v41 = vcombine.low %v307_v29, %v315_v30  ;;  %v9254_v42 = vcombine.low %v308_v31, %v316_v32  ;;  %v412_v29 = vld [vmem:[#allocation2 + $0x8e8] sm:$0xff] }
 0x25f   :  { %7020 = vmatpush1.bf16.msra.mxu0 %v9140_v63  ;;  %7184 = vmatpush1.bf16.msra.mxu1 %v9142_v37  ;;  %v9255_v63 = vcombine.high %v308_v31, %v316_v32  ;;  %v323_v37 = vld [vmem:[#allocation2 + $0x620] sm:$0xff] }
 0x260   :  { %7021 = vmatprep.subr.bf16.mxu0 %v9157_v38  ;;  %7185 = vmatprep.subr.bf16.mxu1 %v9159_v39  ;;  %v331_v38 = vld [vmem:[#allocation2 + $0x660] sm:$0xff]  ;;  %v324_v39 = vld [vmem:[#allocation2 + $0x628] sm:$0xff] }
 0x261   :  { %v9269_v45 = vcombine.high %v323_v37, %v331_v38  ;;  %v9268_v51 = vcombine.low %v323_v37, %v331_v38  ;;  %v9270_v52 = vcombine.low %v324_v39, %v332_v40  ;;  %v428_v37 = vld [vmem:[#allocation2 + $0x968] sm:$0xff] }
 0x263   :  { %7022 = vmatpush1.bf16.msra.mxu0 %v9156_v46  ;;  %7186 = vmatpush1.bf16.msra.mxu1 %v9158_v47  ;;  %v9271_v46 = vcombine.high %v324_v39, %v332_v40  ;;  %v339_v47 = vld [vmem:[#allocation2 + $0x6a0] sm:$0xff] }
 0x264   :  { %7023 = vmatprep.subr.bf16.mxu0 %v9173_v48  ;;  %7187 = vmatprep.subr.bf16.mxu1 %v9175_v49  ;;  %v347_v48 = vld [vmem:[#allocation2 + $0x6e0] sm:$0xff]  ;;  %v340_v49 = vld [vmem:[#allocation2 + $0x6a8] sm:$0xff] }
 0x265   :  { %v9285_v16 = vcombine.high %v339_v47, %v347_v48  ;;  %v9284_v61 = vcombine.low %v339_v47, %v347_v48  ;;  %v9286_v62 = vcombine.low %v340_v49, %v348_v50  ;;  %v444_v47 = vld [vmem:[#allocation2 + $0x9e8] sm:$0xff] }
 0x267   :  { %7024 = vmatpush1.bf16.msra.mxu0 %v9172_v55  ;;  %7188 = vmatpush1.bf16.msra.mxu1 %v9174_v56  ;;  %v9287_v55 = vcombine.high %v340_v49, %v348_v50  ;;  %v355_v56 = vld [vmem:[#allocation2 + $0x720] sm:$0xff] }
 0x268   :  { %7025 = vmatprep.subr.bf16.mxu0 %v9189_v58  ;;  %7189 = vmatprep.subr.bf16.mxu1 %v9191_v23  ;;  %v363_v58 = vld [vmem:[#allocation2 + $0x760] sm:$0xff]  ;;  %v356_v23 = vld [vmem:[#allocation2 + $0x728] sm:$0xff] }
 0x269   :  { %v9301_v0 = vcombine.high %v355_v56, %v363_v58  ;;  %v9300_v6 = vcombine.low %v355_v56, %v363_v58  ;;  %v9302_v7 = vcombine.low %v356_v23, %v364_v60  ;;  %v460_v56 = vld [vmem:[#allocation2 + $0xa68] sm:$0xff] }
 0x26b   :  { %7026 = vmatpush1.bf16.msra.mxu0 %v9188_v1  ;;  %7190 = vmatpush1.bf16.msra.mxu1 %v9190_v2  ;;  %v9303_v1 = vcombine.high %v356_v23, %v364_v60  ;;  %v371_v2 = vld [vmem:[#allocation2 + $0x7a0] sm:$0xff] }
 0x26c   :  { %7027 = vmatprep.subr.bf16.mxu0 %v9205_v3  ;;  %7191 = vmatprep.subr.bf16.mxu1 %v9207_v53  ;;  %v379_v3 = vld [vmem:[#allocation2 + $0x7e0] sm:$0xff]  ;;  %v372_v53 = vld [vmem:[#allocation2 + $0x7a8] sm:$0xff] }
 0x26d   :  { %v9317_v8 = vcombine.high %v371_v2, %v379_v3  ;;  %v9316_v59 = vcombine.low %v371_v2, %v379_v3  ;;  %v9318_v20 = vcombine.low %v372_v53, %v380_v5  ;;  %v476_v2 = vld [vmem:[#allocation2 + $0xae8] sm:$0xff] }
 0x26f   :  { %7028 = vmatpush1.bf16.msra.mxu0 %v9204_v12  ;;  %7192 = vmatpush1.bf16.msra.mxu1 %v9206_v13  ;;  %v9319_v12 = vcombine.high %v372_v53, %v380_v5  ;;  %v387_v13 = vld [vmem:[#allocation2 + $0x820] sm:$0xff] }
 0x270   :  { %7029 = vmatprep.subr.bf16.mxu0 %v9221_v33  ;;  %7193 = vmatprep.subr.bf16.mxu1 %v9223_v17  ;;  %v395_v33 = vld [vmem:[#allocation2 + $0x860] sm:$0xff]  ;;  %v388_v17 = vld [vmem:[#allocation2 + $0x828] sm:$0xff] }
 0x271   :  { %v9333_v22 = vcombine.high %v387_v13, %v395_v33  ;;  %v9332_v30 = vcombine.low %v387_v13, %v395_v33  ;;  %v9334_v31 = vcombine.low %v388_v17, %v396_v18  ;;  %v492_v13 = vld [vmem:[#allocation2 + $0xb68] sm:$0xff] }
 0x273   :  { %7030 = vmatpush1.bf16.msra.mxu0 %v9220_v24  ;;  %7194 = vmatpush1.bf16.msra.mxu1 %v9222_v26  ;;  %v9335_v24 = vcombine.high %v388_v17, %v396_v18  ;;  %v403_v26 = vld [vmem:[#allocation2 + $0x8a0] sm:$0xff] }
 0x274   :  { %7031 = vmatprep.subr.bf16.mxu0 %v9237_v27  ;;  %7195 = vmatprep.subr.bf16.mxu1 %v9239_v28  ;;  %v411_v27 = vld [vmem:[#allocation2 + $0x8e0] sm:$0xff]  ;;  %v404_v28 = vld [vmem:[#allocation2 + $0x8a8] sm:$0xff] }
 0x275   :  { %v9349_v32 = vcombine.high %v403_v26, %v411_v27  ;;  %v9348_v38 = vcombine.low %v403_v26, %v411_v27  ;;  %v9350_v39 = vcombine.low %v404_v28, %v412_v29  ;;  %v508_v26 = vld [vmem:[#allocation2 + $0xbe8] sm:$0xff] }
 0x277   :  { %7032 = vmatpush1.bf16.msra.mxu0 %v9236_v34  ;;  %7196 = vmatpush1.bf16.msra.mxu1 %v9238_v57  ;;  %v9351_v34 = vcombine.high %v404_v28, %v412_v29  ;;  %v419_v57 = vld [vmem:[#allocation2 + $0x920] sm:$0xff] }
 0x278   :  { %7033 = vmatprep.subr.bf16.mxu0 %v9253_v35  ;;  %7197 = vmatprep.subr.bf16.mxu1 %v9255_v63  ;;  %v427_v35 = vld [vmem:[#allocation2 + $0x960] sm:$0xff]  ;;  %v420_v63 = vld [vmem:[#allocation2 + $0x928] sm:$0xff] }
 0x279   :  { %v9365_v40 = vcombine.high %v419_v57, %v427_v35  ;;  %v9364_v48 = vcombine.low %v419_v57, %v427_v35  ;;  %v9366_v49 = vcombine.low %v420_v63, %v428_v37  ;;  %v524_v57 = vld [vmem:[#allocation2 + $0xc68] sm:$0xff] }
 0x27b   :  { %7034 = vmatpush1.bf16.msra.mxu0 %v9252_v41  ;;  %7198 = vmatpush1.bf16.msra.mxu1 %v9254_v42  ;;  %v9367_v41 = vcombine.high %v420_v63, %v428_v37  ;;  %v435_v42 = vld [vmem:[#allocation2 + $0x9a0] sm:$0xff] }
 0x27c   :  { %7035 = vmatprep.subr.bf16.mxu0 %v9269_v45  ;;  %7199 = vmatprep.subr.bf16.mxu1 %v9271_v46  ;;  %v443_v45 = vld [vmem:[#allocation2 + $0x9e0] sm:$0xff]  ;;  %v436_v46 = vld [vmem:[#allocation2 + $0x9a8] sm:$0xff] }
 0x27d   :  { %v9381_v50 = vcombine.high %v435_v42, %v443_v45  ;;  %v9380_v58 = vcombine.low %v435_v42, %v443_v45  ;;  %v9382_v23 = vcombine.low %v436_v46, %v444_v47  ;;  %v540_v42 = vld [vmem:[#allocation2 + $0xce8] sm:$0xff] }
 0x27f   :  { %7036 = vmatpush1.bf16.msra.mxu0 %v9268_v51  ;;  %7200 = vmatpush1.bf16.msra.mxu1 %v9270_v52  ;;  %v9383_v51 = vcombine.high %v436_v46, %v444_v47  ;;  %v451_v52 = vld [vmem:[#allocation2 + $0xa20] sm:$0xff] }
 0x280   :  { %7037 = vmatprep.subr.bf16.mxu0 %v9285_v16  ;;  %7201 = vmatprep.subr.bf16.mxu1 %v9287_v55  ;;  %v459_v16 = vld [vmem:[#allocation2 + $0xa60] sm:$0xff]  ;;  %v452_v55 = vld [vmem:[#allocation2 + $0xa28] sm:$0xff] }
 0x281   :  { %v9397_v60 = vcombine.high %v451_v52, %v459_v16  ;;  %v9396_v3 = vcombine.low %v451_v52, %v459_v16  ;;  %v9398_v53 = vcombine.low %v452_v55, %v460_v56  ;;  %v556_v52 = vld [vmem:[#allocation2 + $0xd68] sm:$0xff] }
 0x283   :  { %7038 = vmatpush1.bf16.msra.mxu0 %v9284_v61  ;;  %7202 = vmatpush1.bf16.msra.mxu1 %v9286_v62  ;;  %v9399_v61 = vcombine.high %v452_v55, %v460_v56  ;;  %v467_v62 = vld [vmem:[#allocation2 + $0xaa0] sm:$0xff] }
 0x284   :  { %7039 = vmatprep.subr.bf16.mxu0 %v9301_v0  ;;  %7203 = vmatprep.subr.bf16.mxu1 %v9303_v1  ;;  %v475_v0 = vld [vmem:[#allocation2 + $0xae0] sm:$0xff]  ;;  %v468_v1 = vld [vmem:[#allocation2 + $0xaa8] sm:$0xff] }
 0x285   :  { %v9413_v5 = vcombine.high %v467_v62, %v475_v0  ;;  %v9412_v33 = vcombine.low %v467_v62, %v475_v0  ;;  %v9414_v17 = vcombine.low %v468_v1, %v476_v2  ;;  %v572_v62 = vld [vmem:[#allocation2 + $0xde8] sm:$0xff] }
 0x287   :  { %7040 = vmatpush1.bf16.msra.mxu0 %v9300_v6  ;;  %7204 = vmatpush1.bf16.msra.mxu1 %v9302_v7  ;;  %v9415_v6 = vcombine.high %v468_v1, %v476_v2  ;;  %v483_v7 = vld [vmem:[#allocation2 + $0xb20] sm:$0xff] }
 0x288   :  { %7041 = vmatprep.subr.bf16.mxu0 %v9317_v8  ;;  %7205 = vmatprep.subr.bf16.mxu1 %v9319_v12  ;;  %v491_v8 = vld [vmem:[#allocation2 + $0xb60] sm:$0xff]  ;;  %v484_v12 = vld [vmem:[#allocation2 + $0xb28] sm:$0xff] }
 0x289   :  { %v9429_v18 = vcombine.high %v483_v7, %v491_v8  ;;  %v9428_v27 = vcombine.low %v483_v7, %v491_v8  ;;  %v9430_v28 = vcombine.low %v484_v12, %v492_v13  ;;  %v588_v7 = vld [vmem:[#allocation2 + $0xe68] sm:$0xff] }
 0x28b   :  { %7042 = vmatpush1.bf16.msra.mxu0 %v9316_v59  ;;  %7206 = vmatpush1.bf16.msra.mxu1 %v9318_v20  ;;  %v9431_v59 = vcombine.high %v484_v12, %v492_v13  ;;  %v499_v20 = vld [vmem:[#allocation2 + $0xba0] sm:$0xff] }
 0x28c   :  { %7052 = vmatprep.subr.bf16.mxu0 %v9333_v22  ;;  %7216 = vmatprep.subr.bf16.mxu1 %v9335_v24  ;;  %v507_v22 = vld [vmem:[#allocation2 + $0xbe0] sm:$0xff]  ;;  %v500_v24 = vld [vmem:[#allocation2 + $0xba8] sm:$0xff] }
 0x28d   :  { %v9445_v29 = vcombine.high %v499_v20, %v507_v22  ;;  %v9444_v35 = vcombine.low %v499_v20, %v507_v22  ;;  %v9446_v63 = vcombine.low %v500_v24, %v508_v26  ;;  %v604_v20 = vld [vmem:[#allocation2 + $0xee8] sm:$0xff] }
 0x28e   :  { %7044 = vmatmul.mubr.bf16.vlgmr.msra.gmra.mrb[8].mxu0 %v10889_v25  ;;  %7208 = vmatmul.mubr.bf16.vlgmr.msra.gmra.mrb[8].mxu1 %v10889_v25 }
 0x28f   :  { %7053 = vmatpush1.bf16.msra.mxu0 %v9332_v30  ;;  %7217 = vmatpush1.bf16.msra.mxu1 %v9334_v31  ;;  %v9447_v30 = vcombine.high %v500_v24, %v508_v26  ;;  %v515_v31 = vld [vmem:[#allocation2 + $0xc20] sm:$0xff] }
 0x290   :  { %7054 = vmatprep.subr.bf16.mxu0 %v9349_v32  ;;  %7218 = vmatprep.subr.bf16.mxu1 %v9351_v34  ;;  %v523_v32 = vld [vmem:[#allocation2 + $0xc60] sm:$0xff]  ;;  %v516_v34 = vld [vmem:[#allocation2 + $0xc28] sm:$0xff] }
 0x291   :  { %7084 = vmatprep.mubr.bf16.mxu0 %v10891_v36  ;;  %7248 = vmatprep.mubr.bf16.mxu1 %v10891_v36  ;;  %v9461_v37 = vcombine.high %v515_v31, %v523_v32  ;;  %v9460_v45 = vcombine.low %v515_v31, %v523_v32  ;;  %v9462_v46 = vcombine.low %v516_v34, %v524_v57  ;;  %v620_v31 = vld [vmem:[#allocation2 + $0xf68] sm:$0xff] }
 0x293   :  { %7055 = vmatpush1.bf16.msra.mxu0 %v9348_v38  ;;  %7219 = vmatpush1.bf16.msra.mxu1 %v9350_v39  ;;  %v9463_v38 = vcombine.high %v516_v34, %v524_v57  ;;  %v531_v39 = vld [vmem:[#allocation2 + $0xca0] sm:$0xff] }
 0x294   :  { %7056 = vmatprep.subr.bf16.mxu0 %v9365_v40  ;;  %7220 = vmatprep.subr.bf16.mxu1 %v9367_v41  ;;  %v539_v40 = vld [vmem:[#allocation2 + $0xce0] sm:$0xff]  ;;  %v532_v41 = vld [vmem:[#allocation2 + $0xca8] sm:$0xff] }
 0x295   :  { %v9477_v47 = vcombine.high %v531_v39, %v539_v40  ;;  %v9476_v16 = vcombine.low %v531_v39, %v539_v40  ;;  %v9478_v55 = vcombine.low %v532_v41, %v540_v42  ;;  %v636_v39 = vld [vmem:[#allocation2 + $0xfe8] sm:$0xff] }
 0x297   :  { %7057 = vmatpush1.bf16.msra.mxu0 %v9364_v48  ;;  %7221 = vmatpush1.bf16.msra.mxu1 %v9366_v49  ;;  %v9479_v48 = vcombine.high %v532_v41, %v540_v42  ;;  %v547_v49 = vld [vmem:[#allocation2 + $0xd20] sm:$0xff] }
 0x298   :  { %7058 = vmatprep.subr.bf16.mxu0 %v9381_v50  ;;  %7222 = vmatprep.subr.bf16.mxu1 %v9383_v51  ;;  %v555_v50 = vld [vmem:[#allocation2 + $0xd60] sm:$0xff]  ;;  %v548_v51 = vld [vmem:[#allocation2 + $0xd28] sm:$0xff] }
 0x299   :  { %v9493_v56 = vcombine.high %v547_v49, %v555_v50  ;;  %v9492_v0 = vcombine.low %v547_v49, %v555_v50  ;;  %v9494_v1 = vcombine.low %v548_v51, %v556_v52  ;;  %v652_v49 = vld [vmem:[#allocation2 + $0x1068] sm:$0xff] }
 0x29b   :  { %7059 = vmatpush1.bf16.msra.mxu0 %v9380_v58  ;;  %7223 = vmatpush1.bf16.msra.mxu1 %v9382_v23  ;;  %v9495_v58 = vcombine.high %v548_v51, %v556_v52  ;;  %v563_v23 = vld [vmem:[#allocation2 + $0xda0] sm:$0xff] }
 0x29c   :  { %7060 = vmatprep.subr.bf16.mxu0 %v9397_v60  ;;  %7224 = vmatprep.subr.bf16.mxu1 %v9399_v61  ;;  %v571_v60 = vld [vmem:[#allocation2 + $0xde0] sm:$0xff]  ;;  %v564_v61 = vld [vmem:[#allocation2 + $0xda8] sm:$0xff] }
 0x29d   :  { %v9509_v2 = vcombine.high %v563_v23, %v571_v60  ;;  %v9508_v8 = vcombine.low %v563_v23, %v571_v60  ;;  %v9510_v12 = vcombine.low %v564_v61, %v572_v62  ;;  %v668_v23 = vld [vmem:[#allocation2 + $0x10e8] sm:$0xff] }
 0x29f   :  { %7061 = vmatpush1.bf16.msra.mxu0 %v9396_v3  ;;  %7225 = vmatpush1.bf16.msra.mxu1 %v9398_v53  ;;  %v9511_v3 = vcombine.high %v564_v61, %v572_v62  ;;  %v579_v53 = vld [vmem:[#allocation2 + $0xe20] sm:$0xff] }
 0x2a0   :  { %7062 = vmatprep.subr.bf16.mxu0 %v9413_v5  ;;  %7226 = vmatprep.subr.bf16.mxu1 %v9415_v6  ;;  %v587_v5 = vld [vmem:[#allocation2 + $0xe60] sm:$0xff]  ;;  %v580_v6 = vld [vmem:[#allocation2 + $0xe28] sm:$0xff] }
 0x2a1   :  { %v9525_v13 = vcombine.high %v579_v53, %v587_v5  ;;  %v9524_v22 = vcombine.low %v579_v53, %v587_v5  ;;  %v9526_v24 = vcombine.low %v580_v6, %v588_v7  ;;  %v684_v53 = vld [vmem:[#allocation2 + $0x1168] sm:$0xff] }
 0x2a3   :  { %7063 = vmatpush1.bf16.msra.mxu0 %v9412_v33  ;;  %7227 = vmatpush1.bf16.msra.mxu1 %v9414_v17  ;;  %v9527_v33 = vcombine.high %v580_v6, %v588_v7  ;;  %v595_v17 = vld [vmem:[#allocation2 + $0xea0] sm:$0xff] }
 0x2a4   :  { %7064 = vmatprep.subr.bf16.mxu0 %v9429_v18  ;;  %7228 = vmatprep.subr.bf16.mxu1 %v9431_v59  ;;  %v603_v18 = vld [vmem:[#allocation2 + $0xee0] sm:$0xff]  ;;  %v596_v59 = vld [vmem:[#allocation2 + $0xea8] sm:$0xff] }
 0x2a5   :  { %v9541_v26 = vcombine.high %v595_v17, %v603_v18  ;;  %v9540_v32 = vcombine.low %v595_v17, %v603_v18  ;;  %v9542_v34 = vcombine.low %v596_v59, %v604_v20  ;;  %v700_v17 = vld [vmem:[#allocation2 + $0x11e8] sm:$0xff] }
 0x2a7   :  { %7065 = vmatpush1.bf16.msra.mxu0 %v9428_v27  ;;  %7229 = vmatpush1.bf16.msra.mxu1 %v9430_v28  ;;  %v9543_v27 = vcombine.high %v596_v59, %v604_v20  ;;  %v611_v28 = vld [vmem:[#allocation2 + $0xf20] sm:$0xff] }
 0x2a8   :  { %7066 = vmatprep.subr.bf16.mxu0 %v9445_v29  ;;  %7230 = vmatprep.subr.bf16.mxu1 %v9447_v30  ;;  %v619_v29 = vld [vmem:[#allocation2 + $0xf60] sm:$0xff]  ;;  %v612_v30 = vld [vmem:[#allocation2 + $0xf28] sm:$0xff] }
 0x2a9   :  { %v9557_v57 = vcombine.high %v611_v28, %v619_v29  ;;  %v9556_v40 = vcombine.low %v611_v28, %v619_v29  ;;  %v9558_v41 = vcombine.low %v612_v30, %v620_v31  ;;  %v716_v28 = vld [vmem:[#allocation2 + $0x1268] sm:$0xff] }
 0x2ab   :  { %7067 = vmatpush1.bf16.msra.mxu0 %v9444_v35  ;;  %7231 = vmatpush1.bf16.msra.mxu1 %v9446_v63  ;;  %v9559_v35 = vcombine.high %v612_v30, %v620_v31  ;;  %v627_v63 = vld [vmem:[#allocation2 + $0xfa0] sm:$0xff] }
 0x2ac   :  { %7068 = vmatprep.subr.bf16.mxu0 %v9461_v37  ;;  %7232 = vmatprep.subr.bf16.mxu1 %v9463_v38  ;;  %v635_v37 = vld [vmem:[#allocation2 + $0xfe0] sm:$0xff]  ;;  %v628_v38 = vld [vmem:[#allocation2 + $0xfa8] sm:$0xff] }
 0x2ad   :  { %v9573_v42 = vcombine.high %v627_v63, %v635_v37  ;;  %v9572_v50 = vcombine.low %v627_v63, %v635_v37  ;;  %v9574_v51 = vcombine.low %v628_v38, %v636_v39  ;;  %v732_v63 = vld [vmem:[#allocation2 + $0x12e8] sm:$0xff] }
 0x2af   :  { %7069 = vmatpush1.bf16.msra.mxu0 %v9460_v45  ;;  %7233 = vmatpush1.bf16.msra.mxu1 %v9462_v46  ;;  %v9575_v45 = vcombine.high %v628_v38, %v636_v39  ;;  %v643_v46 = vld [vmem:[#allocation2 + $0x1020] sm:$0xff] }
 0x2b0   :  { %7070 = vmatprep.subr.bf16.mxu0 %v9477_v47  ;;  %7234 = vmatprep.subr.bf16.mxu1 %v9479_v48  ;;  %v651_v47 = vld [vmem:[#allocation2 + $0x1060] sm:$0xff]  ;;  %v644_v48 = vld [vmem:[#allocation2 + $0x1028] sm:$0xff] }
 0x2b1   :  { %v9589_v52 = vcombine.high %v643_v46, %v651_v47  ;;  %v9588_v60 = vcombine.low %v643_v46, %v651_v47  ;;  %v9590_v61 = vcombine.low %v644_v48, %v652_v49  ;;  %v748_v46 = vld [vmem:[#allocation2 + $0x1368] sm:$0xff] }
 0x2b3   :  { %7071 = vmatpush1.bf16.msra.mxu0 %v9476_v16  ;;  %7235 = vmatpush1.bf16.msra.mxu1 %v9478_v55  ;;  %v9591_v16 = vcombine.high %v644_v48, %v652_v49  ;;  %v659_v55 = vld [vmem:[#allocation2 + $0x10a0] sm:$0xff] }
 0x2b4   :  { %7072 = vmatprep.subr.bf16.mxu0 %v9493_v56  ;;  %7236 = vmatprep.subr.bf16.mxu1 %v9495_v58  ;;  %v667_v56 = vld [vmem:[#allocation2 + $0x10e0] sm:$0xff]  ;;  %v660_v58 = vld [vmem:[#allocation2 + $0x10a8] sm:$0xff] }
 0x2b5   :  { %v9605_v62 = vcombine.high %v659_v55, %v667_v56  ;;  %v9604_v5 = vcombine.low %v659_v55, %v667_v56  ;;  %v9606_v6 = vcombine.low %v660_v58, %v668_v23  ;;  %v764_v55 = vld [vmem:[#allocation2 + $0x13e8] sm:$0xff] }
 0x2b7   :  { %7073 = vmatpush1.bf16.msra.mxu0 %v9492_v0  ;;  %7237 = vmatpush1.bf16.msra.mxu1 %v9494_v1  ;;  %v9607_v0 = vcombine.high %v660_v58, %v668_v23  ;;  %v675_v1 = vld [vmem:[#allocation2 + $0x1120] sm:$0xff] }
 0x2b8   :  { %7074 = vmatprep.subr.bf16.mxu0 %v9509_v2  ;;  %7238 = vmatprep.subr.bf16.mxu1 %v9511_v3  ;;  %v683_v2 = vld [vmem:[#allocation2 + $0x1160] sm:$0xff]  ;;  %v676_v3 = vld [vmem:[#allocation2 + $0x1128] sm:$0xff] }
 0x2b9   :  { %v9621_v7 = vcombine.high %v675_v1, %v683_v2  ;;  %v9620_v18 = vcombine.low %v675_v1, %v683_v2  ;;  %v9622_v59 = vcombine.low %v676_v3, %v684_v53  ;;  %v780_v1 = vld [vmem:[#allocation2 + $0x1468] sm:$0xff] }
 0x2bb   :  { %7075 = vmatpush1.bf16.msra.mxu0 %v9508_v8  ;;  %7239 = vmatpush1.bf16.msra.mxu1 %v9510_v12  ;;  %v9623_v8 = vcombine.high %v676_v3, %v684_v53  ;;  %v691_v12 = vld [vmem:[#allocation2 + $0x11a0] sm:$0xff] }
 0x2bc   :  { %7076 = vmatprep.subr.bf16.mxu0 %v9525_v13  ;;  %7240 = vmatprep.subr.bf16.mxu1 %v9527_v33  ;;  %v699_v13 = vld [vmem:[#allocation2 + $0x11e0] sm:$0xff]  ;;  %v692_v33 = vld [vmem:[#allocation2 + $0x11a8] sm:$0xff] }
 0x2bd   :  { %v9637_v20 = vcombine.high %v691_v12, %v699_v13  ;;  %v9636_v29 = vcombine.low %v691_v12, %v699_v13  ;;  %v9638_v30 = vcombine.low %v692_v33, %v700_v17  ;;  %v796_v12 = vld [vmem:[#allocation2 + $0x14e8] sm:$0xff] }
 0x2bf   :  { %7077 = vmatpush1.bf16.msra.mxu0 %v9524_v22  ;;  %7241 = vmatpush1.bf16.msra.mxu1 %v9526_v24  ;;  %v9639_v22 = vcombine.high %v692_v33, %v700_v17  ;;  %v707_v24 = vld [vmem:[#allocation2 + $0x1220] sm:$0xff] }
 0x2c0   :  { %7078 = vmatprep.subr.bf16.mxu0 %v9541_v26  ;;  %7242 = vmatprep.subr.bf16.mxu1 %v9543_v27  ;;  %v715_v26 = vld [vmem:[#allocation2 + $0x1260] sm:$0xff]  ;;  %v708_v27 = vld [vmem:[#allocation2 + $0x1228] sm:$0xff] }
 0x2c1   :  { %v9653_v31 = vcombine.high %v707_v24, %v715_v26  ;;  %v9652_v37 = vcombine.low %v707_v24, %v715_v26  ;;  %v9654_v38 = vcombine.low %v708_v27, %v716_v28  ;;  %v812_v24 = vld [vmem:[#allocation2 + $0x1568] sm:$0xff] }
 0x2c3   :  { %7079 = vmatpush1.bf16.msra.mxu0 %v9540_v32  ;;  %7243 = vmatpush1.bf16.msra.mxu1 %v9542_v34  ;;  %v9655_v32 = vcombine.high %v708_v27, %v716_v28  ;;  %v723_v34 = vld [vmem:[#allocation2 + $0x12a0] sm:$0xff] }
 0x2c4   :  { %7080 = vmatprep.subr.bf16.mxu0 %v9557_v57  ;;  %7244 = vmatprep.subr.bf16.mxu1 %v9559_v35  ;;  %v731_v57 = vld [vmem:[#allocation2 + $0x12e0] sm:$0xff]  ;;  %v724_v35 = vld [vmem:[#allocation2 + $0x12a8] sm:$0xff] }
 0x2c5   :  { %v9669_v39 = vcombine.high %v723_v34, %v731_v57  ;;  %v9668_v47 = vcombine.low %v723_v34, %v731_v57  ;;  %v9670_v48 = vcombine.low %v724_v35, %v732_v63  ;;  %v828_v34 = vld [vmem:[#allocation2 + $0x15e8] sm:$0xff] }
 0x2c7   :  { %7081 = vmatpush1.bf16.msra.mxu0 %v9556_v40  ;;  %7245 = vmatpush1.bf16.msra.mxu1 %v9558_v41  ;;  %v9671_v40 = vcombine.high %v724_v35, %v732_v63  ;;  %v739_v41 = vld [vmem:[#allocation2 + $0x1320] sm:$0xff] }
 0x2c8   :  { %7082 = vmatprep.subr.bf16.mxu0 %v9573_v42  ;;  %7246 = vmatprep.subr.bf16.mxu1 %v9575_v45  ;;  %v747_v42 = vld [vmem:[#allocation2 + $0x1360] sm:$0xff]  ;;  %v740_v45 = vld [vmem:[#allocation2 + $0x1328] sm:$0xff] }
 0x2c9   :  { %v9685_v49 = vcombine.high %v739_v41, %v747_v42  ;;  %v9684_v56 = vcombine.low %v739_v41, %v747_v42  ;;  %v9686_v58 = vcombine.low %v740_v45, %v748_v46  ;;  %v844_v41 = vld [vmem:[#allocation2 + $0x1668] sm:$0xff] }
 0x2cb   :  { %7083 = vmatpush1.bf16.msra.mxu0 %v9572_v50  ;;  %7247 = vmatpush1.bf16.msra.mxu1 %v9574_v51  ;;  %v9687_v50 = vcombine.high %v740_v45, %v748_v46  ;;  %v755_v51 = vld [vmem:[#allocation2 + $0x13a0] sm:$0xff] }
 0x2cc   :  { %7093 = vmatprep.subr.bf16.mxu0 %v9589_v52  ;;  %7257 = vmatprep.subr.bf16.mxu1 %v9591_v16  ;;  %v763_v52 = vld [vmem:[#allocation2 + $0x13e0] sm:$0xff]  ;;  %v756_v16 = vld [vmem:[#allocation2 + $0x13a8] sm:$0xff] }
 0x2cd   :  { %v9701_v23 = vcombine.high %v755_v51, %v763_v52  ;;  %v9700_v2 = vcombine.low %v755_v51, %v763_v52  ;;  %v9702_v3 = vcombine.low %v756_v16, %v764_v55  ;;  %v860_v51 = vld [vmem:[#allocation2 + $0x16e8] sm:$0xff] }
 0x2ce   :  { %7085 = vmatmul.mubr.bf16.vlgmr.msra.gmra.mrb[8].mxu0 %v10910_v43  ;;  %7249 = vmatmul.mubr.bf16.vlgmr.msra.gmra.mrb[8].mxu1 %v10910_v43 }
 0x2cf   :  { %7094 = vmatpush1.bf16.msra.mxu0 %v9588_v60  ;;  %7258 = vmatpush1.bf16.msra.mxu1 %v9590_v61  ;;  %v9703_v60 = vcombine.high %v756_v16, %v764_v55  ;;  %v771_v61 = vld [vmem:[#allocation2 + $0x1420] sm:$0xff] }
 0x2d0   :  { %7095 = vmatprep.subr.bf16.mxu0 %v9605_v62  ;;  %7259 = vmatprep.subr.bf16.mxu1 %v9607_v0  ;;  %v779_v62 = vld [vmem:[#allocation2 + $0x1460] sm:$0xff]  ;;  %v772_v0 = vld [vmem:[#allocation2 + $0x1428] sm:$0xff] }
 0x2d1   :  { %7125 = vmatprep.mubr.bf16.mxu0 %v10912_v54  ;;  %7289 = vmatprep.mubr.bf16.mxu1 %v10912_v54  ;;  %v9717_v53 = vcombine.high %v771_v61, %v779_v62  ;;  %v9716_v13 = vcombine.low %v771_v61, %v779_v62  ;;  %v9718_v33 = vcombine.low %v772_v0, %v780_v1  ;;  %v876_v61 = vld [vmem:[#allocation2 + $0x1768] sm:$0xff] }
 0x2d3   :  { %7096 = vmatpush1.bf16.msra.mxu0 %v9604_v5  ;;  %7260 = vmatpush1.bf16.msra.mxu1 %v9606_v6  ;;  %v9719_v5 = vcombine.high %v772_v0, %v780_v1  ;;  %v787_v6 = vld [vmem:[#allocation2 + $0x14a0] sm:$0xff] }
 0x2d4   :  { %7097 = vmatprep.subr.bf16.mxu0 %v9621_v7  ;;  %7261 = vmatprep.subr.bf16.mxu1 %v9623_v8  ;;  %v795_v7 = vld [vmem:[#allocation2 + $0x14e0] sm:$0xff]  ;;  %v788_v8 = vld [vmem:[#allocation2 + $0x14a8] sm:$0xff] }
 0x2d5   :  { %v9733_v17 = vcombine.high %v787_v6, %v795_v7  ;;  %v9732_v26 = vcombine.low %v787_v6, %v795_v7  ;;  %v9734_v27 = vcombine.low %v788_v8, %v796_v12  ;;  %v892_v6 = vld [vmem:[#allocation2 + $0x17e8] sm:$0xff] }
 0x2d7   :  { %7098 = vmatpush1.bf16.msra.mxu0 %v9620_v18  ;;  %7262 = vmatpush1.bf16.msra.mxu1 %v9622_v59  ;;  %v9735_v18 = vcombine.high %v788_v8, %v796_v12  ;;  %v803_v59 = vld [vmem:[#allocation2 + $0x1520] sm:$0xff] }
 0x2d8   :  { %7099 = vmatprep.subr.bf16.mxu0 %v9637_v20  ;;  %7263 = vmatprep.subr.bf16.mxu1 %v9639_v22  ;;  %v811_v20 = vld [vmem:[#allocation2 + $0x1560] sm:$0xff]  ;;  %v804_v22 = vld [vmem:[#allocation2 + $0x1528] sm:$0xff] }
 0x2d9   :  { %v9749_v28 = vcombine.high %v803_v59, %v811_v20  ;;  %v9748_v57 = vcombine.low %v803_v59, %v811_v20  ;;  %v9750_v35 = vcombine.low %v804_v22, %v812_v24  ;;  %v908_v59 = vld [vmem:[#allocation2 + $0x1868] sm:$0xff] }
 0x2db   :  { %7100 = vmatpush1.bf16.msra.mxu0 %v9636_v29  ;;  %7264 = vmatpush1.bf16.msra.mxu1 %v9638_v30  ;;  %v9751_v29 = vcombine.high %v804_v22, %v812_v24  ;;  %v819_v30 = vld [vmem:[#allocation2 + $0x15a0] sm:$0xff] }
 0x2dc   :  { %7101 = vmatprep.subr.bf16.mxu0 %v9653_v31  ;;  %7265 = vmatprep.subr.bf16.mxu1 %v9655_v32  ;;  %v827_v31 = vld [vmem:[#allocation2 + $0x15e0] sm:$0xff]  ;;  %v820_v32 = vld [vmem:[#allocation2 + $0x15a8] sm:$0xff] }
 0x2dd   :  { %v9765_v63 = vcombine.high %v819_v30, %v827_v31  ;;  %v9764_v42 = vcombine.low %v819_v30, %v827_v31  ;;  %v9766_v45 = vcombine.low %v820_v32, %v828_v34  ;;  %v924_v30 = vld [vmem:[#allocation2 + $0x18e8] sm:$0xff] }
 0x2df   :  { %7102 = vmatpush1.bf16.msra.mxu0 %v9652_v37  ;;  %7266 = vmatpush1.bf16.msra.mxu1 %v9654_v38  ;;  %v9767_v37 = vcombine.high %v820_v32, %v828_v34  ;;  %v835_v38 = vld [vmem:[#allocation2 + $0x1620] sm:$0xff] }
 0x2e0   :  { %7103 = vmatprep.subr.bf16.mxu0 %v9669_v39  ;;  %7267 = vmatprep.subr.bf16.mxu1 %v9671_v40  ;;  %v843_v39 = vld [vmem:[#allocation2 + $0x1660] sm:$0xff]  ;;  %v836_v40 = vld [vmem:[#allocation2 + $0x1628] sm:$0xff] }
 0x2e1   :  { %v9781_v46 = vcombine.high %v835_v38, %v843_v39  ;;  %v9780_v52 = vcombine.low %v835_v38, %v843_v39  ;;  %v9782_v16 = vcombine.low %v836_v40, %v844_v41  ;;  %v940_v38 = vld [vmem:[#allocation2 + $0x1968] sm:$0xff] }
 0x2e3   :  { %7104 = vmatpush1.bf16.msra.mxu0 %v9668_v47  ;;  %7268 = vmatpush1.bf16.msra.mxu1 %v9670_v48  ;;  %v9783_v47 = vcombine.high %v836_v40, %v844_v41  ;;  %v851_v48 = vld [vmem:[#allocation2 + $0x16a0] sm:$0xff] }
 0x2e4   :  { %7105 = vmatprep.subr.bf16.mxu0 %v9685_v49  ;;  %7269 = vmatprep.subr.bf16.mxu1 %v9687_v50  ;;  %v859_v49 = vld [vmem:[#allocation2 + $0x16e0] sm:$0xff]  ;;  %v852_v50 = vld [vmem:[#allocation2 + $0x16a8] sm:$0xff] }
 0x2e5   :  { %v9797_v55 = vcombine.high %v851_v48, %v859_v49  ;;  %v9796_v62 = vcombine.low %v851_v48, %v859_v49  ;;  %v9798_v0 = vcombine.low %v852_v50, %v860_v51  ;;  %v956_v48 = vld [vmem:[#allocation2 + $0x19e8] sm:$0xff] }
 0x2e7   :  { %7106 = vmatpush1.bf16.msra.mxu0 %v9684_v56  ;;  %7270 = vmatpush1.bf16.msra.mxu1 %v9686_v58  ;;  %v9799_v56 = vcombine.high %v852_v50, %v860_v51  ;;  %v867_v58 = vld [vmem:[#allocation2 + $0x1720] sm:$0xff] }
 0x2e8   :  { %7107 = vmatprep.subr.bf16.mxu0 %v9701_v23  ;;  %7271 = vmatprep.subr.bf16.mxu1 %v9703_v60  ;;  %v875_v23 = vld [vmem:[#allocation2 + $0x1760] sm:$0xff]  ;;  %v868_v60 = vld [vmem:[#allocation2 + $0x1728] sm:$0xff] }
 0x2e9   :  { %v9813_v1 = vcombine.high %v867_v58, %v875_v23  ;;  %v9812_v7 = vcombine.low %v867_v58, %v875_v23  ;;  %v9814_v8 = vcombine.low %v868_v60, %v876_v61  ;;  %v972_v58 = vld [vmem:[#allocation2 + $0x1a68] sm:$0xff] }
 0x2eb   :  { %7108 = vmatpush1.bf16.msra.mxu0 %v9700_v2  ;;  %7272 = vmatpush1.bf16.msra.mxu1 %v9702_v3  ;;  %v9815_v2 = vcombine.high %v868_v60, %v876_v61  ;;  %v883_v3 = vld [vmem:[#allocation2 + $0x17a0] sm:$0xff] }
 0x2ec   :  { %7109 = vmatprep.subr.bf16.mxu0 %v9717_v53  ;;  %7273 = vmatprep.subr.bf16.mxu1 %v9719_v5  ;;  %v891_v53 = vld [vmem:[#allocation2 + $0x17e0] sm:$0xff]  ;;  %v884_v5 = vld [vmem:[#allocation2 + $0x17a8] sm:$0xff] }
 0x2ed   :  { %v9829_v12 = vcombine.high %v883_v3, %v891_v53  ;;  %v9828_v20 = vcombine.low %v883_v3, %v891_v53  ;;  %v9830_v22 = vcombine.low %v884_v5, %v892_v6  ;;  %v988_v3 = vld [vmem:[#allocation2 + $0x1ae8] sm:$0xff] }
 0x2ef   :  { %7110 = vmatpush1.bf16.msra.mxu0 %v9716_v13  ;;  %7274 = vmatpush1.bf16.msra.mxu1 %v9718_v33  ;;  %v9831_v13 = vcombine.high %v884_v5, %v892_v6  ;;  %v899_v33 = vld [vmem:[#allocation2 + $0x1820] sm:$0xff] }
 0x2f0   :  { %7111 = vmatprep.subr.bf16.mxu0 %v9733_v17  ;;  %7275 = vmatprep.subr.bf16.mxu1 %v9735_v18  ;;  %v907_v17 = vld [vmem:[#allocation2 + $0x1860] sm:$0xff]  ;;  %v900_v18 = vld [vmem:[#allocation2 + $0x1828] sm:$0xff] }
 0x2f1   :  { %v9845_v24 = vcombine.high %v899_v33, %v907_v17  ;;  %v9844_v31 = vcombine.low %v899_v33, %v907_v17  ;;  %v9846_v32 = vcombine.low %v900_v18, %v908_v59  ;;  %v1004_v33 = vld [vmem:[#allocation2 + $0x1b68] sm:$0xff] }
 0x2f3   :  { %7112 = vmatpush1.bf16.msra.mxu0 %v9732_v26  ;;  %7276 = vmatpush1.bf16.msra.mxu1 %v9734_v27  ;;  %v9847_v26 = vcombine.high %v900_v18, %v908_v59  ;;  %v915_v27 = vld [vmem:[#allocation2 + $0x18a0] sm:$0xff] }
 0x2f4   :  { %7113 = vmatprep.subr.bf16.mxu0 %v9749_v28  ;;  %7277 = vmatprep.subr.bf16.mxu1 %v9751_v29  ;;  %v923_v28 = vld [vmem:[#allocation2 + $0x18e0] sm:$0xff]  ;;  %v916_v29 = vld [vmem:[#allocation2 + $0x18a8] sm:$0xff] }
 0x2f5   :  { %v9861_v34 = vcombine.high %v915_v27, %v923_v28  ;;  %v9860_v39 = vcombine.low %v915_v27, %v923_v28  ;;  %v9862_v40 = vcombine.low %v916_v29, %v924_v30 }
 0x2f7   :  { %7114 = vmatpush1.bf16.msra.mxu0 %v9748_v57  ;;  %7278 = vmatpush1.bf16.msra.mxu1 %v9750_v35  ;;  %v9863_v57 = vcombine.high %v916_v29, %v924_v30  ;;  %v931_v35 = vld [vmem:[#allocation2 + $0x1920] sm:$0xff]  ;;  %v1012_v29 = vld [vmem:[#allocation2 + $0x1ba8] sm:$0xff] }
 0x2f8   :  { %7115 = vmatprep.subr.bf16.mxu0 %v9765_v63  ;;  %7279 = vmatprep.subr.bf16.mxu1 %v9767_v37  ;;  %v939_v63 = vld [vmem:[#allocation2 + $0x1960] sm:$0xff]  ;;  %v932_v37 = vld [vmem:[#allocation2 + $0x1928] sm:$0xff] }
 0x2f9   :  { %v9877_v41 = vcombine.high %v931_v35, %v939_v63  ;;  %v9876_v49 = vcombine.low %v931_v35, %v939_v63  ;;  %v9878_v50 = vcombine.low %v932_v37, %v940_v38  ;;  %v1020_v30 = vld [vmem:[#allocation2 + $0x1be8] sm:$0xff] }
 0x2fb   :  { %7116 = vmatpush1.bf16.msra.mxu0 %v9764_v42  ;;  %7280 = vmatpush1.bf16.msra.mxu1 %v9766_v45  ;;  %v9879_v42 = vcombine.high %v932_v37, %v940_v38  ;;  %v947_v45 = vld [vmem:[#allocation2 + $0x19a0] sm:$0xff] }
 0x2fc   :  { %7117 = vmatprep.subr.bf16.mxu0 %v9781_v46  ;;  %7281 = vmatprep.subr.bf16.mxu1 %v9783_v47  ;;  %v955_v46 = vld [vmem:[#allocation2 + $0x19e0] sm:$0xff]  ;;  %v948_v47 = vld [vmem:[#allocation2 + $0x19a8] sm:$0xff] }
 0x2fd   :  { %v9893_v51 = vcombine.high %v947_v45, %v955_v46  ;;  %v9892_v23 = vcombine.low %v947_v45, %v955_v46  ;;  %v9894_v60 = vcombine.low %v948_v47, %v956_v48  ;;  %v1036_v45 = vld [vmem:[#allocation2 + $0x1c68] sm:$0xff] }
 0x2ff   :  { %7118 = vmatpush1.bf16.msra.mxu0 %v9780_v52  ;;  %7282 = vmatpush1.bf16.msra.mxu1 %v9782_v16  ;;  %v9895_v52 = vcombine.high %v948_v47, %v956_v48  ;;  %v963_v16 = vld [vmem:[#allocation2 + $0x1a20] sm:$0xff]  ;;  %v9958_v47 = vcombine.low %v1012_v29, %v1020_v30 }
 0x300   :  { %7119 = vmatprep.subr.bf16.mxu0 %v9797_v55  ;;  %7283 = vmatprep.subr.bf16.mxu1 %v9799_v56  ;;  %v971_v55 = vld [vmem:[#allocation2 + $0x1a60] sm:$0xff]  ;;  %v964_v56 = vld [vmem:[#allocation2 + $0x1a28] sm:$0xff] }
 0x301   :  { %v9909_v61 = vcombine.high %v963_v16, %v971_v55  ;;  %v9908_v53 = vcombine.low %v963_v16, %v971_v55  ;;  %v9910_v5 = vcombine.low %v964_v56, %v972_v58  ;;  %v1052_v16 = vld [vmem:[#allocation2 + $0x1ce8] sm:$0xff] }
 0x303   :  { %7120 = vmatpush1.bf16.msra.mxu0 %v9796_v62  ;;  %7284 = vmatpush1.bf16.msra.mxu1 %v9798_v0  ;;  %v9911_v62 = vcombine.high %v964_v56, %v972_v58  ;;  %v979_v0 = vld [vmem:[#allocation2 + $0x1aa0] sm:$0xff] }
 0x304   :  { %7121 = vmatprep.subr.bf16.mxu0 %v9813_v1  ;;  %7285 = vmatprep.subr.bf16.mxu1 %v9815_v2  ;;  %v987_v1 = vld [vmem:[#allocation2 + $0x1ae0] sm:$0xff]  ;;  %v980_v2 = vld [vmem:[#allocation2 + $0x1aa8] sm:$0xff] }
 0x305   :  { %v9925_v6 = vcombine.high %v979_v0, %v987_v1  ;;  %v9924_v17 = vcombine.low %v979_v0, %v987_v1  ;;  %v9926_v18 = vcombine.low %v980_v2, %v988_v3  ;;  %v1068_v0 = vld [vmem:[#allocation2 + $0x1d68] sm:$0xff] }
 0x307   :  { %7122 = vmatpush1.bf16.msra.mxu0 %v9812_v7  ;;  %7286 = vmatpush1.bf16.msra.mxu1 %v9814_v8  ;;  %v9927_v7 = vcombine.high %v980_v2, %v988_v3  ;;  %v995_v8 = vld [vmem:[#allocation2 + $0x1b20] sm:$0xff] }
 0x308   :  { %7123 = vmatprep.subr.bf16.mxu0 %v9829_v12  ;;  %7287 = vmatprep.subr.bf16.mxu1 %v9831_v13  ;;  %v1003_v12 = vld [vmem:[#allocation2 + $0x1b60] sm:$0xff]  ;;  %v996_v13 = vld [vmem:[#allocation2 + $0x1b28] sm:$0xff] }
 0x309   :  { %v9941_v59 = vcombine.high %v995_v8, %v1003_v12  ;;  %v9942_v63 = vcombine.low %v996_v13, %v1004_v33 }
 0x30b   :  { %7124 = vmatpush1.bf16.msra.mxu0 %v9828_v20  ;;  %7288 = vmatpush1.bf16.msra.mxu1 %v9830_v22  ;;  %v9943_v22 = vcombine.high %v996_v13, %v1004_v33 }
 0x30c   :  { %7134 = vmatprep.subr.bf16.mxu0 %v9845_v24  ;;  %7298 = vmatprep.subr.bf16.mxu1 %v9847_v26  ;;  %v1011_v24 = vld [vmem:[#allocation2 + $0x1ba0] sm:$0xff] }
 0x30d   :  { %v1019_v26 = vld [vmem:[#allocation2 + $0x1be0] sm:$0xff] }
 0x30e   :  { %7126 = vmatmul.mubr.bf16.vlgmr.msra.gmra.mrb[8].mxu0 %v10927_v4  ;;  %7290 = vmatmul.mubr.bf16.vlgmr.msra.gmra.mrb[8].mxu1 %v10927_v4  ;;  %v9957_v37 = vcombine.high %v1011_v24, %v1019_v26  ;;  %v9956_v46 = vcombine.low %v1011_v24, %v1019_v26  ;;  %v1100_v24 = vld [vmem:[#allocation2 + $0x1e68] sm:$0xff] }
 0x30f   :  { %7135 = vmatpush1.bf16.msra.mxu0 %v9844_v31  ;;  %7299 = vmatpush1.bf16.msra.mxu1 %v9846_v32 }
 0x310   :  { %7136 = vmatprep.subr.bf16.mxu0 %v9861_v34  ;;  %7300 = vmatprep.subr.bf16.mxu1 %v9863_v57  ;;  %v9940_v34 = vcombine.low %v995_v8, %v1003_v12  ;;  %v1084_v8 = vld [vmem:[#allocation2 + $0x1de8] sm:$0xff] }
 0x311   :  { %7166 = vmatprep.mubr.bf16.mxu0 %v10929_v11  ;;  %7330 = vmatprep.mubr.bf16.mxu1 %v10929_v11 }
 0x313   :  { %7137 = vmatpush1.bf16.msra.mxu0 %v9860_v39  ;;  %7301 = vmatpush1.bf16.msra.mxu1 %v9862_v40  ;;  %v9959_v39 = vcombine.high %v1012_v29, %v1020_v30  ;;  %v1027_v40 = vld [vmem:[#allocation2 + $0x1c20] sm:$0xff] }
 0x314   :  { %7138 = vmatprep.subr.bf16.mxu0 %v9877_v41  ;;  %7302 = vmatprep.subr.bf16.mxu1 %v9879_v42  ;;  %v1035_v41 = vld [vmem:[#allocation2 + $0x1c60] sm:$0xff]  ;;  %v1028_v42 = vld [vmem:[#allocation2 + $0x1c28] sm:$0xff] }
 0x315   :  { %v9973_v48 = vcombine.high %v1027_v40, %v1035_v41  ;;  %v9972_v55 = vcombine.low %v1027_v40, %v1035_v41  ;;  %v9974_v56 = vcombine.low %v1028_v42, %v1036_v45  ;;  %v1123_v41 = vld [vmem:[#allocation2 + $0x1f20] sm:$0xff] }
 0x317   :  { %7139 = vmatpush1.bf16.msra.mxu0 %v9876_v49  ;;  %7303 = vmatpush1.bf16.msra.mxu1 %v9878_v50  ;;  %v9975_v49 = vcombine.high %v1028_v42, %v1036_v45  ;;  %v1043_v50 = vld [vmem:[#allocation2 + $0x1ca0] sm:$0xff]  ;;  %v1124_v45 = vld [vmem:[#allocation2 + $0x1f28] sm:$0xff] }
 0x318   :  { %7140 = vmatprep.subr.bf16.mxu0 %v9893_v51  ;;  %7304 = vmatprep.subr.bf16.mxu1 %v9895_v52  ;;  %v1051_v51 = vld [vmem:[#allocation2 + $0x1ce0] sm:$0xff]  ;;  %v1044_v52 = vld [vmem:[#allocation2 + $0x1ca8] sm:$0xff] }
 0x319   :  { %v9989_v58 = vcombine.high %v1043_v50, %v1051_v51  ;;  %v9988_v1 = vcombine.low %v1043_v50, %v1051_v51  ;;  %v9990_v2 = vcombine.low %v1044_v52, %v1052_v16  ;;  %v1131_v42 = vld [vmem:[#allocation2 + $0x1f60] sm:$0xff] }
 0x31a   :  { %v1139_v51 = vld [vmem:[#allocation2 + $0x1fa0] sm:$0xff] }
 0x31b   :  { %7141 = vmatpush1.bf16.msra.mxu0 %v9892_v23  ;;  %7305 = vmatpush1.bf16.msra.mxu1 %v9894_v60  ;;  %v9991_v23 = vcombine.high %v1044_v52, %v1052_v16  ;;  %v1059_v60 = vld [vmem:[#allocation2 + $0x1d20] sm:$0xff]  ;;  %v1140_v16 = vld [vmem:[#allocation2 + $0x1fa8] sm:$0xff] }
 0x31c   :  { %7142 = vmatprep.subr.bf16.mxu0 %v9909_v61  ;;  %7306 = vmatprep.subr.bf16.mxu1 %v9911_v62  ;;  %v1067_v61 = vld [vmem:[#allocation2 + $0x1d60] sm:$0xff]  ;;  %v1060_v62 = vld [vmem:[#allocation2 + $0x1d28] sm:$0xff] }
 0x31d   :  { %v10005_v3 = vcombine.high %v1059_v60, %v1067_v61  ;;  %v10004_v12 = vcombine.low %v1059_v60, %v1067_v61  ;;  %v10006_v13 = vcombine.low %v1060_v62, %v1068_v0  ;;  %v1147_v52 = vld [vmem:[#allocation2 + $0x1fe0] sm:$0xff]  ;;  %v133_v61 = vld [vmem:[#allocation2 + $0x30] sm:$0xff] }
 0x31f   :  { %7143 = vmatpush1.bf16.msra.mxu0 %v9908_v53  ;;  %7307 = vmatpush1.bf16.msra.mxu1 %v9910_v5  ;;  %v10007_v53 = vcombine.high %v1060_v62, %v1068_v0  ;;  %v1075_v5 = vld [vmem:[#allocation2 + $0x1da0] sm:$0xff]  ;;  %v141_v62 = vld [vmem:[#allocation2 + $0x70] sm:$0xff]  ;;  %v134_v0 = vld [vmem:[#allocation2 + $0x38] sm:$0xff] }
 0x320   :  { %7144 = vmatprep.subr.bf16.mxu0 %v9925_v6  ;;  %7308 = vmatprep.subr.bf16.mxu1 %v9927_v7  ;;  %v1083_v6 = vld [vmem:[#allocation2 + $0x1de0] sm:$0xff]  ;;  %v1076_v7 = vld [vmem:[#allocation2 + $0x1da8] sm:$0xff] }
 0x321   :  { %v10979_v20 = vpop.f32.mrb[4].mxu0  ;;  %v10981_v27 = vpop.f32.mrb[4].mxu1  ;;  %v10021_v33 = vcombine.high %v1075_v5, %v1083_v6  ;;  %v10020_v26 = vcombine.low %v1075_v5, %v1083_v6  ;;  %v10022_v29 = vcombine.low %v1076_v7, %v1084_v8  ;;  %v149_v6 = vld [vmem:[#allocation2 + $0xb0] sm:$0xff] }
 0x322   :  { %v10983_v28 = vpop.f32.mrb[5].mxu0  ;;  %v10985_v31 = vpop.f32.mrb[5].mxu1 }
 0x323   :  { %v6844_v32 = vpop.f32.mrb[6].mxu0  ;;  %7145 = vmatpush1.bf16.msra.mxu0 %v9924_v17  ;;  %v7008_v57 = vpop.f32.mrb[6].mxu1  ;;  %7309 = vmatpush1.bf16.msra.mxu1 %v9926_v18  ;;  %v10023_v17 = vcombine.high %v1076_v7, %v1084_v8  ;;  %v1091_v18 = vld [vmem:[#allocation2 + $0x1e20] sm:$0xff]  ;;  %v157_v7 = vld [vmem:[#allocation2 + $0xf0] sm:$0xff]  ;;  %v150_v8 = vld [vmem:[#allocation2 + $0xb8] sm:$0xff] }
 0x324   :  { %v6845_v35 = vpop.f32.mrb[7].mxu0  ;;  %7146 = vmatprep.subr.bf16.mxu0 %v9941_v59  ;;  %v7009_v38 = vpop.f32.mrb[7].mxu1  ;;  %7310 = vmatprep.subr.bf16.mxu1 %v9943_v22  ;;  %v1099_v59 = vld [vmem:[#allocation2 + $0x1e60] sm:$0xff]  ;;  %v1092_v22 = vld [vmem:[#allocation2 + $0x1e28] sm:$0xff] }
 0x325   :  { %v10037_v30 = vcombine.high %v1091_v18, %v1099_v59  ;;  %v10039_v32 = vcombine.high %v1092_v22, %v1100_v24  ;;  %v1115_v57 = vld [vmem:[#allocation2 + $0x1ee0] sm:$0xff]  ;;  %v1108_v35 = vld [vmem:[#allocation2 + $0x1ea8] sm:$0xff]  ;;  %v10038_v38 = vcombine.low %v1092_v22, %v1100_v24  ;;  %v173_v22 = vld [vmem:[#allocation2 + $0x170] sm:$0xff] }
 0x326   :  { %v166_v24 = vld [vmem:[#allocation2 + $0x138] sm:$0xff] }
 0x327   :  { %7147 = vmatpush1.bf16.msra.mxu0 %v9940_v34  ;;  %7311 = vmatpush1.bf16.msra.mxu1 %v9942_v63  ;;  %v1107_v34 = vld [vmem:[#allocation2 + $0x1ea0] sm:$0xff]  ;;  %v1116_v63 = vld [vmem:[#allocation2 + $0x1ee8] sm:$0xff] }
 0x328   :  { %7148 = vmatprep.subr.bf16.mxu0 %v9957_v37  ;;  %7312 = vmatprep.subr.bf16.mxu1 %v9959_v39  ;;  %v10036_v37 = vcombine.low %v1091_v18, %v1099_v59  ;;  %v10053_v39 = vcombine.high %v1107_v34, %v1115_v57  ;;  %v10055_v40 = vcombine.high %v1108_v35, %v1116_v63  ;;  %v165_v59 = vld [vmem:[#allocation2 + $0x130] sm:$0xff] }
 0x32b   :  { %7149 = vmatpush1.bf16.msra.mxu0 %v9956_v46  ;;  %7313 = vmatpush1.bf16.msra.mxu1 %v9958_v47  ;;  %v1132_v46 = vld [vmem:[#allocation2 + $0x1f68] sm:$0xff]  ;;  %v10052_v47 = vcombine.low %v1107_v34, %v1115_v57  ;;  %v181_v57 = vld [vmem:[#allocation2 + $0x1b0] sm:$0xff] }
 0x32c   :  { %7150 = vmatprep.subr.bf16.mxu0 %v9973_v48  ;;  %7314 = vmatprep.subr.bf16.mxu1 %v9975_v49  ;;  %v10054_v48 = vcombine.low %v1108_v35, %v1116_v63  ;;  %v10069_v49 = vcombine.high %v1123_v41, %v1131_v42  ;;  %v10071_v50 = vcombine.high %v1124_v45, %v1132_v46  ;;  %v189_v35 = vld [vmem:[#allocation2 + $0x1f0] sm:$0xff]  ;;  %v182_v63 = vld [vmem:[#allocation2 + $0x1b8] sm:$0xff] }
 0x32f   :  { %7151 = vmatpush1.bf16.msra.mxu0 %v9972_v55  ;;  %7315 = vmatpush1.bf16.msra.mxu1 %v9974_v56  ;;  %v1148_v55 = vld [vmem:[#allocation2 + $0x1fe8] sm:$0xff]  ;;  %v10068_v56 = vcombine.low %v1123_v41, %v1131_v42  ;;  %v197_v42 = vld [vmem:[#allocation2 + $0x230] sm:$0xff] }
 0x330   :  { %7152 = vmatprep.subr.bf16.mxu0 %v9989_v58  ;;  %7316 = vmatprep.subr.bf16.mxu1 %v9991_v23  ;;  %v10070_v58 = vcombine.low %v1124_v45, %v1132_v46  ;;  %v10085_v23 = vcombine.high %v1139_v51, %v1147_v52  ;;  %v10087_v60 = vcombine.high %v1140_v16, %v1148_v55  ;;  %v205_v45 = vld [vmem:[#allocation2 + $0x270] sm:$0xff]  ;;  %v198_v46 = vld [vmem:[#allocation2 + $0x238] sm:$0xff] }
 0x333   :  { %7153 = vmatpush1.bf16.msra.mxu0 %v9988_v1  ;;  %7317 = vmatpush1.bf16.msra.mxu1 %v9990_v2  ;;  %v142_v1 = vld [vmem:[#allocation2 + $0x78] sm:$0xff]  ;;  %v10084_v2 = vcombine.low %v1139_v51, %v1147_v52  ;;  %v213_v51 = vld [vmem:[#allocation2 + $0x2b0] sm:$0xff] }
 0x334   :  { %7154 = vmatprep.subr.bf16.mxu0 %v10005_v3  ;;  %7318 = vmatprep.subr.bf16.mxu1 %v10007_v53  ;;  %v10086_v3 = vcombine.low %v1140_v16, %v1148_v55  ;;  %v9081_v53 = vcombine.high %v133_v61, %v141_v62  ;;  %v9083_v5 = vcombine.high %v134_v0, %v142_v1  ;;  %v221_v52 = vld [vmem:[#allocation2 + $0x2f0] sm:$0xff]  ;;  %v214_v16 = vld [vmem:[#allocation2 + $0x2b8] sm:$0xff] }
 0x335   :  { %v222_v55 = vld [vmem:[#allocation2 + $0x2f8] sm:$0xff] }
 0x337   :  { %7155 = vmatpush1.bf16.msra.mxu0 %v10004_v12  ;;  %7319 = vmatpush1.bf16.msra.mxu1 %v10006_v13  ;;  %v158_v12 = vld [vmem:[#allocation2 + $0xf8] sm:$0xff]  ;;  %v9080_v13 = vcombine.low %v133_v61, %v141_v62  ;;  %v229_v61 = vld [vmem:[#allocation2 + $0x330] sm:$0xff] }
 0x338   :  { %7156 = vmatprep.subr.bf16.mxu0 %v10021_v33  ;;  %7320 = vmatprep.subr.bf16.mxu1 %v10023_v17  ;;  %v9082_v33 = vcombine.low %v134_v0, %v142_v1  ;;  %v9097_v17 = vcombine.high %v149_v6, %v157_v7  ;;  %v9099_v18 = vcombine.high %v150_v8, %v158_v12  ;;  %v237_v62 = vld [vmem:[#allocation2 + $0x370] sm:$0xff]  ;;  %v230_v0 = vld [vmem:[#allocation2 + $0x338] sm:$0xff] }
 0x339   :  { %v238_v1 = vld [vmem:[#allocation2 + $0x378] sm:$0xff] }
 0x33b   :  { %7157 = vmatpush1.bf16.msra.mxu0 %v10020_v26  ;;  %7321 = vmatpush1.bf16.msra.mxu1 %v10022_v29  ;;  %v174_v26 = vld [vmem:[#allocation2 + $0x178] sm:$0xff]  ;;  %v9096_v29 = vcombine.low %v149_v6, %v157_v7  ;;  %v245_v6 = vld [vmem:[#allocation2 + $0x3b0] sm:$0xff] }
 0x33c   :  { %7158 = vmatprep.subr.bf16.mxu0 %v10037_v30  ;;  %7322 = vmatprep.subr.bf16.mxu1 %v10039_v32  ;;  %v9098_v30 = vcombine.low %v150_v8, %v158_v12  ;;  %v9113_v32 = vcombine.high %v165_v59, %v173_v22  ;;  %v9115_v34 = vcombine.high %v166_v24, %v174_v26  ;;  %v253_v7 = vld [vmem:[#allocation2 + $0x3f0] sm:$0xff]  ;;  %v246_v8 = vld [vmem:[#allocation2 + $0x3b8] sm:$0xff] }
 0x33d   :  { %v254_v12 = vld [vmem:[#allocation2 + $0x3f8] sm:$0xff] }
 0x33f   :  { %7159 = vmatpush1.bf16.msra.mxu0 %v10036_v37  ;;  %7323 = vmatpush1.bf16.msra.mxu1 %v10038_v38  ;;  %v190_v37 = vld [vmem:[#allocation2 + $0x1f8] sm:$0xff]  ;;  %v9112_v38 = vcombine.low %v165_v59, %v173_v22  ;;  %v261_v59 = vld [vmem:[#allocation2 + $0x430] sm:$0xff] }
 0x340   :  { %7160 = vmatprep.subr.bf16.mxu0 %v10053_v39  ;;  %7324 = vmatprep.subr.bf16.mxu1 %v10055_v40  ;;  %v9114_v39 = vcombine.low %v166_v24, %v174_v26  ;;  %v9129_v40 = vcombine.high %v181_v57, %v189_v35  ;;  %v9131_v41 = vcombine.high %v182_v63, %v190_v37  ;;  %v269_v22 = vld [vmem:[#allocation2 + $0x470] sm:$0xff]  ;;  %v262_v24 = vld [vmem:[#allocation2 + $0x438] sm:$0xff] }
 0x341   :  { %v270_v26 = vld [vmem:[#allocation2 + $0x478] sm:$0xff] }
 0x343   :  { %7161 = vmatpush1.bf16.msra.mxu0 %v10052_v47  ;;  %7325 = vmatpush1.bf16.msra.mxu1 %v10054_v48  ;;  %v206_v47 = vld [vmem:[#allocation2 + $0x278] sm:$0xff]  ;;  %v9128_v48 = vcombine.low %v181_v57, %v189_v35  ;;  %v277_v57 = vld [vmem:[#allocation2 + $0x4b0] sm:$0xff] }
 0x344   :  { %7162 = vmatprep.subr.bf16.mxu0 %v10069_v49  ;;  %7326 = vmatprep.subr.bf16.mxu1 %v10071_v50  ;;  %v9130_v49 = vcombine.low %v182_v63, %v190_v37  ;;  %v9145_v50 = vcombine.high %v197_v42, %v205_v45  ;;  %v285_v35 = vld [vmem:[#allocation2 + $0x4f0] sm:$0xff]  ;;  %v278_v63 = vld [vmem:[#allocation2 + $0x4b8] sm:$0xff] }
 0x345   :  { %v286_v37 = vld [vmem:[#allocation2 + $0x4f8] sm:$0xff] }
 0x347   :  { %7163 = vmatpush1.bf16.msra.mxu0 %v10068_v56  ;;  %7327 = vmatpush1.bf16.msra.mxu1 %v10070_v58  ;;  %v9144_v56 = vcombine.low %v197_v42, %v205_v45  ;;  %v9146_v58 = vcombine.low %v198_v46, %v206_v47  ;;  %v293_v42 = vld [vmem:[#allocation2 + $0x530] sm:$0xff] }
 0x348   :  { %7164 = vmatprep.subr.bf16.mxu0 %v10085_v23  ;;  %7328 = vmatprep.subr.bf16.mxu1 %v10087_v60  ;;  %v9161_v23 = vcombine.high %v213_v51, %v221_v52  ;;  %v9163_v60 = vcombine.high %v214_v16, %v222_v55  ;;  %v301_v45 = vld [vmem:[#allocation2 + $0x570] sm:$0xff] }
 0x34b   :  { %7165 = vmatpush1.bf16.msra.mxu0 %v10084_v2  ;;  %7329 = vmatpush1.bf16.msra.mxu1 %v10086_v3  ;;  %v9160_v2 = vcombine.low %v213_v51, %v221_v52  ;;  %v9162_v3 = vcombine.low %v214_v16, %v222_v55  ;;  %v309_v51 = vld [vmem:[#allocation2 + $0x5b0] sm:$0xff]  ;;  %v310_v16 = vld [vmem:[#allocation2 + $0x5b8] sm:$0xff] }
 0x34c   :  { %7339 = vmatprep.subr.bf16.mxu0 %v9081_v53  ;;  %7503 = vmatprep.subr.bf16.mxu1 %v9083_v5  ;;  %v9177_v53 = vcombine.high %v229_v61, %v237_v62  ;;  %v9179_v5 = vcombine.high %v230_v0, %v238_v1  ;;  %v317_v52 = vld [vmem:[#allocation2 + $0x5f0] sm:$0xff]  ;;  %v318_v55 = vld [vmem:[#allocation2 + $0x5f8] sm:$0xff] }
 0x34e   :  { %7167 = vmatmul.mubr.bf16.vlgmr.msra.gmra.mrb[8].mxu0 %v10937_v21  ;;  %7331 = vmatmul.mubr.bf16.vlgmr.msra.gmra.mrb[8].mxu1 %v10937_v21 }
 0x34f   :  { %7340 = vmatpush1.bf16.msra.mxu0 %v9080_v13  ;;  %7504 = vmatpush1.bf16.msra.mxu1 %v9082_v33  ;;  %v9176_v13 = vcombine.low %v229_v61, %v237_v62  ;;  %v9178_v33 = vcombine.low %v230_v0, %v238_v1  ;;  %v325_v61 = vld [vmem:[#allocation2 + $0x630] sm:$0xff]  ;;  %v326_v0 = vld [vmem:[#allocation2 + $0x638] sm:$0xff] }
 0x350   :  { %7341 = vmatprep.subr.bf16.mxu0 %v9097_v17  ;;  %7505 = vmatprep.subr.bf16.mxu1 %v9099_v18  ;;  %v9193_v17 = vcombine.high %v245_v6, %v253_v7  ;;  %v9195_v18 = vcombine.high %v246_v8, %v254_v12  ;;  %v333_v62 = vld [vmem:[#allocation2 + $0x670] sm:$0xff]  ;;  %v334_v1 = vld [vmem:[#allocation2 + $0x678] sm:$0xff] }
 0x351   :  { %7371 = vmatprep.mubr.bf16.mxu0 %v10876_v9  ;;  %7535 = vmatprep.mubr.bf16.mxu1 %v10876_v9  ;;  %v9147_v9 = vcombine.high %v198_v46, %v206_v47  ;;  %v294_v46 = vld [vmem:[#allocation2 + $0x538] sm:$0xff] }
 0x352   :  { %v302_v47 = vld [vmem:[#allocation2 + $0x578] sm:$0xff] }
 0x353   :  { %7342 = vmatpush1.bf16.msra.mxu0 %v9096_v29  ;;  %7506 = vmatpush1.bf16.msra.mxu1 %v9098_v30  ;;  %v9192_v29 = vcombine.low %v245_v6, %v253_v7  ;;  %v9194_v30 = vcombine.low %v246_v8, %v254_v12  ;;  %v341_v6 = vld [vmem:[#allocation2 + $0x6b0] sm:$0xff]  ;;  %v342_v8 = vld [vmem:[#allocation2 + $0x6b8] sm:$0xff] }
 0x354   :  { %7343 = vmatprep.subr.bf16.mxu0 %v9113_v32  ;;  %7507 = vmatprep.subr.bf16.mxu1 %v9115_v34  ;;  %v9209_v32 = vcombine.high %v261_v59, %v269_v22  ;;  %v9211_v34 = vcombine.high %v262_v24, %v270_v26  ;;  %v349_v7 = vld [vmem:[#allocation2 + $0x6f0] sm:$0xff]  ;;  %v350_v12 = vld [vmem:[#allocation2 + $0x6f8] sm:$0xff] }
 0x357   :  { %7344 = vmatpush1.bf16.msra.mxu0 %v9112_v38  ;;  %7508 = vmatpush1.bf16.msra.mxu1 %v9114_v39  ;;  %v9208_v38 = vcombine.low %v261_v59, %v269_v22  ;;  %v9210_v39 = vcombine.low %v262_v24, %v270_v26  ;;  %v357_v59 = vld [vmem:[#allocation2 + $0x730] sm:$0xff]  ;;  %v358_v24 = vld [vmem:[#allocation2 + $0x738] sm:$0xff] }
 0x358   :  { %7345 = vmatprep.subr.bf16.mxu0 %v9129_v40  ;;  %7509 = vmatprep.subr.bf16.mxu1 %v9131_v41  ;;  %v9225_v40 = vcombine.high %v277_v57, %v285_v35  ;;  %v9227_v41 = vcombine.high %v278_v63, %v286_v37  ;;  %v365_v22 = vld [vmem:[#allocation2 + $0x770] sm:$0xff]  ;;  %v366_v26 = vld [vmem:[#allocation2 + $0x778] sm:$0xff] }
 0x35b   :  { %7346 = vmatpush1.bf16.msra.mxu0 %v9128_v48  ;;  %7510 = vmatpush1.bf16.msra.mxu1 %v9130_v49  ;;  %v9224_v48 = vcombine.low %v277_v57, %v285_v35  ;;  %v9226_v49 = vcombine.low %v278_v63, %v286_v37  ;;  %v373_v57 = vld [vmem:[#allocation2 + $0x7b0] sm:$0xff]  ;;  %v374_v63 = vld [vmem:[#allocation2 + $0x7b8] sm:$0xff] }
 0x35c   :  { %7347 = vmatprep.subr.bf16.mxu0 %v9145_v50  ;;  %7511 = vmatprep.subr.bf16.mxu1 %v9147_v9  ;;  %v9241_v50 = vcombine.high %v293_v42, %v301_v45  ;;  %v9243_v9 = vcombine.high %v294_v46, %v302_v47  ;;  %v381_v35 = vld [vmem:[#allocation2 + $0x7f0] sm:$0xff]  ;;  %v382_v37 = vld [vmem:[#allocation2 + $0x7f8] sm:$0xff] }
 0x35f   :  { %7348 = vmatpush1.bf16.msra.mxu0 %v9144_v56  ;;  %7512 = vmatpush1.bf16.msra.mxu1 %v9146_v58  ;;  %v9240_v56 = vcombine.low %v293_v42, %v301_v45  ;;  %v9242_v58 = vcombine.low %v294_v46, %v302_v47  ;;  %v389_v42 = vld [vmem:[#allocation2 + $0x830] sm:$0xff]  ;;  %v390_v46 = vld [vmem:[#allocation2 + $0x838] sm:$0xff] }
 0x360   :  { %7349 = vmatprep.subr.bf16.mxu0 %v9161_v23  ;;  %7513 = vmatprep.subr.bf16.mxu1 %v9163_v60  ;;  %v9257_v23 = vcombine.high %v309_v51, %v317_v52  ;;  %v9259_v60 = vcombine.high %v310_v16, %v318_v55  ;;  %v397_v45 = vld [vmem:[#allocation2 + $0x870] sm:$0xff]  ;;  %v398_v47 = vld [vmem:[#allocation2 + $0x878] sm:$0xff] }
 0x363   :  { %7350 = vmatpush1.bf16.msra.mxu0 %v9160_v2  ;;  %7514 = vmatpush1.bf16.msra.mxu1 %v9162_v3  ;;  %v9256_v2 = vcombine.low %v309_v51, %v317_v52  ;;  %v9258_v3 = vcombine.low %v310_v16, %v318_v55  ;;  %v405_v51 = vld [vmem:[#allocation2 + $0x8b0] sm:$0xff]  ;;  %v406_v16 = vld [vmem:[#allocation2 + $0x8b8] sm:$0xff] }
 0x364   :  { %7351 = vmatprep.subr.bf16.mxu0 %v9177_v53  ;;  %7515 = vmatprep.subr.bf16.mxu1 %v9179_v5  ;;  %v9273_v53 = vcombine.high %v325_v61, %v333_v62  ;;  %v9275_v5 = vcombine.high %v326_v0, %v334_v1  ;;  %v413_v52 = vld [vmem:[#allocation2 + $0x8f0] sm:$0xff]  ;;  %v414_v55 = vld [vmem:[#allocation2 + $0x8f8] sm:$0xff] }
 0x367   :  { %7352 = vmatpush1.bf16.msra.mxu0 %v9176_v13  ;;  %7516 = vmatpush1.bf16.msra.mxu1 %v9178_v33  ;;  %v9272_v13 = vcombine.low %v325_v61, %v333_v62  ;;  %v9274_v33 = vcombine.low %v326_v0, %v334_v1  ;;  %v421_v61 = vld [vmem:[#allocation2 + $0x930] sm:$0xff]  ;;  %v422_v0 = vld [vmem:[#allocation2 + $0x938] sm:$0xff] }
 0x368   :  { %7353 = vmatprep.subr.bf16.mxu0 %v9193_v17  ;;  %7517 = vmatprep.subr.bf16.mxu1 %v9195_v18  ;;  %v9289_v17 = vcombine.high %v341_v6, %v349_v7  ;;  %v9291_v18 = vcombine.high %v342_v8, %v350_v12  ;;  %v429_v62 = vld [vmem:[#allocation2 + $0x970] sm:$0xff]  ;;  %v430_v1 = vld [vmem:[#allocation2 + $0x978] sm:$0xff] }
 0x36b   :  { %7354 = vmatpush1.bf16.msra.mxu0 %v9192_v29  ;;  %7518 = vmatpush1.bf16.msra.mxu1 %v9194_v30  ;;  %v9288_v29 = vcombine.low %v341_v6, %v349_v7  ;;  %v9290_v30 = vcombine.low %v342_v8, %v350_v12  ;;  %v437_v6 = vld [vmem:[#allocation2 + $0x9b0] sm:$0xff]  ;;  %v438_v8 = vld [vmem:[#allocation2 + $0x9b8] sm:$0xff] }
 0x36c   :  { %7355 = vmatprep.subr.bf16.mxu0 %v9209_v32  ;;  %7519 = vmatprep.subr.bf16.mxu1 %v9211_v34  ;;  %v9305_v32 = vcombine.high %v357_v59, %v365_v22  ;;  %v9307_v34 = vcombine.high %v358_v24, %v366_v26  ;;  %v445_v7 = vld [vmem:[#allocation2 + $0x9f0] sm:$0xff]  ;;  %v446_v12 = vld [vmem:[#allocation2 + $0x9f8] sm:$0xff] }
 0x36f   :  { %7356 = vmatpush1.bf16.msra.mxu0 %v9208_v38  ;;  %7520 = vmatpush1.bf16.msra.mxu1 %v9210_v39  ;;  %v9304_v38 = vcombine.low %v357_v59, %v365_v22  ;;  %v9306_v39 = vcombine.low %v358_v24, %v366_v26  ;;  %v461_v59 = vld [vmem:[#allocation2 + $0xa70] sm:$0xff]  ;;  %v454_v22 = vld [vmem:[#allocation2 + $0xa38] sm:$0xff]  ;;  %v9384_v26 = vcombine.low %v437_v6, %v445_v7 }
 0x370   :  { %7357 = vmatprep.subr.bf16.mxu0 %v9225_v40  ;;  %7521 = vmatprep.subr.bf16.mxu1 %v9227_v41  ;;  %v9321_v40 = vcombine.high %v373_v57, %v381_v35  ;;  %v9323_v41 = vcombine.high %v374_v63, %v382_v37  ;;  %v462_v24 = vld [vmem:[#allocation2 + $0xa78] sm:$0xff] }
 0x373   :  { %7358 = vmatpush1.bf16.msra.mxu0 %v9224_v48  ;;  %7522 = vmatpush1.bf16.msra.mxu1 %v9226_v49  ;;  %v9320_v48 = vcombine.low %v373_v57, %v381_v35  ;;  %v9322_v49 = vcombine.low %v374_v63, %v382_v37  ;;  %v470_v57 = vld [vmem:[#allocation2 + $0xab8] sm:$0xff]  ;;  %v9402_v37 = vcombine.low %v454_v22, %v462_v24 }
 0x374   :  { %7359 = vmatprep.subr.bf16.mxu0 %v9241_v50  ;;  %7523 = vmatprep.subr.bf16.mxu1 %v9243_v9  ;;  %v9337_v50 = vcombine.high %v389_v42, %v397_v45  ;;  %v9339_v9 = vcombine.high %v390_v46, %v398_v47  ;;  %v478_v35 = vld [vmem:[#allocation2 + $0xaf8] sm:$0xff] }
 0x377   :  { %7360 = vmatpush1.bf16.msra.mxu0 %v9240_v56  ;;  %7524 = vmatpush1.bf16.msra.mxu1 %v9242_v58  ;;  %v9336_v56 = vcombine.low %v389_v42, %v397_v45  ;;  %v9338_v58 = vcombine.low %v390_v46, %v398_v47  ;;  %v486_v42 = vld [vmem:[#allocation2 + $0xb38] sm:$0xff]  ;;  %v9418_v47 = vcombine.low %v470_v57, %v478_v35 }
 0x378   :  { %7361 = vmatprep.subr.bf16.mxu0 %v9257_v23  ;;  %7525 = vmatprep.subr.bf16.mxu1 %v9259_v60  ;;  %v9353_v23 = vcombine.high %v405_v51, %v413_v52  ;;  %v9355_v60 = vcombine.high %v406_v16, %v414_v55  ;;  %v494_v45 = vld [vmem:[#allocation2 + $0xb78] sm:$0xff] }
 0x37b   :  { %7362 = vmatpush1.bf16.msra.mxu0 %v9256_v2  ;;  %7526 = vmatpush1.bf16.msra.mxu1 %v9258_v3  ;;  %v9352_v2 = vcombine.low %v405_v51, %v413_v52  ;;  %v9354_v3 = vcombine.low %v406_v16, %v414_v55  ;;  %v502_v51 = vld [vmem:[#allocation2 + $0xbb8] sm:$0xff]  ;;  %v9434_v55 = vcombine.low %v486_v42, %v494_v45 }
 0x37c   :  { %7363 = vmatprep.subr.bf16.mxu0 %v9273_v53  ;;  %7527 = vmatprep.subr.bf16.mxu1 %v9275_v5  ;;  %v9369_v53 = vcombine.high %v421_v61, %v429_v62  ;;  %v9371_v5 = vcombine.high %v422_v0, %v430_v1  ;;  %v510_v52 = vld [vmem:[#allocation2 + $0xbf8] sm:$0xff] }
 0x37f   :  { %7364 = vmatpush1.bf16.msra.mxu0 %v9272_v13  ;;  %7528 = vmatpush1.bf16.msra.mxu1 %v9274_v33  ;;  %v9368_v13 = vcombine.low %v421_v61, %v429_v62  ;;  %v9385_v33 = vcombine.high %v437_v6, %v445_v7  ;;  %v518_v61 = vld [vmem:[#allocation2 + $0xc38] sm:$0xff] }
 0x380   :  { %7365 = vmatprep.subr.bf16.mxu0 %v9289_v17  ;;  %7529 = vmatprep.subr.bf16.mxu1 %v9291_v18  ;;  %v9387_v17 = vcombine.high %v438_v8, %v446_v12  ;;  %v453_v18 = vld [vmem:[#allocation2 + $0xa30] sm:$0xff]  ;;  %v526_v62 = vld [vmem:[#allocation2 + $0xc78] sm:$0xff] }
 0x381   :  { %v9400_v63 = vcombine.low %v453_v18, %v461_v59  ;;  %v534_v6 = vld [vmem:[#allocation2 + $0xcb8] sm:$0xff] }
 0x382   :  { %v542_v7 = vld [vmem:[#allocation2 + $0xcf8] sm:$0xff] }
 0x383   :  { %7366 = vmatpush1.bf16.msra.mxu0 %v9288_v29  ;;  %7530 = vmatpush1.bf16.msra.mxu1 %v9290_v30  ;;  %v9386_v29 = vcombine.low %v438_v8, %v446_v12  ;;  %v9401_v30 = vcombine.high %v453_v18, %v461_v59  ;;  %v9466_v12 = vcombine.low %v518_v61, %v526_v62  ;;  %v550_v18 = vld [vmem:[#allocation2 + $0xd38] sm:$0xff] }
 0x384   :  { %7367 = vmatprep.subr.bf16.mxu0 %v9305_v32  ;;  %7531 = vmatprep.subr.bf16.mxu1 %v9307_v34  ;;  %v469_v32 = vld [vmem:[#allocation2 + $0xab0] sm:$0xff]  ;;  %v558_v59 = vld [vmem:[#allocation2 + $0xd78] sm:$0xff] }
 0x385   :  { %v477_v34 = vld [vmem:[#allocation2 + $0xaf0] sm:$0xff] }
 0x386   :  { %v9416_v46 = vcombine.low %v469_v32, %v477_v34 }
 0x387   :  { %7368 = vmatpush1.bf16.msra.mxu0 %v9304_v38  ;;  %7532 = vmatpush1.bf16.msra.mxu1 %v9306_v39  ;;  %v9417_v38 = vcombine.high %v469_v32, %v477_v34  ;;  %v9419_v39 = vcombine.high %v470_v57, %v478_v35  ;;  %v566_v32 = vld [vmem:[#allocation2 + $0xdb8] sm:$0xff]  ;;  %v9498_v35 = vcombine.low %v550_v18, %v558_v59 }
 0x388   :  { %7369 = vmatprep.subr.bf16.mxu0 %v9321_v40  ;;  %7533 = vmatprep.subr.bf16.mxu1 %v9323_v41  ;;  %v485_v40 = vld [vmem:[#allocation2 + $0xb30] sm:$0xff]  ;;  %v574_v34 = vld [vmem:[#allocation2 + $0xdf8] sm:$0xff] }
 0x389   :  { %v493_v41 = vld [vmem:[#allocation2 + $0xb70] sm:$0xff] }
 0x38a   :  { %v9432_v16 = vcombine.low %v485_v40, %v493_v41 }
 0x38b   :  { %7370 = vmatpush1.bf16.msra.mxu0 %v9320_v48  ;;  %7534 = vmatpush1.bf16.msra.mxu1 %v9322_v49  ;;  %v9433_v48 = vcombine.high %v485_v40, %v493_v41  ;;  %v9435_v49 = vcombine.high %v486_v42, %v494_v45  ;;  %v582_v40 = vld [vmem:[#allocation2 + $0xe38] sm:$0xff]  ;;  %v9514_v45 = vcombine.low %v566_v32, %v574_v34 }
 0x38c   :  { %7380 = vmatprep.subr.bf16.mxu0 %v9337_v50  ;;  %7544 = vmatprep.subr.bf16.mxu1 %v9339_v9  ;;  %v501_v50 = vld [vmem:[#allocation2 + $0xbb0] sm:$0xff]  ;;  %v590_v41 = vld [vmem:[#allocation2 + $0xe78] sm:$0xff] }
 0x38d   :  { %v509_v9 = vld [vmem:[#allocation2 + $0xbf0] sm:$0xff] }
 0x38e   :  { %7372 = vmatmul.mubr.bf16.vlgmr.msra.gmra.mrb[12].mxu0 %v10889_v25  ;;  %7536 = vmatmul.mubr.bf16.vlgmr.msra.gmra.mrb[12].mxu1 %v10889_v25  ;;  %v9370_v25 = vcombine.low %v422_v0, %v430_v1  ;;  %v9448_v0 = vcombine.low %v501_v50, %v509_v9  ;;  %v9450_v1 = vcombine.low %v502_v51, %v510_v52 }
 0x38f   :  { %7381 = vmatpush1.bf16.msra.mxu0 %v9336_v56  ;;  %7545 = vmatpush1.bf16.msra.mxu1 %v9338_v58  ;;  %v9449_v56 = vcombine.high %v501_v50, %v509_v9  ;;  %v9451_v58 = vcombine.high %v502_v51, %v510_v52  ;;  %v598_v50 = vld [vmem:[#allocation2 + $0xeb8] sm:$0xff]  ;;  %v9530_v52 = vcombine.low %v582_v40, %v590_v41 }
 0x390   :  { %7382 = vmatprep.subr.bf16.mxu0 %v9353_v23  ;;  %7546 = vmatprep.subr.bf16.mxu1 %v9355_v60  ;;  %v517_v23 = vld [vmem:[#allocation2 + $0xc30] sm:$0xff]  ;;  %v606_v9 = vld [vmem:[#allocation2 + $0xef8] sm:$0xff] }
 0x391   :  { %7412 = vmatprep.mubr.bf16.mxu0 %v10891_v36  ;;  %7576 = vmatprep.mubr.bf16.mxu1 %v10891_v36  ;;  %v9403_v36 = vcombine.high %v454_v22, %v462_v24  ;;  %v525_v60 = vld [vmem:[#allocation2 + $0xc70] sm:$0xff]  ;;  %v9482_v24 = vcombine.low %v534_v6, %v542_v7 }
 0x392   :  { %v9464_v8 = vcombine.low %v517_v23, %v525_v60 }
 0x393   :  { %7383 = vmatpush1.bf16.msra.mxu0 %v9352_v2  ;;  %7547 = vmatpush1.bf16.msra.mxu1 %v9354_v3  ;;  %v9465_v2 = vcombine.high %v517_v23, %v525_v60  ;;  %v9467_v3 = vcombine.high %v518_v61, %v526_v62  ;;  %v614_v23 = vld [vmem:[#allocation2 + $0xf38] sm:$0xff]  ;;  %v9546_v62 = vcombine.low %v598_v50, %v606_v9 }
 0x394   :  { %7384 = vmatprep.subr.bf16.mxu0 %v9369_v53  ;;  %7548 = vmatprep.subr.bf16.mxu1 %v9371_v5  ;;  %v533_v53 = vld [vmem:[#allocation2 + $0xcb0] sm:$0xff]  ;;  %v622_v60 = vld [vmem:[#allocation2 + $0xf78] sm:$0xff] }
 0x395   :  { %v541_v5 = vld [vmem:[#allocation2 + $0xcf0] sm:$0xff] }
 0x396   :  { %v9480_v22 = vcombine.low %v533_v53, %v541_v5 }
 0x397   :  { %7385 = vmatpush1.bf16.msra.mxu0 %v9368_v13  ;;  %7549 = vmatpush1.bf16.msra.mxu1 %v9370_v25  ;;  %v9481_v13 = vcombine.high %v533_v53, %v541_v5  ;;  %v9483_v25 = vcombine.high %v534_v6, %v542_v7  ;;  %v630_v53 = vld [vmem:[#allocation2 + $0xfb8] sm:$0xff]  ;;  %v9562_v7 = vcombine.low %v614_v23, %v622_v60 }
 0x398   :  { %7386 = vmatprep.subr.bf16.mxu0 %v9385_v33  ;;  %7550 = vmatprep.subr.bf16.mxu1 %v9387_v17  ;;  %v549_v33 = vld [vmem:[#allocation2 + $0xd30] sm:$0xff]  ;;  %v638_v5 = vld [vmem:[#allocation2 + $0xff8] sm:$0xff] }
 0x399   :  { %v557_v17 = vld [vmem:[#allocation2 + $0xd70] sm:$0xff] }
 0x39a   :  { %v9496_v57 = vcombine.low %v549_v33, %v557_v17 }
 0x39b   :  { %7387 = vmatpush1.bf16.msra.mxu0 %v9384_v26  ;;  %7551 = vmatpush1.bf16.msra.mxu1 %v9386_v29  ;;  %v9497_v26 = vcombine.high %v549_v33, %v557_v17  ;;  %v9499_v29 = vcombine.high %v550_v18, %v558_v59  ;;  %v646_v33 = vld [vmem:[#allocation2 + $0x1038] sm:$0xff]  ;;  %v9578_v59 = vcombine.low %v630_v53, %v638_v5 }
 0x39c   :  { %7388 = vmatprep.subr.bf16.mxu0 %v9401_v30  ;;  %7552 = vmatprep.subr.bf16.mxu1 %v9403_v36  ;;  %v565_v30 = vld [vmem:[#allocation2 + $0xdb0] sm:$0xff]  ;;  %v654_v17 = vld [vmem:[#allocation2 + $0x1078] sm:$0xff] }
 0x39d   :  { %v573_v36 = vld [vmem:[#allocation2 + $0xdf0] sm:$0xff] }
 0x39e   :  { %v9512_v42 = vcombine.low %v565_v30, %v573_v36 }
 0x39f   :  { %7389 = vmatpush1.bf16.msra.mxu0 %v9400_v63  ;;  %7553 = vmatpush1.bf16.msra.mxu1 %v9402_v37  ;;  %v9513_v63 = vcombine.high %v565_v30, %v573_v36  ;;  %v9515_v37 = vcombine.high %v566_v32, %v574_v34  ;;  %v662_v30 = vld [vmem:[#allocation2 + $0x10b8] sm:$0xff]  ;;  %v9594_v34 = vcombine.low %v646_v33, %v654_v17 }
 0x3a0   :  { %7390 = vmatprep.subr.bf16.mxu0 %v9417_v38  ;;  %7554 = vmatprep.subr.bf16.mxu1 %v9419_v39  ;;  %v581_v38 = vld [vmem:[#allocation2 + $0xe30] sm:$0xff]  ;;  %v670_v36 = vld [vmem:[#allocation2 + $0x10f8] sm:$0xff] }
 0x3a1   :  { %v589_v39 = vld [vmem:[#allocation2 + $0xe70] sm:$0xff] }
 0x3a2   :  { %v9528_v51 = vcombine.low %v581_v38, %v589_v39 }
 0x3a3   :  { %7391 = vmatpush1.bf16.msra.mxu0 %v9416_v46  ;;  %7555 = vmatpush1.bf16.msra.mxu1 %v9418_v47  ;;  %v9529_v46 = vcombine.high %v581_v38, %v589_v39  ;;  %v9531_v47 = vcombine.high %v582_v40, %v590_v41  ;;  %v678_v38 = vld [vmem:[#allocation2 + $0x1138] sm:$0xff]  ;;  %v9610_v41 = vcombine.low %v662_v30, %v670_v36 }
 0x3a4   :  { %7392 = vmatprep.subr.bf16.mxu0 %v9433_v48  ;;  %7556 = vmatprep.subr.bf16.mxu1 %v9435_v49  ;;  %v597_v48 = vld [vmem:[#allocation2 + $0xeb0] sm:$0xff]  ;;  %v686_v39 = vld [vmem:[#allocation2 + $0x1178] sm:$0xff] }
 0x3a5   :  { %v605_v49 = vld [vmem:[#allocation2 + $0xef0] sm:$0xff] }
 0x3a6   :  { %v9544_v61 = vcombine.low %v597_v48, %v605_v49 }
 0x3a7   :  { %7393 = vmatpush1.bf16.msra.mxu0 %v9432_v16  ;;  %7557 = vmatpush1.bf16.msra.mxu1 %v9434_v55  ;;  %v9545_v16 = vcombine.high %v597_v48, %v605_v49  ;;  %v9547_v55 = vcombine.high %v598_v50, %v606_v9  ;;  %v694_v48 = vld [vmem:[#allocation2 + $0x11b8] sm:$0xff] }
 0x3a8   :  { %7394 = vmatprep.subr.bf16.mxu0 %v9449_v56  ;;  %7558 = vmatprep.subr.bf16.mxu1 %v9451_v58  ;;  %v613_v56 = vld [vmem:[#allocation2 + $0xf30] sm:$0xff]  ;;  %v702_v49 = vld [vmem:[#allocation2 + $0x11f8] sm:$0xff] }
 0x3a9   :  { %v621_v58 = vld [vmem:[#allocation2 + $0xf70] sm:$0xff] }
 0x3aa   :  { %v9560_v6 = vcombine.low %v613_v56, %v621_v58 }
 0x3ab   :  { %7395 = vmatpush1.bf16.msra.mxu0 %v9448_v0  ;;  %7559 = vmatpush1.bf16.msra.mxu1 %v9450_v1  ;;  %v9561_v0 = vcombine.high %v613_v56, %v621_v58  ;;  %v9563_v1 = vcombine.high %v614_v23, %v622_v60  ;;  %v718_v56 = vld [vmem:[#allocation2 + $0x1278] sm:$0xff]  ;;  %v9642_v23 = vcombine.low %v694_v48, %v702_v49 }
 0x3ac   :  { %7396 = vmatprep.subr.bf16.mxu0 %v9465_v2  ;;  %7560 = vmatprep.subr.bf16.mxu1 %v9467_v3  ;;  %v629_v2 = vld [vmem:[#allocation2 + $0xfb0] sm:$0xff] }
 0x3ad   :  { %v637_v3 = vld [vmem:[#allocation2 + $0xff0] sm:$0xff] }
 0x3ae   :  { %v9576_v18 = vcombine.low %v629_v2, %v637_v3 }
 0x3af   :  { %7397 = vmatpush1.bf16.msra.mxu0 %v9464_v8  ;;  %7561 = vmatpush1.bf16.msra.mxu1 %v9466_v12  ;;  %v9577_v8 = vcombine.high %v629_v2, %v637_v3  ;;  %v9579_v12 = vcombine.high %v630_v53, %v638_v5 }
 0x3b0   :  { %7398 = vmatprep.subr.bf16.mxu0 %v9481_v13  ;;  %7562 = vmatprep.subr.bf16.mxu1 %v9483_v25  ;;  %v645_v13 = vld [vmem:[#allocation2 + $0x1030] sm:$0xff] }
 0x3b1   :  { %v653_v25 = vld [vmem:[#allocation2 + $0x1070] sm:$0xff] }
 0x3b2   :  { %v9592_v32 = vcombine.low %v645_v13, %v653_v25 }
 0x3b3   :  { %7399 = vmatpush1.bf16.msra.mxu0 %v9480_v22  ;;  %7563 = vmatpush1.bf16.msra.mxu1 %v9482_v24  ;;  %v9593_v22 = vcombine.high %v645_v13, %v653_v25  ;;  %v9595_v24 = vcombine.high %v646_v33, %v654_v17 }
 0x3b4   :  { %7400 = vmatprep.subr.bf16.mxu0 %v9497_v26  ;;  %7564 = vmatprep.subr.bf16.mxu1 %v9499_v29  ;;  %v661_v26 = vld [vmem:[#allocation2 + $0x10b0] sm:$0xff] }
 0x3b5   :  { %v669_v29 = vld [vmem:[#allocation2 + $0x10f0] sm:$0xff] }
 0x3b6   :  { %v9608_v40 = vcombine.low %v661_v26, %v669_v29 }
 0x3b7   :  { %7401 = vmatpush1.bf16.msra.mxu0 %v9496_v57  ;;  %7565 = vmatpush1.bf16.msra.mxu1 %v9498_v35  ;;  %v9609_v57 = vcombine.high %v661_v26, %v669_v29  ;;  %v9611_v35 = vcombine.high %v662_v30, %v670_v36 }
 0x3b8   :  { %7402 = vmatprep.subr.bf16.mxu0 %v9513_v63  ;;  %7566 = vmatprep.subr.bf16.mxu1 %v9515_v37  ;;  %v677_v63 = vld [vmem:[#allocation2 + $0x1130] sm:$0xff] }
 0x3b9   :  { %v685_v37 = vld [vmem:[#allocation2 + $0x1170] sm:$0xff] }
 0x3ba   :  { %v9624_v50 = vcombine.low %v677_v63, %v685_v37 }
 0x3bb   :  { %7403 = vmatpush1.bf16.msra.mxu0 %v9512_v42  ;;  %7567 = vmatpush1.bf16.msra.mxu1 %v9514_v45  ;;  %v9625_v42 = vcombine.high %v677_v63, %v685_v37  ;;  %v9627_v45 = vcombine.high %v678_v38, %v686_v39 }
 0x3bc   :  { %7404 = vmatprep.subr.bf16.mxu0 %v9529_v46  ;;  %7568 = vmatprep.subr.bf16.mxu1 %v9531_v47  ;;  %v693_v46 = vld [vmem:[#allocation2 + $0x11b0] sm:$0xff] }
 0x3bd   :  { %v701_v47 = vld [vmem:[#allocation2 + $0x11f0] sm:$0xff] }
 0x3be   :  { %v9641_v9 = vcombine.high %v693_v46, %v701_v47  ;;  %v9640_v58 = vcombine.low %v693_v46, %v701_v47 }
 0x3bf   :  { %7405 = vmatpush1.bf16.msra.mxu0 %v9528_v51  ;;  %7569 = vmatpush1.bf16.msra.mxu1 %v9530_v52  ;;  %v9643_v51 = vcombine.high %v694_v48, %v702_v49  ;;  %v709_v52 = vld [vmem:[#allocation2 + $0x1230] sm:$0xff] }
 0x3c0   :  { %7406 = vmatprep.subr.bf16.mxu0 %v9545_v16  ;;  %7570 = vmatprep.subr.bf16.mxu1 %v9547_v55  ;;  %v717_v16 = vld [vmem:[#allocation2 + $0x1270] sm:$0xff]  ;;  %v710_v55 = vld [vmem:[#allocation2 + $0x1238] sm:$0xff] }
 0x3c1   :  { %v9657_v60 = vcombine.high %v709_v52, %v717_v16  ;;  %v9656_v2 = vcombine.low %v709_v52, %v717_v16  ;;  %v9658_v3 = vcombine.low %v710_v55, %v718_v56 }
 0x3c3   :  { %7407 = vmatpush1.bf16.msra.mxu0 %v9544_v61  ;;  %7571 = vmatpush1.bf16.msra.mxu1 %v9546_v62  ;;  %v725_v61 = vld [vmem:[#allocation2 + $0x12b0] sm:$0xff] }
 0x3c4   :  { %7408 = vmatprep.subr.bf16.mxu0 %v9561_v0  ;;  %7572 = vmatprep.subr.bf16.mxu1 %v9563_v1  ;;  %v733_v62 = vld [vmem:[#allocation2 + $0x12f0] sm:$0xff]  ;;  %v726_v0 = vld [vmem:[#allocation2 + $0x12b8] sm:$0xff] }
 0x3c5   :  { %v734_v1 = vld [vmem:[#allocation2 + $0x12f8] sm:$0xff]  ;;  %v9673_v53 = vcombine.high %v725_v61, %v733_v62  ;;  %v9672_v13 = vcombine.low %v725_v61, %v733_v62 }
 0x3c6   :  { %v9675_v5 = vcombine.high %v726_v0, %v734_v1  ;;  %v9674_v25 = vcombine.low %v726_v0, %v734_v1 }
 0x3c7   :  { %7409 = vmatpush1.bf16.msra.mxu0 %v9560_v6  ;;  %7573 = vmatpush1.bf16.msra.mxu1 %v9562_v7  ;;  %v741_v6 = vld [vmem:[#allocation2 + $0x1330] sm:$0xff] }
 0x3c8   :  { %7410 = vmatprep.subr.bf16.mxu0 %v9577_v8  ;;  %7574 = vmatprep.subr.bf16.mxu1 %v9579_v12  ;;  %v749_v7 = vld [vmem:[#allocation2 + $0x1370] sm:$0xff]  ;;  %v742_v8 = vld [vmem:[#allocation2 + $0x1338] sm:$0xff] }
 0x3c9   :  { %v750_v12 = vld [vmem:[#allocation2 + $0x1378] sm:$0xff]  ;;  %v9689_v33 = vcombine.high %v741_v6, %v749_v7  ;;  %v9688_v26 = vcombine.low %v741_v6, %v749_v7 }
 0x3ca   :  { %v9691_v17 = vcombine.high %v742_v8, %v750_v12  ;;  %v9690_v29 = vcombine.low %v742_v8, %v750_v12 }
 0x3cb   :  { %7411 = vmatpush1.bf16.msra.mxu0 %v9576_v18  ;;  %7575 = vmatpush1.bf16.msra.mxu1 %v9578_v59  ;;  %v757_v18 = vld [vmem:[#allocation2 + $0x13b0] sm:$0xff] }
 0x3cc   :  { %7421 = vmatprep.subr.bf16.mxu0 %v9593_v22  ;;  %7585 = vmatprep.subr.bf16.mxu1 %v9595_v24  ;;  %v765_v59 = vld [vmem:[#allocation2 + $0x13f0] sm:$0xff]  ;;  %v758_v22 = vld [vmem:[#allocation2 + $0x13b8] sm:$0xff] }
 0x3cd   :  { %v766_v24 = vld [vmem:[#allocation2 + $0x13f8] sm:$0xff]  ;;  %v9705_v30 = vcombine.high %v757_v18, %v765_v59  ;;  %v9704_v63 = vcombine.low %v757_v18, %v765_v59 }
 0x3ce   :  { %7413 = vmatmul.mubr.bf16.vlgmr.msra.gmra.mrb[12].mxu0 %v10910_v43  ;;  %7577 = vmatmul.mubr.bf16.vlgmr.msra.gmra.mrb[12].mxu1 %v10910_v43  ;;  %v9626_v43 = vcombine.low %v678_v38, %v686_v39  ;;  %v9707_v36 = vcombine.high %v758_v22, %v766_v24  ;;  %v9706_v37 = vcombine.low %v758_v22, %v766_v24 }
 0x3cf   :  { %7422 = vmatpush1.bf16.msra.mxu0 %v9592_v32  ;;  %7586 = vmatpush1.bf16.msra.mxu1 %v9594_v34  ;;  %v773_v32 = vld [vmem:[#allocation2 + $0x1430] sm:$0xff] }
 0x3d0   :  { %7423 = vmatprep.subr.bf16.mxu0 %v9609_v57  ;;  %7587 = vmatprep.subr.bf16.mxu1 %v9611_v35  ;;  %v781_v34 = vld [vmem:[#allocation2 + $0x1470] sm:$0xff]  ;;  %v774_v57 = vld [vmem:[#allocation2 + $0x1438] sm:$0xff] }
 0x3d1   :  { %7453 = vmatprep.mubr.bf16.mxu0 %v10912_v54  ;;  %7617 = vmatprep.mubr.bf16.mxu1 %v10912_v54  ;;  %v9659_v54 = vcombine.high %v710_v55, %v718_v56  ;;  %v782_v35 = vld [vmem:[#allocation2 + $0x1478] sm:$0xff]  ;;  %v9721_v38 = vcombine.high %v773_v32, %v781_v34  ;;  %v9720_v46 = vcombine.low %v773_v32, %v781_v34 }
 0x3d2   :  { %v9723_v39 = vcombine.high %v774_v57, %v782_v35  ;;  %v9722_v47 = vcombine.low %v774_v57, %v782_v35 }
 0x3d3   :  { %7424 = vmatpush1.bf16.msra.mxu0 %v9608_v40  ;;  %7588 = vmatpush1.bf16.msra.mxu1 %v9610_v41  ;;  %v789_v40 = vld [vmem:[#allocation2 + $0x14b0] sm:$0xff] }
 0x3d4   :  { %7425 = vmatprep.subr.bf16.mxu0 %v9625_v42  ;;  %7589 = vmatprep.subr.bf16.mxu1 %v9627_v45  ;;  %v797_v41 = vld [vmem:[#allocation2 + $0x14f0] sm:$0xff]  ;;  %v790_v42 = vld [vmem:[#allocation2 + $0x14b8] sm:$0xff] }
 0x3d5   :  { %v798_v45 = vld [vmem:[#allocation2 + $0x14f8] sm:$0xff]  ;;  %v9737_v48 = vcombine.high %v789_v40, %v797_v41  ;;  %v9736_v52 = vcombine.low %v789_v40, %v797_v41 }
 0x3d6   :  { %v9739_v49 = vcombine.high %v790_v42, %v798_v45  ;;  %v9738_v16 = vcombine.low %v790_v42, %v798_v45 }
 0x3d7   :  { %7426 = vmatpush1.bf16.msra.mxu0 %v9624_v50  ;;  %7590 = vmatpush1.bf16.msra.mxu1 %v9626_v43  ;;  %v805_v50 = vld [vmem:[#allocation2 + $0x1530] sm:$0xff] }
 0x3d8   :  { %7427 = vmatprep.subr.bf16.mxu0 %v9641_v9  ;;  %7591 = vmatprep.subr.bf16.mxu1 %v9643_v51  ;;  %v813_v43 = vld [vmem:[#allocation2 + $0x1570] sm:$0xff]  ;;  %v806_v9 = vld [vmem:[#allocation2 + $0x1538] sm:$0xff] }
 0x3d9   :  { %v814_v51 = vld [vmem:[#allocation2 + $0x1578] sm:$0xff]  ;;  %v9753_v55 = vcombine.high %v805_v50, %v813_v43  ;;  %v9752_v61 = vcombine.low %v805_v50, %v813_v43 }
 0x3da   :  { %v9755_v56 = vcombine.high %v806_v9, %v814_v51  ;;  %v9754_v62 = vcombine.low %v806_v9, %v814_v51 }
 0x3db   :  { %7428 = vmatpush1.bf16.msra.mxu0 %v9640_v58  ;;  %7592 = vmatpush1.bf16.msra.mxu1 %v9642_v23  ;;  %v821_v58 = vld [vmem:[#allocation2 + $0x15b0] sm:$0xff] }
 0x3dc   :  { %7429 = vmatprep.subr.bf16.mxu0 %v9657_v60  ;;  %7593 = vmatprep.subr.bf16.mxu1 %v9659_v54  ;;  %v829_v23 = vld [vmem:[#allocation2 + $0x15f0] sm:$0xff]  ;;  %v822_v60 = vld [vmem:[#allocation2 + $0x15b8] sm:$0xff] }
 0x3dd   :  { %v830_v54 = vld [vmem:[#allocation2 + $0x15f8] sm:$0xff]  ;;  %v9769_v0 = vcombine.high %v821_v58, %v829_v23  ;;  %v9768_v6 = vcombine.low %v821_v58, %v829_v23 }
 0x3de   :  { %v9771_v1 = vcombine.high %v822_v60, %v830_v54  ;;  %v9770_v7 = vcombine.low %v822_v60, %v830_v54 }
 0x3df   :  { %7430 = vmatpush1.bf16.msra.mxu0 %v9656_v2  ;;  %7594 = vmatpush1.bf16.msra.mxu1 %v9658_v3  ;;  %v837_v2 = vld [vmem:[#allocation2 + $0x1630] sm:$0xff] }
 0x3e0   :  { %7431 = vmatprep.subr.bf16.mxu0 %v9673_v53  ;;  %7595 = vmatprep.subr.bf16.mxu1 %v9675_v5  ;;  %v845_v3 = vld [vmem:[#allocation2 + $0x1670] sm:$0xff]  ;;  %v838_v53 = vld [vmem:[#allocation2 + $0x1638] sm:$0xff] }
 0x3e1   :  { %v846_v5 = vld [vmem:[#allocation2 + $0x1678] sm:$0xff]  ;;  %v9785_v8 = vcombine.high %v837_v2, %v845_v3  ;;  %v9784_v18 = vcombine.low %v837_v2, %v845_v3 }
 0x3e2   :  { %v9787_v12 = vcombine.high %v838_v53, %v846_v5  ;;  %v9786_v59 = vcombine.low %v838_v53, %v846_v5 }
 0x3e3   :  { %7432 = vmatpush1.bf16.msra.mxu0 %v9672_v13  ;;  %7596 = vmatpush1.bf16.msra.mxu1 %v9674_v25  ;;  %v853_v13 = vld [vmem:[#allocation2 + $0x16b0] sm:$0xff] }
 0x3e4   :  { %7433 = vmatprep.subr.bf16.mxu0 %v9689_v33  ;;  %7597 = vmatprep.subr.bf16.mxu1 %v9691_v17  ;;  %v861_v25 = vld [vmem:[#allocation2 + $0x16f0] sm:$0xff]  ;;  %v854_v33 = vld [vmem:[#allocation2 + $0x16b8] sm:$0xff] }
 0x3e5   :  { %v862_v17 = vld [vmem:[#allocation2 + $0x16f8] sm:$0xff]  ;;  %v9801_v22 = vcombine.high %v853_v13, %v861_v25  ;;  %v9800_v32 = vcombine.low %v853_v13, %v861_v25 }
 0x3e6   :  { %v9803_v24 = vcombine.high %v854_v33, %v862_v17  ;;  %v9802_v34 = vcombine.low %v854_v33, %v862_v17  ;;  %v965_v17 = vld [vmem:[#allocation2 + $0x1a30] sm:$0xff] }
 0x3e7   :  { %7434 = vmatpush1.bf16.msra.mxu0 %v9688_v26  ;;  %7598 = vmatpush1.bf16.msra.mxu1 %v9690_v29  ;;  %v869_v26 = vld [vmem:[#allocation2 + $0x1730] sm:$0xff] }
 0x3e8   :  { %7435 = vmatprep.subr.bf16.mxu0 %v9705_v30  ;;  %7599 = vmatprep.subr.bf16.mxu1 %v9707_v36  ;;  %v877_v29 = vld [vmem:[#allocation2 + $0x1770] sm:$0xff]  ;;  %v870_v30 = vld [vmem:[#allocation2 + $0x1738] sm:$0xff] }
 0x3e9   :  { %v878_v36 = vld [vmem:[#allocation2 + $0x1778] sm:$0xff]  ;;  %v9817_v57 = vcombine.high %v869_v26, %v877_v29  ;;  %v9816_v40 = vcombine.low %v869_v26, %v877_v29 }
 0x3ea   :  { %v9819_v35 = vcombine.high %v870_v30, %v878_v36  ;;  %v9818_v41 = vcombine.low %v870_v30, %v878_v36  ;;  %v981_v30 = vld [vmem:[#allocation2 + $0x1ab0] sm:$0xff] }
 0x3eb   :  { %7436 = vmatpush1.bf16.msra.mxu0 %v9704_v63  ;;  %7600 = vmatpush1.bf16.msra.mxu1 %v9706_v37  ;;  %v885_v63 = vld [vmem:[#allocation2 + $0x17b0] sm:$0xff] }
 0x3ec   :  { %7437 = vmatprep.subr.bf16.mxu0 %v9721_v38  ;;  %7601 = vmatprep.subr.bf16.mxu1 %v9723_v39  ;;  %v893_v37 = vld [vmem:[#allocation2 + $0x17f0] sm:$0xff]  ;;  %v886_v38 = vld [vmem:[#allocation2 + $0x17b8] sm:$0xff] }
 0x3ed   :  { %v894_v39 = vld [vmem:[#allocation2 + $0x17f8] sm:$0xff]  ;;  %v9833_v42 = vcombine.high %v885_v63, %v893_v37  ;;  %v9832_v50 = vcombine.low %v885_v63, %v893_v37  ;;  %v989_v36 = vld [vmem:[#allocation2 + $0x1af0] sm:$0xff]  ;;  %v1157_v63 = vsub.s32 0, %v10860_v44 }
 0x3ee   :  { %v9835_v45 = vcombine.high %v886_v38, %v894_v39  ;;  %v9834_v43 = vcombine.low %v886_v38, %v894_v39  ;;  %v9929_v38 = vcombine.high %v981_v30, %v989_v36  ;;  %v1165_v39 = vsub.s32 2, %v10860_v44 }
 0x3ef   :  { %7438 = vmatpush1.bf16.msra.mxu0 %v9720_v46  ;;  %7602 = vmatpush1.bf16.msra.mxu1 %v9722_v47  ;;  %v901_v46 = vld [vmem:[#allocation2 + $0x1830] sm:$0xff] }
 0x3f0   :  { %7439 = vmatprep.subr.bf16.mxu0 %v9737_v48  ;;  %7603 = vmatprep.subr.bf16.mxu1 %v9739_v49  ;;  %v909_v47 = vld [vmem:[#allocation2 + $0x1870] sm:$0xff]  ;;  %v902_v48 = vld [vmem:[#allocation2 + $0x1838] sm:$0xff] }
 0x3f1   :  { %v910_v49 = vld [vmem:[#allocation2 + $0x1878] sm:$0xff]  ;;  %v9849_v9 = vcombine.high %v901_v46, %v909_v47  ;;  %v9848_v58 = vcombine.low %v901_v46, %v909_v47  ;;  %v1169_v46 = vsub.s32 3, %v10860_v44 }
 0x3f2   :  { %v9851_v51 = vcombine.high %v902_v48, %v910_v49  ;;  %v9850_v23 = vcombine.low %v902_v48, %v910_v49  ;;  %v998_v48 = vld [vmem:[#allocation2 + $0x1b38] sm:$0xff] }
 0x3f3   :  { %7440 = vmatpush1.bf16.msra.mxu0 %v9736_v52  ;;  %7604 = vmatpush1.bf16.msra.mxu1 %v9738_v16  ;;  %v917_v52 = vld [vmem:[#allocation2 + $0x18b0] sm:$0xff]  ;;  %v1006_v49 = vld [vmem:[#allocation2 + $0x1b78] sm:$0xff] }
 0x3f4   :  { %7441 = vmatprep.subr.bf16.mxu0 %v9753_v55  ;;  %7605 = vmatprep.subr.bf16.mxu1 %v9755_v56  ;;  %v925_v16 = vld [vmem:[#allocation2 + $0x18f0] sm:$0xff]  ;;  %v918_v55 = vld [vmem:[#allocation2 + $0x18b8] sm:$0xff] }
 0x3f5   :  { %v926_v56 = vld [vmem:[#allocation2 + $0x18f8] sm:$0xff]  ;;  %v9865_v60 = vcombine.high %v917_v52, %v925_v16  ;;  %v9864_v2 = vcombine.low %v917_v52, %v925_v16 }
 0x3f6   :  { %v9867_v54 = vcombine.high %v918_v55, %v926_v56  ;;  %v9866_v3 = vcombine.low %v918_v55, %v926_v56  ;;  %v9947_v56 = vcombine.high %v998_v48, %v1006_v49 }
 0x3f7   :  { %7442 = vmatpush1.bf16.msra.mxu0 %v9752_v61  ;;  %7606 = vmatpush1.bf16.msra.mxu1 %v9754_v62  ;;  %v933_v61 = vld [vmem:[#allocation2 + $0x1930] sm:$0xff] }
 0x3f8   :  { %7443 = vmatprep.subr.bf16.mxu0 %v9769_v0  ;;  %7607 = vmatprep.subr.bf16.mxu1 %v9771_v1  ;;  %v941_v62 = vld [vmem:[#allocation2 + $0x1970] sm:$0xff]  ;;  %v934_v0 = vld [vmem:[#allocation2 + $0x1938] sm:$0xff] }
 0x3f9   :  { %v942_v1 = vld [vmem:[#allocation2 + $0x1978] sm:$0xff]  ;;  %v9881_v53 = vcombine.high %v933_v61, %v941_v62  ;;  %v9880_v13 = vcombine.low %v933_v61, %v941_v62 }
 0x3fa   :  { %v9883_v5 = vcombine.high %v934_v0, %v942_v1  ;;  %v1014_v62 = vld [vmem:[#allocation2 + $0x1bb8] sm:$0xff] }
 0x3fb   :  { %7444 = vmatpush1.bf16.msra.mxu0 %v9768_v6  ;;  %7608 = vmatpush1.bf16.msra.mxu1 %v9770_v7  ;;  %v949_v6 = vld [vmem:[#allocation2 + $0x19b0] sm:$0xff] }
 0x3fc   :  { %7445 = vmatprep.subr.bf16.mxu0 %v9785_v8  ;;  %7609 = vmatprep.subr.bf16.mxu1 %v9787_v12  ;;  %v957_v7 = vld [vmem:[#allocation2 + $0x19f0] sm:$0xff]  ;;  %v950_v8 = vld [vmem:[#allocation2 + $0x19b8] sm:$0xff] }
 0x3fd   :  { %v958_v12 = vld [vmem:[#allocation2 + $0x19f8] sm:$0xff]  ;;  %v9897_v25 = vcombine.high %v949_v6, %v957_v7 }
 0x3fe   :  { %v9899_v33 = vcombine.high %v950_v8, %v958_v12  ;;  %v9898_v26 = vcombine.low %v950_v8, %v958_v12  ;;  %v9946_v12 = vcombine.low %v998_v48, %v1006_v49 }
 0x3ff   :  { %7446 = vmatpush1.bf16.msra.mxu0 %v9784_v18  ;;  %7610 = vmatpush1.bf16.msra.mxu1 %v9786_v59  ;;  %v973_v18 = vld [vmem:[#allocation2 + $0x1a70] sm:$0xff]  ;;  %v966_v59 = vld [vmem:[#allocation2 + $0x1a38] sm:$0xff] }
 0x400   :  { %7447 = vmatprep.subr.bf16.mxu0 %v9801_v22  ;;  %7611 = vmatprep.subr.bf16.mxu1 %v9803_v24  ;;  %v974_v22 = vld [vmem:[#allocation2 + $0x1a78] sm:$0xff]  ;;  %v9896_v24 = vcombine.low %v949_v6, %v957_v7  ;;  %v9913_v29 = vcombine.high %v965_v17, %v973_v18 }
 0x401   :  { %v9914_v37 = vcombine.low %v966_v59, %v974_v22 }
 0x403   :  { %7448 = vmatpush1.bf16.msra.mxu0 %v9800_v32  ;;  %7612 = vmatpush1.bf16.msra.mxu1 %v9802_v34  ;;  %v982_v32 = vld [vmem:[#allocation2 + $0x1ab8] sm:$0xff] }
 0x404   :  { %7449 = vmatprep.subr.bf16.mxu0 %v9817_v57  ;;  %7613 = vmatprep.subr.bf16.mxu1 %v9819_v35  ;;  %v990_v34 = vld [vmem:[#allocation2 + $0x1af8] sm:$0xff]  ;;  %v9912_v57 = vcombine.low %v965_v17, %v973_v18  ;;  %v11003_v35 = vld [vmem:[#allocation5 + $0x8] sm:$0xff]  ;;  %v1037_v17 = vld [vmem:[#allocation2 + $0x1c70] sm:$0xff] }
 0x405   :  { %v1190_v47 = vrot.slane %v11003_v35, %v1157_v63  ;;  %v9930_v52 = vcombine.low %v982_v32, %v990_v34  ;;  %v1030_v18 = vld [vmem:[#allocation2 + $0x1c38] sm:$0xff] }
 0x407   :  { %7450 = vmatpush1.bf16.msra.mxu0 %v9816_v40  ;;  %7614 = vmatpush1.bf16.msra.mxu1 %v9818_v41  ;;  %v1161_v40 = vsub.s32 1, %v10860_v44  ;;  %v9931_v41 = vcombine.high %v982_v32, %v990_v34  ;;  %v1054_v32 = vld [vmem:[#allocation2 + $0x1cf8] sm:$0xff] }
 0x408   :  { %7451 = vmatprep.subr.bf16.mxu0 %v9833_v42  ;;  %7615 = vmatprep.subr.bf16.mxu1 %v9835_v45  ;;  %v997_v42 = vld [vmem:[#allocation2 + $0x1b30] sm:$0xff] }
 0x409   :  { %v1005_v45 = vld [vmem:[#allocation2 + $0x1b70] sm:$0xff] }
 0x40a   :  { %v9945_v16 = vcombine.high %v997_v42, %v1005_v45 }
 0x40b   :  { %7452 = vmatpush1.bf16.msra.mxu0 %v9832_v50  ;;  %7616 = vmatpush1.bf16.msra.mxu1 %v9834_v43  ;;  %v1198_v50 = vrot.slane %v11003_v35, %v1165_v39  ;;  %v1194_v43 = vrot.slane %v11003_v35, %v1161_v40 }
 0x40c   :  { %7462 = vmatprep.subr.bf16.mxu0 %v9849_v9  ;;  %7626 = vmatprep.subr.bf16.mxu1 %v9851_v51  ;;  %v9928_v9 = vcombine.low %v981_v30, %v989_v36  ;;  %v1202_v51 = vrot.slane %v11003_v35, %v1169_v46  ;;  %v1053_v30 = vld [vmem:[#allocation2 + $0x1cf0] sm:$0xff]  ;;  %v1046_v36 = vld [vmem:[#allocation2 + $0x1cb8] sm:$0xff] }
 0x40d   :  { %v9994_v49 = vcombine.low %v1046_v36, %v1054_v32 }
 0x40e   :  { %7454 = vmatmul.mubr.bf16.vlgmr.msra.gmra.mrb[12].mxu0 %v10927_v4  ;;  %7618 = vmatmul.mubr.bf16.vlgmr.msra.gmra.mrb[12].mxu1 %v10927_v4  ;;  %v9882_v4 = vcombine.low %v934_v0, %v942_v1  ;;  %v1022_v0 = vld [vmem:[#allocation2 + $0x1bf8] sm:$0xff] }
 0x40f   :  { %7463 = vmatpush1.bf16.msra.mxu0 %v9848_v58  ;;  %7627 = vmatpush1.bf16.msra.mxu1 %v9850_v23  ;;  %v1013_v58 = vld [vmem:[#allocation2 + $0x1bb0] sm:$0xff] }
 0x410   :  { %7464 = vmatprep.subr.bf16.mxu0 %v9865_v60  ;;  %7628 = vmatprep.subr.bf16.mxu1 %v9867_v54  ;;  %v1021_v23 = vld [vmem:[#allocation2 + $0x1bf0] sm:$0xff] }
 0x411   :  { %7494 = vmatprep.mubr.bf16.mxu0 %v10929_v11  ;;  %7658 = vmatprep.mubr.bf16.mxu1 %v10929_v11  ;;  %v9915_v11 = vcombine.high %v966_v59, %v974_v22  ;;  %v1038_v59 = vld [vmem:[#allocation2 + $0x1c78] sm:$0xff]  ;;  %v9960_v22 = vcombine.low %v1013_v58, %v1021_v23 }
 0x413   :  { %7465 = vmatpush1.bf16.msra.mxu0 %v9864_v2  ;;  %7629 = vmatpush1.bf16.msra.mxu1 %v9866_v3 }
 0x414   :  { %7466 = vmatprep.subr.bf16.mxu0 %v9881_v53  ;;  %7630 = vmatprep.subr.bf16.mxu1 %v9883_v5  ;;  %v9944_v5 = vcombine.low %v997_v42, %v1005_v45  ;;  %v1069_v42 = vld [vmem:[#allocation2 + $0x1d70] sm:$0xff]  ;;  %v1062_v45 = vld [vmem:[#allocation2 + $0x1d38] sm:$0xff] }
 0x417   :  { %7467 = vmatpush1.bf16.msra.mxu0 %v9880_v13  ;;  %7631 = vmatpush1.bf16.msra.mxu1 %v9882_v4  ;;  %v9961_v13 = vcombine.high %v1013_v58, %v1021_v23 }
 0x418   :  { %7468 = vmatprep.subr.bf16.mxu0 %v9897_v25  ;;  %7632 = vmatprep.subr.bf16.mxu1 %v9899_v33  ;;  %v9963_v25 = vcombine.high %v1014_v62, %v1022_v0  ;;  %v1029_v33 = vld [vmem:[#allocation2 + $0x1c30] sm:$0xff] }
 0x419   :  { %v9976_v34 = vcombine.low %v1029_v33, %v1037_v17 }
 0x41b   :  { %7469 = vmatpush1.bf16.msra.mxu0 %v9896_v24  ;;  %7633 = vmatpush1.bf16.msra.mxu1 %v9898_v26  ;;  %v9962_v24 = vcombine.low %v1014_v62, %v1022_v0  ;;  %v9977_v26 = vcombine.high %v1029_v33, %v1037_v17  ;;  %v1094_v62 = vld [vmem:[#allocation2 + $0x1e38] sm:$0xff] }
 0x41c   :  { %7470 = vmatprep.subr.bf16.mxu0 %v9913_v29  ;;  %7634 = vmatprep.subr.bf16.mxu1 %v9915_v11  ;;  %v9979_v29 = vcombine.high %v1030_v18, %v1038_v59  ;;  %v1045_v11 = vld [vmem:[#allocation2 + $0x1cb0] sm:$0xff]  ;;  %v1102_v0 = vld [vmem:[#allocation2 + $0x1e78] sm:$0xff] }
 0x41d   :  { %v9992_v48 = vcombine.low %v1045_v11, %v1053_v30  ;;  %v10042_v33 = vcombine.low %v1094_v62, %v1102_v0 }
 0x41f   :  { %7471 = vmatpush1.bf16.msra.mxu0 %v9912_v57  ;;  %7635 = vmatpush1.bf16.msra.mxu1 %v9914_v37  ;;  %v9978_v57 = vcombine.low %v1030_v18, %v1038_v59  ;;  %v9993_v37 = vcombine.high %v1045_v11, %v1053_v30  ;;  %v1125_v59 = vld [vmem:[#allocation2 + $0x1f30] sm:$0xff] }
 0x420   :  { %7472 = vmatprep.subr.bf16.mxu0 %v9929_v38  ;;  %7636 = vmatprep.subr.bf16.mxu1 %v9931_v41  ;;  %v9995_v38 = vcombine.high %v1046_v36, %v1054_v32  ;;  %v1061_v41 = vld [vmem:[#allocation2 + $0x1d30] sm:$0xff] }
 0x421   :  { %v7168_v55 = vpop.f32.mrb[8].mxu0  ;;  %v7332_v54 = vpop.f32.mrb[8].mxu1 }
 0x422   :  { %v11021_v60 = vadd.f32 %v7168_v55, %v1190_v47  ;;  %v7170_v61 = vpop.f32.mrb[9].mxu0  ;;  %v11023_v1 = vadd.f32 %v7332_v54, %v1198_v50  ;;  %v7334_v3 = vpop.f32.mrb[9].mxu1  ;;  %v1070_v47 = vld [vmem:[#allocation2 + $0x1d78] sm:$0xff]  ;;  %v10009_v50 = vcombine.high %v1061_v41, %v1069_v42  ;;  %v10008_v55 = vcombine.low %v1061_v41, %v1069_v42  ;;  %v1093_v54 = vld [vmem:[#allocation2 + $0x1e30] sm:$0xff] }
 0x423   :  { %v11025_v2 = vadd.f32 %v7170_v61, %v1194_v43  ;;  %v7172_v53 = vpop.f32.mrb[10].mxu0  ;;  %7473 = vmatpush1.bf16.msra.mxu0 %v9928_v9  ;;  %v11027_v6 = vadd.f32 %v7334_v3, %v1202_v51  ;;  %v7336_v7 = vpop.f32.mrb[10].mxu1  ;;  %7637 = vmatpush1.bf16.msra.mxu1 %v9930_v52  ;;  %v10011_v43 = vcombine.high %v1062_v45, %v1070_v47  ;;  %v1077_v9 = vld [vmem:[#allocation2 + $0x1db0] sm:$0xff]  ;;  %v1078_v52 = vld [vmem:[#allocation2 + $0x1db8] sm:$0xff] }
 0x424   :  { %v7173_v8 = vpop.f32.mrb[11].mxu0  ;;  %7474 = vmatprep.subr.bf16.mxu0 %v9945_v16  ;;  %v7337_v4 = vpop.f32.mrb[11].mxu1  ;;  %7638 = vmatprep.subr.bf16.mxu1 %v9947_v56  ;;  %v1085_v51 = vld [vmem:[#allocation2 + $0x1df0] sm:$0xff]  ;;  %v1086_v16 = vld [vmem:[#allocation2 + $0x1df8] sm:$0xff]  ;;  %v10010_v56 = vcombine.low %v1062_v45, %v1070_v47  ;;  %v10043_v7 = vcombine.high %v1094_v62, %v1102_v0  ;;  %v10528_v62 = vld [vmem:[#allocation7 + $0x50] sm:$0xff]  }
 0x425   :  { %v10025_v58 = vcombine.high %v1077_v9, %v1085_v51  ;;  %v10027_v23 = vcombine.high %v1078_v52, %v1086_v16  ;;  %v1101_v61 = vld [vmem:[#allocation2 + $0x1e70] sm:$0xff]  ;;  %v10024_v3 = vcombine.low %v1077_v9, %v1085_v51  ;;  %v10026_v53 = vcombine.low %v1078_v52, %v1086_v16  ;;  %v1118_v4 = vld [vmem:[#allocation2 + $0x1ef8] sm:$0xff]  ;;  %v10529_v0 = vld [vmem:[#allocation7 + $0xd0] sm:$0xff]  }
 0x426   :  { %v1109_v8 = vld [vmem:[#allocation2 + $0x1eb0] sm:$0xff]  ;;  %v1150_v41 = vld [vmem:[#allocation2 + $0x1ff8] sm:$0xff] }
 0x427   :  { %7475 = vmatpush1.bf16.msra.mxu0 %v9944_v5  ;;  %7639 = vmatpush1.bf16.msra.mxu1 %v9946_v12  ;;  %v10041_v5 = vcombine.high %v1093_v54, %v1101_v61  ;;  %v1117_v12 = vld [vmem:[#allocation2 + $0x1ef0] sm:$0xff] }
 0x428   :  { %7476 = vmatprep.subr.bf16.mxu0 %v9961_v13  ;;  %7640 = vmatprep.subr.bf16.mxu1 %v9963_v25  ;;  %v1110_v13 = vld [vmem:[#allocation2 + $0x1eb8] sm:$0xff]  ;;  %v10040_v25 = vcombine.low %v1093_v54, %v1101_v61  ;;  %v10057_v17 = vcombine.high %v1109_v8, %v1117_v12  ;;  %v10056_v11 = vcombine.low %v1109_v8, %v1117_v12  ;;  %v10520_v51 = vld [vmem:[#allocation7 + $0x40] sm:$0xff]   ;;  %v10535_v8 = vld [vmem:[#allocation7 + $0x98] sm:$0xff]  }
 0x429   :  { %v10059_v18 = vcombine.high %v1110_v13, %v1118_v4  ;;  %v10058_v30 = vcombine.low %v1110_v13, %v1118_v4  ;;  %v10526_v54 = vld [vmem:[#allocation7 + $0x8] sm:$0xff]   ;;  %v10536_v12 = vld [vmem:[#allocation7 + $0x60] sm:$0xff]  }
 0x42a   :  { %v10527_v61 = vld [vmem:[#allocation7 + $0x88] sm:$0xff]   ;;  %v10537_v13 = vld [vmem:[#allocation7 + $0xe0] sm:$0xff]  }
 0x42b   :  { %7477 = vmatpush1.bf16.msra.mxu0 %v9960_v22  ;;  %7641 = vmatpush1.bf16.msra.mxu1 %v9962_v24  ;;  %v1133_v22 = vld [vmem:[#allocation2 + $0x1f70] sm:$0xff]  ;;  %v1126_v24 = vld [vmem:[#allocation2 + $0x1f38] sm:$0xff] }
 0x42c   :  { %7478 = vmatprep.subr.bf16.mxu0 %v9977_v26  ;;  %7642 = vmatprep.subr.bf16.mxu1 %v9979_v29  ;;  %v1134_v26 = vld [vmem:[#allocation2 + $0x1f78] sm:$0xff]  ;;  %v11029_v29 = vld [vmem:[#allocation5] sm:$0xff]  ;;  %v10073_v36 = vcombine.high %v1125_v59, %v1133_v22  ;;  %v10072_v45 = vcombine.low %v1125_v59, %v1133_v22  ;;  %v10538_v4 = vld [vmem:[#allocation7 + $0x20] sm:$0xff]   ;;  %v1185_v59 = vsub.s32 7, %v10860_v44 }
 0x42d   :  { %v10075_v32 = vcombine.high %v1126_v24, %v1134_v26  ;;  %v1170_v42 = vrot.slane %v11029_v29, %v1169_v46  ;;  %v10074_v47 = vcombine.low %v1126_v24, %v1134_v26  ;;  %v10521_v46 = vld [vmem:[#allocation7 + $0xc0] sm:$0xff]   ;;  %v10542_v22 = vld [vmem:[#allocation7 + $0x28] sm:$0xff]   ;;  %v1158_v24 = vrot.slane %v11029_v29, %v1157_v63  ;;  %v10546_v63 = vld [vmem:[#allocation7 + $0x30] sm:$0xff]  }
 0x42e   :  { %v10543_v26 = vld [vmem:[#allocation7 + $0xa8] sm:$0xff]  }
 0x42f   :  { %7479 = vmatpush1.bf16.msra.mxu0 %v9976_v34  ;;  %7643 = vmatpush1.bf16.msra.mxu1 %v9978_v57  ;;  %v1141_v34 = vld [vmem:[#allocation2 + $0x1fb0] sm:$0xff] }
 0x430   :  { %7480 = vmatprep.subr.bf16.mxu0 %v9993_v37  ;;  %7644 = vmatprep.subr.bf16.mxu1 %v9995_v38  ;;  %v1149_v57 = vld [vmem:[#allocation2 + $0x1ff0] sm:$0xff]  ;;  %v1162_v37 = vrot.slane %v11029_v29, %v1161_v40  ;;  %v1142_v38 = vld [vmem:[#allocation2 + $0x1fb8] sm:$0xff] }
 0x431   :  { %v10088_v40 = vcombine.low %v1141_v34, %v1149_v57  ;;  %v10090_v9 = vcombine.low %v1142_v38, %v1150_v41 }
 0x433   :  { %7481 = vmatpush1.bf16.msra.mxu0 %v9992_v48  ;;  %7645 = vmatpush1.bf16.msra.mxu1 %v9994_v49  ;;  %v10089_v48 = vcombine.high %v1141_v34, %v1149_v57  ;;  %v10091_v49 = vcombine.high %v1142_v38, %v1150_v41  ;;  %v1186_v34 = vrot.slane %v11029_v29, %v1185_v59  ;;  %v10548_v38 = vld [vmem:[#allocation7 + $0x78] sm:$0xff]  }
 0x434   :  { %7482 = vmatprep.subr.bf16.mxu0 %v10009_v50  ;;  %7646 = vmatprep.subr.bf16.mxu1 %v10011_v43  ;;  %v10398_v50 = vadd.f32 %v10959_v15, %v1162_v37  ;;  %v10400_v43 = vadd.f32 %v10961_v19, %v1170_v42  ;;  %v10525_v19 = vld [vmem:[#allocation7 + $0xc8] sm:$0xff]   ;;  %v10397_v57 = vadd.f32 %v10955_v10, %v1158_v24  ;;  %v10547_v37 = vld [vmem:[#allocation7 + $0xb0] sm:$0xff]   ;;  %v10549_v41 = vld [vmem:[#allocation7 + $0xf8] sm:$0xff]  }
 0x436   :  { %v7668_v52 = vmax.f32 %v10398_v50, 0.0  ;;  %v7670_v16 = vmax.f32 %v10400_v43, 0.0  ;;  %v10552_v50 = vld [vmem:[#allocation7 + $0x140] sm:$0xff]  }
 0x437   :  { %7483 = vmatpush1.bf16.msra.mxu0 %v10008_v55  ;;  %7647 = vmatpush1.bf16.msra.mxu1 %v10010_v56  ;;  %v10522_v55 = vld [vmem:[#allocation7] sm:$0xff]  }
 0x438   :  { %7484 = vmatprep.subr.bf16.mxu0 %v10025_v58  ;;  %7648 = vmatprep.subr.bf16.mxu1 %v10027_v23  ;;  %v10523_v56 = vld [vmem:[#allocation7 + $0x80] sm:$0xff]   ;;  %v10524_v58 = vld [vmem:[#allocation7 + $0x48] sm:$0xff]   ;;  %v7684_v15 = vpack.c.bf16 %v7668_v52, %v7668_v52  ;;  %v7686_v23 = vpack.c.bf16 %v7670_v16, %v7670_v16 }
 0x439   :  { %v10553_v43 = vld [vmem:[#allocation7 + $0x1c0] sm:$0xff]   ;;  %v10557_v16 = vld [vmem:[#allocation7 + $0x1c8] sm:$0xff]  }
 0x43b   :  { %7485 = vmatpush1.bf16.msra.mxu0 %v10024_v3  ;;  %7649 = vmatpush1.bf16.msra.mxu1 %v10026_v53  ;;  %v10530_v3 = vld [vmem:[#allocation7 + $0x10] sm:$0xff]  }
 0x43c   :  { %7486 = vmatprep.subr.bf16.mxu0 %v10041_v5  ;;  %7650 = vmatprep.subr.bf16.mxu1 %v10043_v7  ;;  %v10531_v53 = vld [vmem:[#allocation7 + $0x90] sm:$0xff]   ;;  %v10532_v5 = vld [vmem:[#allocation7 + $0x58] sm:$0xff]  }
 0x43d   :  { %v10533_v7 = vld [vmem:[#allocation7 + $0xd8] sm:$0xff]  }
 0x43f   :  { %7487 = vmatpush1.bf16.msra.mxu0 %v10040_v25  ;;  %7651 = vmatpush1.bf16.msra.mxu1 %v10042_v33  ;;  %v10539_v25 = vld [vmem:[#allocation7 + $0xa0] sm:$0xff]   ;;  %v10540_v33 = vld [vmem:[#allocation7 + $0x68] sm:$0xff]  }
 0x440   :  { %7488 = vmatprep.subr.bf16.mxu0 %v10057_v17  ;;  %7652 = vmatprep.subr.bf16.mxu1 %v10059_v18  ;;  %v10541_v17 = vld [vmem:[#allocation7 + $0xe8] sm:$0xff]   ;;  %v1177_v18 = vsub.s32 5, %v10860_v44 }
 0x443   :  { %7489 = vmatpush1.bf16.msra.mxu0 %v10056_v11  ;;  %7653 = vmatpush1.bf16.msra.mxu1 %v10058_v30  ;;  %v10544_v11 = vld [vmem:[#allocation7 + $0x70] sm:$0xff]   ;;  %v1166_v30 = vrot.slane %v11029_v29, %v1165_v39 }
 0x444   :  { %7490 = vmatprep.subr.bf16.mxu0 %v10073_v36  ;;  %7654 = vmatprep.subr.bf16.mxu1 %v10075_v32  ;;  %v10545_v36 = vld [vmem:[#allocation7 + $0xf0] sm:$0xff]   ;;  %v1178_v32 = vrot.slane %v11029_v29, %v1177_v18 }
 0x445   :  { %v10399_v39 = vadd.f32 %v10957_v14, %v1166_v30  ;;  %v10554_v14 = vld [vmem:[#allocation7 + $0x100] sm:$0xff]  }
 0x446   :  { %v10402_v42 = vadd.f32 %v10983_v28, %v1178_v32  ;;  %v10555_v28 = vld [vmem:[#allocation7 + $0x180] sm:$0xff]   ;;  %v10580_v32 = vld [vmem:[#allocation7 + $0x178] sm:$0xff]  }
 0x447   :  { %7491 = vmatpush1.bf16.msra.mxu0 %v10072_v45  ;;  %7655 = vmatpush1.bf16.msra.mxu1 %v10074_v47  ;;  %v10404_v45 = vadd.f32 %v10985_v31, %v1186_v34  ;;  %v10550_v47 = vld [vmem:[#allocation7 + $0x38] sm:$0xff]   ;;  %v7669_v10 = vmax.f32 %v10399_v39, 0.0  ;;  %v10556_v31 = vld [vmem:[#allocation7 + $0x148] sm:$0xff]  }
 0x448   :  { %7492 = vmatprep.subr.bf16.mxu0 %v10089_v48  ;;  %7656 = vmatprep.subr.bf16.mxu1 %v10091_v49  ;;  %v7667_v48 = vmax.f32 %v10397_v57, 0.0  ;;  %v10551_v49 = vld [vmem:[#allocation7 + $0xb8] sm:$0xff]  }
 0x449   :  { %v10582_v57 = vld [vmem:[#allocation7 + $0x138] sm:$0xff]  }
 0x44b   :  { %7493 = vmatpush1.bf16.msra.mxu0 %v10088_v40  ;;  %7657 = vmatpush1.bf16.msra.mxu1 %v10090_v9  ;;  %v7672_v40 = vmax.f32 %v10402_v42, 0.0  ;;  %v7674_v9 = vmax.f32 %v10404_v45, 0.0  ;;  %v7678_v42 = vmax.f32 %v11027_v6, 0.0  ;;  %v10586_v45 = vld [vmem:[#allocation7 + $0x200] sm:$0xff]   ;;  %v10592_v6 = vld [vmem:[#allocation7 + $0x250] sm:$0xff]  }
 0x44c   :  { %10221 = vmatprep.subr.bf16.mxu0 %v10520_v51  ;;  %10243 = vmatprep.subr.bf16.mxu1 %v10521_v46  ;;  %v7683_v51 = vpack.c.bf16 %v7667_v48, %v7667_v48  ;;  %v7685_v46 = vpack.c.bf16 %v7669_v10, %v7669_v10  ;;  %v10589_v10 = vld [vmem:[#allocation7 + $0x2c8] sm:$0xff]  }
 0x44d   :  { %v7688_v52 = vpack.c.bf16 %v7672_v40, %v7672_v40  ;;  %v10590_v40 = vld [vmem:[#allocation7 + $0x208] sm:$0xff]  }
 0x44e   :  { %7495 = vmatmul.mubr.bf16.vlgmr.msra.gmra.mrb[12].mxu0 %v10937_v21  ;;  %7659 = vmatmul.mubr.bf16.vlgmr.msra.gmra.mrb[12].mxu1 %v10937_v21  ;;  %v10534_v21 = vld [vmem:[#allocation7 + $0x18] sm:$0xff]  }
 0x44f   :  { %10222 = vmatpush3.bf16.msra.mxu0 %v10522_v55  ;;  %8762 = vmatprep.mubr.bf16.mxu0 %v7684_v15  ;;  %v7690_v55 = vpack.c.bf16 %v7674_v9, %v7674_v9  ;;  %v10560_v15 = vld [vmem:[#allocation7 + $0x150] sm:$0xff]  }
 0x450   :  { %10244 = vmatpush3.bf16.msra.mxu1 %v10523_v56  ;;  %8802 = vmatprep.mubr.bf16.mxu1 %v7686_v23  ;;  %v10558_v56 = vld [vmem:[#allocation7 + $0x108] sm:$0xff]   ;;  %v10562_v23 = vld [vmem:[#allocation7 + $0x110] sm:$0xff]  }
 0x451   :  { %10223 = vmatprep.subr.bf16.mxu0 %v10524_v58  ;;  %10245 = vmatprep.subr.bf16.mxu1 %v10525_v19  ;;  %v10559_v58 = vld [vmem:[#allocation7 + $0x188] sm:$0xff]   ;;  %v10561_v19 = vld [vmem:[#allocation7 + $0x1d0] sm:$0xff]  }
 0x452   :  { %v10593_v9 = vld [vmem:[#allocation7 + $0x2d0] sm:$0xff]  }
 0x453   :  { %10224 = vmatpush3.bf16.msra.mxu0 %v10526_v54  ;;  %v10563_v54 = vld [vmem:[#allocation7 + $0x190] sm:$0xff]  }
 0x454   :  { %10246 = vmatpush3.bf16.msra.mxu1 %v10527_v61  ;;  %10225 = vmatprep.subr.bf16.mxu0 %v10528_v62  ;;  %v10564_v61 = vld [vmem:[#allocation7 + $0x158] sm:$0xff]  }
 0x455   :  { %10247 = vmatprep.subr.bf16.mxu1 %v10529_v0  ;;  %v10565_v62 = vld [vmem:[#allocation7 + $0x1d8] sm:$0xff]  }
 0x456   :  { %v10566_v0 = vld [vmem:[#allocation7 + $0x118] sm:$0xff]  }
 0x457   :  { %10226 = vmatpush3.bf16.msra.mxu0 %v10530_v3  ;;  %v10567_v3 = vld [vmem:[#allocation7 + $0x198] sm:$0xff]  }
 0x458   :  { %10248 = vmatpush3.bf16.msra.mxu1 %v10531_v53  ;;  %10227 = vmatprep.subr.bf16.mxu0 %v10532_v5  ;;  %v10568_v53 = vld [vmem:[#allocation7 + $0x160] sm:$0xff]  }
 0x459   :  { %10249 = vmatprep.subr.bf16.mxu1 %v10533_v7  ;;  %v10569_v5 = vld [vmem:[#allocation7 + $0x1e0] sm:$0xff]  }
 0x45a   :  { %v10570_v7 = vld [vmem:[#allocation7 + $0x120] sm:$0xff]  }
 0x45b   :  { %10228 = vmatpush3.bf16.msra.mxu0 %v10534_v21  ;;  %v1173_v21 = vsub.s32 4, %v10860_v44 }
 0x45c   :  { %10250 = vmatpush3.bf16.msra.mxu1 %v10535_v8  ;;  %10229 = vmatprep.subr.bf16.mxu0 %v10536_v12  ;;  %v10571_v8 = vld [vmem:[#allocation7 + $0x1a0] sm:$0xff]   ;;  %v10572_v12 = vld [vmem:[#allocation7 + $0x168] sm:$0xff]  }
 0x45d   :  { %10251 = vmatprep.subr.bf16.mxu1 %v10537_v13  ;;  %v1181_v13 = vsub.s32 6, %v10860_v44 }
 0x45f   :  { %10230 = vmatpush3.bf16.msra.mxu0 %v10538_v4  ;;  %v10573_v4 = vld [vmem:[#allocation7 + $0x1e8] sm:$0xff]   ;;  %v1182_v24 = vrot.slane %v11029_v29, %v1181_v13 }
 0x460   :  { %10252 = vmatpush3.bf16.msra.mxu1 %v10539_v25  ;;  %10231 = vmatprep.subr.bf16.mxu0 %v10540_v33  ;;  %v10574_v25 = vld [vmem:[#allocation7 + $0x128] sm:$0xff]   ;;  %v1174_v33 = vrot.slane %v11029_v29, %v1173_v21  ;;  %v10583_v29 = vld [vmem:[#allocation7 + $0x1b8] sm:$0xff]  }
 0x461   :  { %10253 = vmatprep.subr.bf16.mxu1 %v10541_v17  ;;  %v10575_v17 = vld [vmem:[#allocation7 + $0x1a8] sm:$0xff]   ;;  %v10403_v34 = vadd.f32 %v10981_v27, %v1182_v24  ;;  %v10587_v27 = vld [vmem:[#allocation7 + $0x280] sm:$0xff]  }
 0x462   :  { %v10401_v30 = vadd.f32 %v10979_v20, %v1174_v33  ;;  %v7676_v20 = vmax.f32 %v11025_v2, 0.0  ;;  %v10591_v2 = vld [vmem:[#allocation7 + $0x288] sm:$0xff]   ;;  %v10617_v33 = vld [vmem:[#allocation7 + $0x3c0] sm:$0xff]  }
 0x463   :  { %10232 = vmatpush3.bf16.msra.mxu0 %v10542_v22  ;;  %v10576_v22 = vld [vmem:[#allocation7 + $0x170] sm:$0xff]   ;;  %v7673_v39 = vmax.f32 %v10403_v34, 0.0  ;;  %v10619_v24 = vld [vmem:[#allocation7 + $0x380] sm:$0xff]  }
 0x464   :  { %10254 = vmatpush3.bf16.msra.mxu1 %v10543_v26  ;;  %10233 = vmatprep.subr.bf16.mxu0 %v10544_v11  ;;  %v10577_v26 = vld [vmem:[#allocation7 + $0x1f0] sm:$0xff]  }
 0x465   :  { %10255 = vmatprep.subr.bf16.mxu1 %v10545_v36  ;;  %v10578_v11 = vld [vmem:[#allocation7 + $0x130] sm:$0xff]   ;;  %v7689_v48 = vpack.c.bf16 %v7673_v39, %v7673_v39  ;;  %v10632_v39 = vld [vmem:[#allocation7 + $0x360] sm:$0xff]  }
 0x466   :  { %v10579_v36 = vld [vmem:[#allocation7 + $0x1b0] sm:$0xff]  }
 0x467   :  { %10234 = vmatpush3.bf16.msra.mxu0 %v10546_v63  ;;  %v10581_v63 = vld [vmem:[#allocation7 + $0x1f8] sm:$0xff]   ;;  %v10626_v34 = vld [vmem:[#allocation7 + $0x310] sm:$0xff]  }
 0x468   :  { %10256 = vmatpush3.bf16.msra.mxu1 %v10547_v37  ;;  %10235 = vmatprep.subr.bf16.mxu0 %v10548_v38  ;;  %v7671_v37 = vmax.f32 %v10401_v30, 0.0  ;;  %v10584_v38 = vld [vmem:[#allocation7 + $0x240] sm:$0xff]   ;;  %v10621_v30 = vld [vmem:[#allocation7 + $0x3c8] sm:$0xff]  }
 0x469   :  { %10257 = vmatprep.subr.bf16.mxu1 %v10549_v41  ;;  %v10585_v41 = vld [vmem:[#allocation7 + $0x2c0] sm:$0xff]  }
 0x46b   :  { %10236 = vmatpush3.bf16.msra.mxu0 %v10550_v47  ;;  %v7687_v47 = vpack.c.bf16 %v7671_v37, %v7671_v37  ;;  %v10629_v37 = vld [vmem:[#allocation7 + $0x3d8] sm:$0xff]  }
 0x46c   :  { %10258 = vmatpush3.bf16.msra.mxu1 %v10551_v49  ;;  %10265 = vmatprep.subr.bf16.mxu0 %v10552_v50  ;;  %v10588_v49 = vld [vmem:[#allocation7 + $0x248] sm:$0xff]   ;;  %v7692_v50 = vpack.c.bf16 %v7676_v20, %v7676_v20  ;;  %v10634_v20 = vld [vmem:[#allocation7 + $0x320] sm:$0xff]  }
 0x46d   :  { %10287 = vmatprep.subr.bf16.mxu1 %v10553_v43  ;;  %v7694_v43 = vpack.c.bf16 %v7678_v42, %v7678_v42  ;;  %v10635_v42 = vld [vmem:[#allocation7 + $0x3a0] sm:$0xff]  }
 0x46e   :  { %8763 = vmatmul.mubr.bf16.vlgmr.msra.gmra.mrb[16].mxu0 %v7683_v51  ;;  %v10595_v51 = vld [vmem:[#allocation7 + $0x290] sm:$0xff]  }
 0x46f   :  { %8803 = vmatmul.mubr.bf16.vlgmr.msra.gmra.mrb[16].mxu1 %v7685_v46  ;;  %10266 = vmatpush3.bf16.msra.mxu0 %v10554_v14  ;;  %v10594_v14 = vld [vmem:[#allocation7 + $0x210] sm:$0xff]   ;;  %v10597_v46 = vld [vmem:[#allocation7 + $0x2d8] sm:$0xff]  }
 0x470   :  { %8842 = vmatprep.mubr.bf16.mxu0 %v7688_v52  ;;  %10288 = vmatpush3.bf16.msra.mxu1 %v10555_v28  ;;  %v10596_v28 = vld [vmem:[#allocation7 + $0x258] sm:$0xff]  }
 0x471   :  { %8882 = vmatprep.mubr.bf16.mxu1 %v7690_v55  ;;  %10267 = vmatprep.subr.bf16.mxu0 %v10556_v31  ;;  %v10598_v31 = vld [vmem:[#allocation7 + $0x218] sm:$0xff]   ;;  %v10601_v55 = vld [vmem:[#allocation7 + $0x2e0] sm:$0xff]  }
 0x472   :  { %10289 = vmatprep.subr.bf16.mxu1 %v10557_v16  ;;  %v10599_v52 = vld [vmem:[#allocation7 + $0x298] sm:$0xff]   ;;  %v10600_v16 = vld [vmem:[#allocation7 + $0x260] sm:$0xff]  }
 0x473   :  { %10268 = vmatpush3.bf16.msra.mxu0 %v10558_v56  ;;  %v10602_v56 = vld [vmem:[#allocation7 + $0x220] sm:$0xff]  }
 0x474   :  { %10290 = vmatpush3.bf16.msra.mxu1 %v10559_v58  ;;  %10269 = vmatprep.subr.bf16.mxu0 %v10560_v15  ;;  %v10603_v58 = vld [vmem:[#allocation7 + $0x2a0] sm:$0xff]   ;;  %v10604_v15 = vld [vmem:[#allocation7 + $0x268] sm:$0xff]  }
 0x475   :  { %10291 = vmatprep.subr.bf16.mxu1 %v10561_v19  ;;  %v10605_v19 = vld [vmem:[#allocation7 + $0x2e8] sm:$0xff]  }
 0x477   :  { %10270 = vmatpush3.bf16.msra.mxu0 %v10562_v23  ;;  %v10606_v23 = vld [vmem:[#allocation7 + $0x228] sm:$0xff]  }
 0x478   :  { %10292 = vmatpush3.bf16.msra.mxu1 %v10563_v54  ;;  %10271 = vmatprep.subr.bf16.mxu0 %v10564_v61  ;;  %v10607_v54 = vld [vmem:[#allocation7 + $0x2a8] sm:$0xff]   ;;  %v10608_v61 = vld [vmem:[#allocation7 + $0x270] sm:$0xff]  }
 0x479   :  { %10293 = vmatprep.subr.bf16.mxu1 %v10565_v62  ;;  %v10609_v62 = vld [vmem:[#allocation7 + $0x2f0] sm:$0xff]  }
 0x47b   :  { %10272 = vmatpush3.bf16.msra.mxu0 %v10566_v0  ;;  %v10610_v0 = vld [vmem:[#allocation7 + $0x230] sm:$0xff]  }
 0x47c   :  { %10294 = vmatpush3.bf16.msra.mxu1 %v10567_v3  ;;  %10273 = vmatprep.subr.bf16.mxu0 %v10568_v53  ;;  %v10611_v3 = vld [vmem:[#allocation7 + $0x2b0] sm:$0xff]   ;;  %v10612_v53 = vld [vmem:[#allocation7 + $0x278] sm:$0xff]  }
 0x47d   :  { %10295 = vmatprep.subr.bf16.mxu1 %v10569_v5  ;;  %v10613_v5 = vld [vmem:[#allocation7 + $0x2f8] sm:$0xff]  }
 0x47f   :  { %10274 = vmatpush3.bf16.msra.mxu0 %v10570_v7  ;;  %v10614_v7 = vld [vmem:[#allocation7 + $0x238] sm:$0xff]  }
 0x480   :  { %10296 = vmatpush3.bf16.msra.mxu1 %v10571_v8  ;;  %10275 = vmatprep.subr.bf16.mxu0 %v10572_v12  ;;  %v7675_v8 = vmax.f32 %v11021_v60, 0.0  ;;  %v10615_v12 = vld [vmem:[#allocation7 + $0x2b8] sm:$0xff]   ;;  %v10622_v60 = vld [vmem:[#allocation7 + $0x308] sm:$0xff]  }
 0x481   :  { %10297 = vmatprep.subr.bf16.mxu1 %v10573_v4  ;;  %v10616_v4 = vld [vmem:[#allocation7 + $0x340] sm:$0xff]  }
 0x483   :  { %10276 = vmatpush3.bf16.msra.mxu0 %v10574_v25  ;;  %v7677_v25 = vmax.f32 %v11023_v1, 0.0  ;;  %v10624_v1 = vld [vmem:[#allocation7 + $0x350] sm:$0xff]  }
 0x484   :  { %10298 = vmatpush3.bf16.msra.mxu1 %v10575_v17  ;;  %10277 = vmatprep.subr.bf16.mxu0 %v10576_v22  ;;  %v10618_v17 = vld [vmem:[#allocation7 + $0x300] sm:$0xff]   ;;  %v7691_v22 = vpack.c.bf16 %v7675_v8, %v7675_v8 }
 0x485   :  { %10299 = vmatprep.subr.bf16.mxu1 %v10577_v26  ;;  %v10620_v26 = vld [vmem:[#allocation7 + $0x348] sm:$0xff]  }
 0x487   :  { %10278 = vmatpush3.bf16.msra.mxu0 %v10578_v11  ;;  %v7693_v11 = vpack.c.bf16 %v7677_v25, %v7677_v25 }
 0x488   :  { %10300 = vmatpush3.bf16.msra.mxu1 %v10579_v36  ;;  %10279 = vmatprep.subr.bf16.mxu0 %v10580_v32  ;;  %v10623_v36 = vld [vmem:[#allocation7 + $0x388] sm:$0xff]   ;;  %v10625_v32 = vld [vmem:[#allocation7 + $0x3d0] sm:$0xff]  }
 0x489   :  { %10301 = vmatprep.subr.bf16.mxu1 %v10581_v63  ;;  %v10627_v63 = vld [vmem:[#allocation7 + $0x390] sm:$0xff]  }
 0x48b   :  { %10280 = vmatpush3.bf16.msra.mxu0 %v10582_v57  ;;  %v10628_v57 = vld [vmem:[#allocation7 + $0x358] sm:$0xff]  }
 0x48c   :  { %10302 = vmatpush3.bf16.msra.mxu1 %v10583_v29  ;;  %10309 = vmatprep.subr.bf16.mxu0 %v10584_v38  ;;  %v10630_v29 = vld [vmem:[#allocation7 + $0x318] sm:$0xff]  }
 0x48d   :  { %10331 = vmatprep.subr.bf16.mxu1 %v10585_v41  ;;  %v10631_v38 = vld [vmem:[#allocation7 + $0x398] sm:$0xff]   ;;  %v10633_v41 = vld [vmem:[#allocation7 + $0x3e0] sm:$0xff]  }
 0x48e   :  { %8843 = vmatmul.mubr.bf16.vlgmr.msra.gmra.mrb[20].mxu0 %v7687_v47  ;;  %v10637_v47 = vld [vmem:[#allocation7 + $0x3e8] sm:$0xff]  }
 0x48f   :  { %8883 = vmatmul.mubr.bf16.vlgmr.msra.gmra.mrb[20].mxu1 %v7689_v48  ;;  %10310 = vmatpush3.bf16.msra.mxu0 %v10586_v45  ;;  %v10636_v45 = vld [vmem:[#allocation7 + $0x368] sm:$0xff]  }
 0x490   :  { %8922 = vmatprep.mubr.bf16.mxu0 %v7692_v50  ;;  %10332 = vmatpush3.bf16.msra.mxu1 %v10587_v27  ;;  %v10638_v27 = vld [vmem:[#allocation7 + $0x328] sm:$0xff]   ;;  %v10641_v50 = vld [vmem:[#allocation7 + $0x3f0] sm:$0xff]  }
 0x491   :  { %8962 = vmatprep.mubr.bf16.mxu1 %v7694_v43  ;;  %10311 = vmatprep.subr.bf16.mxu0 %v10588_v49  ;;  %v10639_v48 = vld [vmem:[#allocation7 + $0x3a8] sm:$0xff]   ;;  %v10640_v49 = vld [vmem:[#allocation7 + $0x370] sm:$0xff]  }
 0x492   :  { %10333 = vmatprep.subr.bf16.mxu1 %v10589_v10  ;;  %v10642_v10 = vld [vmem:[#allocation7 + $0x330] sm:$0xff]  }
 0x493   :  { %10312 = vmatpush3.bf16.msra.mxu0 %v10590_v40  ;;  %v10643_v43 = vld [vmem:[#allocation7 + $0x3b0] sm:$0xff]   ;;  %v10644_v40 = vld [vmem:[#allocation7 + $0x378] sm:$0xff]  }
 0x494   :  { %10334 = vmatpush3.bf16.msra.mxu1 %v10591_v2  ;;  %10313 = vmatprep.subr.bf16.mxu0 %v10592_v6  ;;  %v10645_v2 = vld [vmem:[#allocation7 + $0x3f8] sm:$0xff]  }
 0x495   :  { %10335 = vmatprep.subr.bf16.mxu1 %v10593_v9  ;;  %v10646_v6 = vld [vmem:[#allocation7 + $0x338] sm:$0xff]  }
 0x496   :  { %v10647_v9 = vld [vmem:[#allocation7 + $0x3b8] sm:$0xff]  }
 0x497   :  { %10314 = vmatpush3.bf16.msra.mxu0 %v10594_v14  ;;  %v1206_v14 = vrot.slane %v11003_v35, %v1173_v21 }
 0x498   :  { %10336 = vmatpush3.bf16.msra.mxu1 %v10595_v51  ;;  %10315 = vmatprep.subr.bf16.mxu0 %v10596_v28  ;;  %v1214_v51 = vrot.slane %v11003_v35, %v1181_v13  ;;  %v1210_v28 = vrot.slane %v11003_v35, %v1177_v18 }
 0x499   :  { %10337 = vmatprep.subr.bf16.mxu1 %v10597_v46  ;;  %v1218_v46 = vrot.slane %v11003_v35, %v1185_v59 }
 0x49b   :  { %10316 = vmatpush3.bf16.msra.mxu0 %v10598_v31 }
 0x49c   :  { %10338 = vmatpush3.bf16.msra.mxu1 %v10599_v52  ;;  %10317 = vmatprep.subr.bf16.mxu0 %v10600_v16 }
 0x49d   :  { %10339 = vmatprep.subr.bf16.mxu1 %v10601_v55 }
 0x49f   :  { %10318 = vmatpush3.bf16.msra.mxu0 %v10602_v56 }
 0x4a0   :  { %10340 = vmatpush3.bf16.msra.mxu1 %v10603_v58  ;;  %10319 = vmatprep.subr.bf16.mxu0 %v10604_v15 }
 0x4a1   :  { %10341 = vmatprep.subr.bf16.mxu1 %v10605_v19 }
 0x4a3   :  { %10320 = vmatpush3.bf16.msra.mxu0 %v10606_v23 }
 0x4a4   :  { %10342 = vmatpush3.bf16.msra.mxu1 %v10607_v54  ;;  %10321 = vmatprep.subr.bf16.mxu0 %v10608_v61 }
 0x4a5   :  { %10343 = vmatprep.subr.bf16.mxu1 %v10609_v62 }
 0x4a7   :  { %10322 = vmatpush3.bf16.msra.mxu0 %v10610_v0 }
 0x4a8   :  { %10344 = vmatpush3.bf16.msra.mxu1 %v10611_v3  ;;  %10323 = vmatprep.subr.bf16.mxu0 %v10612_v53 }
 0x4a9   :  { %10345 = vmatprep.subr.bf16.mxu1 %v10613_v5 }
 0x4ab   :  { %10324 = vmatpush3.bf16.msra.mxu0 %v10614_v7  ;;  %v10092_v7 = vld [vmem:[#allocation8] ss:$0 sm:$0xff] }
 0x4ac   :  { %10346 = vmatpush3.bf16.msra.mxu1 %v10615_v12  ;;  %10353 = vmatprep.subr.bf16.mxu0 %v10616_v4 }
 0x4ad   :  { %10375 = vmatprep.subr.bf16.mxu1 %v10617_v33 }
 0x4ae   :  { %8923 = vmatmul.mubr.bf16.vlgmr.msra.gmra.mrb[24].mxu0 %v7691_v22 }
 0x4af   :  { %8963 = vmatmul.mubr.bf16.vlgmr.msra.gmra.mrb[24].mxu1 %v7693_v11  ;;  %10354 = vmatpush3.bf16.msra.mxu0 %v10618_v17 }
 0x4b0   :  { %10376 = vmatpush3.bf16.msra.mxu1 %v10619_v24  ;;  %10355 = vmatprep.subr.bf16.mxu0 %v10620_v26 }
 0x4b1   :  { %10377 = vmatprep.subr.bf16.mxu1 %v10621_v30 }
 0x4b3   :  { %10356 = vmatpush3.bf16.msra.mxu0 %v10622_v60 }
 0x4b4   :  { %10378 = vmatpush3.bf16.msra.mxu1 %v10623_v36  ;;  %10357 = vmatprep.subr.bf16.mxu0 %v10624_v1 }
 0x4b5   :  { %10379 = vmatprep.subr.bf16.mxu1 %v10625_v32 }
 0x4b7   :  { %10358 = vmatpush3.bf16.msra.mxu0 %v10626_v34 }
 0x4b8   :  { %10380 = vmatpush3.bf16.msra.mxu1 %v10627_v63  ;;  %10359 = vmatprep.subr.bf16.mxu0 %v10628_v57 }
 0x4b9   :  { %10381 = vmatprep.subr.bf16.mxu1 %v10629_v37 }
 0x4bb   :  { %10360 = vmatpush3.bf16.msra.mxu0 %v10630_v29 }
 0x4bc   :  { %10382 = vmatpush3.bf16.msra.mxu1 %v10631_v38  ;;  %10361 = vmatprep.subr.bf16.mxu0 %v10632_v39 }
 0x4bd   :  { %10383 = vmatprep.subr.bf16.mxu1 %v10633_v41 }
 0x4bf   :  { %10362 = vmatpush3.bf16.msra.mxu0 %v10634_v20 }
 0x4c0   :  { %10384 = vmatpush3.bf16.msra.mxu1 %v10635_v42  ;;  %10363 = vmatprep.subr.bf16.mxu0 %v10636_v45 }
 0x4c1   :  { %10385 = vmatprep.subr.bf16.mxu1 %v10637_v47 }
 0x4c3   :  { %10364 = vmatpush3.bf16.msra.mxu0 %v10638_v27 }
 0x4c4   :  { %10386 = vmatpush3.bf16.msra.mxu1 %v10639_v48  ;;  %10365 = vmatprep.subr.bf16.mxu0 %v10640_v49 }
 0x4c5   :  { %10387 = vmatprep.subr.bf16.mxu1 %v10641_v50 }
 0x4c7   :  { %10366 = vmatpush3.bf16.msra.mxu0 %v10642_v10 }
 0x4c8   :  { %10388 = vmatpush3.bf16.msra.mxu1 %v10643_v43  ;;  %10367 = vmatprep.subr.bf16.mxu0 %v10644_v40 }
 0x4c9   :  { %10389 = vmatprep.subr.bf16.mxu1 %v10645_v2 }
 0x4cb   :  { %10368 = vmatpush3.bf16.msra.mxu0 %v10646_v6 }
 0x4cc   :  { %10390 = vmatpush3.bf16.msra.mxu1 %v10647_v9 }
 0x521   :  { %v7496_v31 = vpop.f32.mrb[12].mxu0  ;;  %v7660_v16 = vpop.f32.mrb[12].mxu1 }
 0x522   :  { %v10409_v52 = vadd.f32 %v7496_v31, %v1206_v14  ;;  %v7498_v55 = vpop.f32.mrb[13].mxu0  ;;  %v10411_v56 = vadd.f32 %v7660_v16, %v1214_v51  ;;  %v7662_v15 = vpop.f32.mrb[13].mxu1 }
 0x523   :  { %v10410_v58 = vadd.f32 %v7498_v55, %v1210_v28  ;;  %v7500_v21 = vpop.f32.mrb[14].mxu0  ;;  %v10412_v23 = vadd.f32 %v7662_v15, %v1218_v46  ;;  %v7664_v54 = vpop.f32.mrb[14].mxu1 }
 0x524   :  { %v7679_v19 = vmax.f32 %v10409_v52, 0.0  ;;  %v7501_v13 = vpop.f32.mrb[15].mxu0  ;;  %v7681_v61 = vmax.f32 %v10411_v56, 0.0  ;;  %v7665_v0 = vpop.f32.mrb[15].mxu1 }
 0x525   :  { %v7680_v62 = vmax.f32 %v10410_v58, 0.0  ;;  %v7682_v18 = vmax.f32 %v10412_v23, 0.0 }
 0x526   :  { %v7695_v44 = vpack.c.bf16 %v7679_v19, %v7679_v19  ;;  %v7697_v35 = vpack.c.bf16 %v7681_v61, %v7681_v61 }
 0x527   :  { %v7696_v3 = vpack.c.bf16 %v7680_v62, %v7680_v62  ;;  %v7698_v53 = vpack.c.bf16 %v7682_v18, %v7682_v18 }
 0x529   :  { %9002 = vmatprep.mubr.bf16.mxu0 %v7696_v3  ;;  %9042 = vmatprep.mubr.bf16.mxu1 %v7698_v53 }
 0x52a   :  { %9003 = vmatmul.mubr.bf16.vlgmr.msra.gmra.mrb[28].mxu0 %v7695_v44  ;;  %9043 = vmatmul.mubr.bf16.vlgmr.msra.gmra.mrb[28].mxu1 %v7697_v35 }
 0x541   :  { %v10237_v59 = vpop.f32.mrb[16].mxu0 }
 0x542   :  { %v10259_v5 = vpop.f32.mrb[16].mxu1  ;;  %v10238_v8 = vpop.f32.mrb[17].mxu0 }
 0x543   :  { %v10239_v12 = vadd.f32 %v10238_v8, %v10237_v59  ;;  %v10260_v4 = vpop.f32.mrb[17].mxu1  ;;  %v10240_v25 = vpop.f32.mrb[18].mxu0 }
 0x544   :  { %v10261_v33 = vadd.f32 %v10260_v4, %v10259_v5  ;;  %v10262_v17 = vpop.f32.mrb[18].mxu1  ;;  %v10241_v22 = vpop.f32.mrb[19].mxu0 }
 0x545   :  { %v8765_v24 = vadd.f32 %v10239_v12, %v10092_v7  ;;  %v10263_v26 = vpop.f32.mrb[19].mxu1 }
 0x547   :  { %v8805_v11 = vadd.f32 %v10261_v33, %v8765_v24 }
 0x561   :  { %v10281_v30 = vpop.f32.mrb[20].mxu0 }
 0x562   :  { %v10303_v60 = vpop.f32.mrb[20].mxu1  ;;  %v10282_v36 = vpop.f32.mrb[21].mxu0 }
 0x563   :  { %v10283_v1 = vadd.f32 %v10282_v36, %v10281_v30  ;;  %v10304_v32 = vpop.f32.mrb[21].mxu1  ;;  %v10284_v34 = vpop.f32.mrb[22].mxu0 }
 0x564   :  { %v10305_v63 = vadd.f32 %v10304_v32, %v10303_v60  ;;  %v10306_v57 = vpop.f32.mrb[22].mxu1  ;;  %v10285_v37 = vpop.f32.mrb[23].mxu0 }
 0x565   :  { %v8845_v29 = vadd.f32 %v10283_v1, %v8805_v11  ;;  %v10307_v38 = vpop.f32.mrb[23].mxu1 }
 0x567   :  { %v8885_v39 = vadd.f32 %v10305_v63, %v8845_v29 }
 0x581   :  { %v10325_v41 = vpop.f32.mrb[24].mxu0 }
 0x582   :  { %v10347_v20 = vpop.f32.mrb[24].mxu1  ;;  %v10326_v42 = vpop.f32.mrb[25].mxu0 }
 0x583   :  { %v10327_v45 = vadd.f32 %v10326_v42, %v10325_v41  ;;  %v10348_v47 = vpop.f32.mrb[25].mxu1  ;;  %v10328_v27 = vpop.f32.mrb[26].mxu0 }
 0x584   :  { %v10349_v48 = vadd.f32 %v10348_v47, %v10347_v20  ;;  %v10350_v49 = vpop.f32.mrb[26].mxu1  ;;  %v10329_v50 = vpop.f32.mrb[27].mxu0 }
 0x585   :  { %v8925_v10 = vadd.f32 %v10327_v45, %v8885_v39  ;;  %v10351_v43 = vpop.f32.mrb[27].mxu1 }
 0x587   :  { %v8965_v40 = vadd.f32 %v10349_v48, %v8925_v10 }
 0x5fd   :  { %v10369_v2 = vpop.f32.mrb[28].mxu0  ;;  %v10391_v6 = vpop.f32.mrb[28].mxu1 }
 0x5fe   :  { %v10370_v9 = vpop.f32.mrb[29].mxu0  ;;  %v10392_v51 = vpop.f32.mrb[29].mxu1 }
 0x5ff   :  { %v10371_v14 = vadd.f32 %v10370_v9, %v10369_v2  ;;  %v10372_v28 = vpop.f32.mrb[30].mxu0  ;;  %v10393_v46 = vadd.f32 %v10392_v51, %v10391_v6  ;;  %v10394_v31 = vpop.f32.mrb[30].mxu1 }
 0x600   :  { %v10373_v52 = vpop.f32.mrb[31].mxu0  ;;  %v10395_v55 = vpop.f32.mrb[31].mxu1 }
 0x601   :  { %v9005_v16 = vadd.f32 %v10371_v14, %v8965_v40 }
 0x603   :  { %v9045_v56 = vadd.f32 %v10393_v46, %v9005_v16 }
 0x605   :  { %9050 = vst [vmem:[#allocation10] sm:$0x3] %v9045_v56 }
 0x606   :  { %10747 = shalt.err (!%p10744_p8)
}
 0x607   :  { %s10748_s24 = scalar_lea.hbm %s11102_s5, 32 }
 0x608   :  { %p10749_p9 = scmp.ne.s32.totalorder %s11102_s5, %s10748_s24  ;;  %p10752_p10 = scmp.lt.u32.totalorder %s10748_s24, %s11102_s5 }
 0x60a   :  { %p10754_p11 = pnand %p10752_p10, %p10749_p9 }
 0x60c   :  { %10757 = shalt.err (!%p10754_p11)
}
 0x60d   :  { %9060 = dma.vmem_to_hbm [thread:$0]  %s9058_s19, 32, %s11102_s5, [#allocation4]  }
 0x60e   :  { %10764 = dma.done.wait [#allocation4], 32  }
 0x60f   :  { %10765 = vsyncadd [#allocation4], 4294967264 }
 0x610   :  { %9064 = vsyncpa [#allocation3], 1 }
 0x611   :  { %9065 = vsyncpa [#allocation6], 1 }
 0x612   :  { %9066 = vsyncpa [#allocation9], 1 }
 0x613   :  { %9067 = vsyncpa [#allocation4], 1 }

</bundles_post_ra>
